<compile_context>
chip_gen: v7x
topology: tpu7x:2x2x1
jax: 0.10.0
libtpu: 0.0.40
codegen_flags: <defaults>
</compile_context>

<pallas_src>
import functools

import jax
import jax.numpy as jnp
from jax import lax
from jax.experimental import pallas as pl
from jax.experimental.pallas import tpu as pltpu

KSIZE = 7
PAD = 3    # 'same' padding for kernel_size=7
SUB = 8    # sublane group size for the streaming channel reduction


def _pick_c_chunk(C, HW, itemsize, budget_bytes=2 * 1024 * 1024):
    """Largest channel chunk that (a) divides C, (b) keeps the x block within
    a small VMEM budget, and (c) satisfies the TPU sublane constraint
    (multiple of 8, or equal to the full C dim)."""
    if C * HW * itemsize <= budget_bytes:
        return C
    max_rows = max(SUB, budget_bytes // max(1, HW * itemsize))
    d = (max_rows // SUB) * SUB
    while d >= SUB:
        if C % d == 0:
            return d
        d -= SUB
    return C  # no aligned divisor fits the budget; fall back to full C


def _spatial_attention_kernel(w_ref, x_ref, o_ref,
                              sum_acc, max_acc, avg_pad, max_pad,
                              *, C, H, W, c_chunk):
    # w_ref:    SMEM (2*7*7,) f32 conv weight, index = c*49 + ky*7 + kx
    # x_ref:    VMEM (1, c_chunk, H*W) lane-dense input block
    # o_ref:    VMEM (1, 1, H, W) output block (written on last C step only)
    # sum_acc:  VMEM (1, H*W) f32 running channel sum
    # max_acc:  VMEM (1, H*W) f32 running channel max
    # avg_pad / max_pad: VMEM (H+6, W+6) f32 zero-padded maps for the conv
    HW = H * W
    ci = pl.program_id(1)
    nc = pl.num_programs(1)

    # ---- init accumulators on the first C chunk of each image ------------
    @pl.when(ci == 0)
    def _():
        sum_acc[...] = jnp.zeros_like(sum_acc)
        max_acc[...] = jnp.full_like(max_acc, -jnp.inf)

    # ---- streaming, lane-dense channel reduction over this chunk ---------
    n_full = c_chunk // SUB
    rem = c_chunk % SUB

    s = jnp.zeros((1, HW), jnp.float32)
    m = jnp.full((1, HW), -jnp.inf, jnp.float32)

    if n_full > 0:
        def body(i, carry):
            ps, pm = carry
            start = pl.multiple_of(i * SUB, SUB)
            blk = x_ref[0, pl.ds(start, SUB), :].astype(jnp.float32)
            return (ps + jnp.sum(blk, axis=0, keepdims=True),
                    jnp.maximum(pm, jnp.max(blk, axis=0, keepdims=True)))
        s, m = lax.fori_loop(0, n_full, body, (s, m))

    if rem > 0:
        blk = x_ref[0, pl.ds(n_full * SUB, rem), :].astype(jnp.float32)
        s = s + jnp.sum(blk, axis=0, keepdims=True)
        m = jnp.maximum(m, jnp.max(blk, axis=0, keepdims=True))

    sum_acc[...] = sum_acc[...] + s
    max_acc[...] = jnp.maximum(max_acc[...], m)

    # ---- finalize on the last C chunk: 7x7 conv + sigmoid ----------------
    @pl.when(ci == nc - 1)
    def _():
        # Zero only the 3-wide borders (interior is fully overwritten below).
        # Done every image so scratch reuse / megacore splitting can never
        # leave stale border values.
        zrow = jnp.zeros((PAD, W + 2 * PAD), jnp.float32)
        zcol = jnp.zeros((H, PAD), jnp.float32)
        for buf in (avg_pad, max_pad):
            buf[pl.ds(0, PAD), :] = zrow
            buf[pl.ds(PAD + H, PAD), :] = zrow
            buf[pl.ds(PAD, H), pl.ds(0, PAD)] = zcol
            buf[pl.ds(PAD, H), pl.ds(PAD + W, PAD)] = zcol

        # Unflatten the lane-dense (1, H*W) maps into the padded 2-D scratch
        # with plain ref slices (avoids an in-kernel reshape/relayout).
        inv_c = jnp.float32(1.0 / C)
        for h in range(H):
            row_s = sum_acc[pl.ds(0, 1), pl.ds(h * W, W)]
            row_m = max_acc[pl.ds(0, 1), pl.ds(h * W, W)]
            avg_pad[pl.ds(PAD + h, 1), pl.ds(PAD, W)] = row_s * inv_c
            max_pad[pl.ds(PAD + h, 1), pl.ds(PAD, W)] = row_m

        # 7x7 conv, 2 in-channels -> 1 out-channel, statically unrolled with
        # 4 independent accumulators (avg/max x even/odd ky) for VALU ILP.
        acc_a0 = jnp.zeros((H, W), jnp.float32)
        acc_a1 = jnp.zeros((H, W), jnp.float32)
        acc_m0 = jnp.zeros((H, W), jnp.float32)
        acc_m1 = jnp.zeros((H, W), jnp.float32)
        for ky in range(KSIZE):
            for kx in range(KSIZE):
                w_avg = w_ref[0 * KSIZE * KSIZE + ky * KSIZE + kx]
                w_max = w_ref[1 * KSIZE * KSIZE + ky * KSIZE + kx]
                a_sl = avg_pad[pl.ds(ky, H), pl.ds(kx, W)]
                m_sl = max_pad[pl.ds(ky, H), pl.ds(kx, W)]
                if ky % 2 == 0:
                    acc_a0 = acc_a0 + w_avg * a_sl
                    acc_m0 = acc_m0 + w_max * m_sl
                else:
                    acc_a1 = acc_a1 + w_avg * a_sl
                    acc_m1 = acc_m1 + w_max * m_sl
        acc = (acc_a0 + acc_a1) + (acc_m0 + acc_m1)
        o_ref[0, 0] = jax.nn.sigmoid(acc).astype(o_ref.dtype)


def spatial_attention(x, conv_weight):
    """x: (N, C, H, W); conv_weight: (1, 2, 7, 7) -> (N, 1, H, W)."""
    N, C, H, W = x.shape
    HW = H * W
    itemsize = jnp.dtype(x.dtype).itemsize

    x_flat = x.reshape(N, C, HW)                           # free: contiguous
    w_flat = conv_weight.reshape(-1).astype(jnp.float32)   # (98,)

    c_chunk = _pick_c_chunk(C, HW, itemsize)
    assert C % c_chunk == 0
    n_c = C // c_chunk

    # Explicit scoped-VMEM budget: double-buffered x block + output block +
    # scratch (lane-padded upper bounds), with headroom above the default.
    x_blk = c_chunk * HW * itemsize
    o_blk = H * 128 * max(itemsize, 4)
    scratch = 2 * 8 * HW * 4 + 2 * (H + 2 * PAD) * 128 * 4
    needed = 2 * x_blk + 2 * o_blk + scratch
    vmem_limit = int(min(32 * 1024 * 1024, max(2 * needed, 8 * 1024 * 1024)))

    kernel = functools.partial(
        _spatial_attention_kernel, C=C, H=H, W=W, c_chunk=c_chunk)

    return pl.pallas_call(
        kernel,
        out_shape=jax.ShapeDtypeStruct((N, 1, H, W), x.dtype),
        grid_spec=pltpu.PrefetchScalarGridSpec(
            num_scalar_prefetch=0,
            grid=(N, n_c),                           # reduction (C) axis last
            in_specs=[
                pl.BlockSpec(memory_space=pltpu.MemorySpace.SMEM),  # weights
                pl.BlockSpec((1, c_chunk, HW), lambda n, c: (n, c, 0)),
            ],
            out_specs=pl.BlockSpec((1, 1, H, W), lambda n, c: (n, 0, 0, 0)),
            scratch_shapes=[
                pltpu.VMEM((1, HW), jnp.float32),                     # sum
                pltpu.VMEM((1, HW), jnp.float32),                     # max
                pltpu.VMEM((H + 2 * PAD, W + 2 * PAD), jnp.float32),  # avg_pad
                pltpu.VMEM((H + 2 * PAD, W + 2 * PAD), jnp.float32),  # max_pad
            ],
        ),
        compiler_params=pltpu.CompilerParams(
            dimension_semantics=("parallel", "arbitrary"),
            vmem_limit_bytes=vmem_limit,
        ),
    )(w_flat, x_flat)


def spatial_attention_ref(x, conv_weight):
    avg = jnp.mean(x, axis=1, keepdims=True)
    mx = jnp.max(x, axis=1, keepdims=True)
    cat = jnp.concatenate([avg, mx], axis=1)  # (N, 2, H, W)
    y = lax.conv_general_dilated(
        cat, conv_weight, window_strides=(1, 1),
        padding=[(PAD, PAD), (PAD, PAD)],
        dimension_numbers=("NCHW", "OIHW", "NCHW"),
    )
    return jax.nn.sigmoid(y)


if __name__ == "__main__":
    key = jax.random.PRNGKey(0)
    kx_key, kw_key = jax.random.split(key)

    N, C, H, W = 2, 4, 16, 16
    x = jax.random.normal(kx_key, (N, C, H, W), dtype=jnp.float32)

    # Conv2d(2, 1, 7, bias=False) weight, PyTorch-style kaiming-uniform bound.
    fan_in = 2 * KSIZE * KSIZE
    bound = 1.0 / (fan_in ** 0.5)
    conv_weight = jax.random.uniform(
        kw_key, (1, 2, KSIZE, KSIZE), minval=-bound, maxval=bound,
        dtype=jnp.float32)

    out = spatial_attention(x, conv_weight)
    out = jax.block_until_ready(out)

    ref = spatial_attention_ref(x, conv_weight)
    assert out.shape == (N, 1, H, W)
    assert jnp.allclose(out, ref, atol=1e-5, rtol=1e-5), "mismatch vs reference"

    print("KERNEL_OK")
</pallas_src>

<mosaic_0001>
module attributes {stable_mosaic.version = 11 : i64} {
  func.func @_spatial_attention_kernel(%arg0: i32, %arg1: i32, %arg2: memref<98xf32, #tpu.memory_space<smem>>, %arg3: memref<1x4x256xf32, #tpu.memory_space<vmem>>, %arg4: memref<1x1x16x16xf32, #tpu.memory_space<vmem>>, %arg5: memref<1x256xf32, #tpu.memory_space<vmem>>, %arg6: memref<1x256xf32, #tpu.memory_space<vmem>>, %arg7: memref<22x22xf32, #tpu.memory_space<vmem>>, %arg8: memref<22x22xf32, #tpu.memory_space<vmem>>) attributes {dimension_semantics = [#tpu.dimension_semantics<parallel>, #tpu.dimension_semantics<arbitrary>], iteration_bounds = array<i64: 2, 1>, scalar_prefetch = 0 : i64, scratch_operands = 4 : i64, tpu.core_type = #tpu.core_type<tc>, window_params = [{transform_indices = @transform_0, window_bounds = array<i64: 98>}, {transform_indices = @transform_1, window_bounds = array<i64: 1, 4, 256>}, {transform_indices = @transform_2, window_bounds = array<i64: 1, 1, 16, 16>}]} {
    %c0_i32 = arith.constant 0 : i32
    %0 = arith.cmpi eq, %arg1, %c0_i32 : i32
    %1 = arith.extui %0 : i1 to i32
    %c0_i32_0 = arith.constant 0 : i32
    %2 = arith.cmpi ne, %1, %c0_i32_0 : i32
    scf.if %2 {
      %cst_16 = arith.constant 0.000000e+00 : f32
      %22 = vector.broadcast %cst_16 : f32 to vector<1x256xf32>
      %c0_17 = arith.constant 0 : index
      %c0_18 = arith.constant 0 : index
      %23 = vector.load %arg5[%c0_17, %c0_18] : memref<1x256xf32, #tpu.memory_space<vmem>>, vector<1x256xf32>
      tpu.vector_store %arg5[%c0_17, %c0_18], %22 {strides = array<i32>} : memref<1x256xf32, #tpu.memory_space<vmem>>, vector<1x256xf32>,
      %cst_19 = arith.constant 0xFF800000 : f32
      %24 = vector.broadcast %cst_19 : f32 to vector<1x256xf32>
      %c0_20 = arith.constant 0 : index
      %c0_21 = arith.constant 0 : index
      %25 = vector.load %arg6[%c0_20, %c0_21] : memref<1x256xf32, #tpu.memory_space<vmem>>, vector<1x256xf32>
      tpu.vector_store %arg6[%c0_20, %c0_21], %24 {strides = array<i32>} : memref<1x256xf32, #tpu.memory_space<vmem>>, vector<1x256xf32>,
    } else {
    }
    %cst = arith.constant 0.000000e+00 : f32
    %3 = vector.broadcast %cst : f32 to vector<1x256xf32>
    %cst_1 = arith.constant 0xFF800000 : f32
    %4 = vector.broadcast %cst_1 : f32 to vector<1x256xf32>
    %c0 = arith.constant 0 : index
    %c0_2 = arith.constant 0 : index
    %c0_3 = arith.constant 0 : index
    %5 = vector.load %arg3[%c0, %c0_2, %c0_3] : memref<1x4x256xf32, #tpu.memory_space<vmem>>, vector<1x4x256xf32>
    %6 = vector.shape_cast %5 : vector<1x4x256xf32> to vector<4x256xf32>
    %cst_4 = arith.constant dense<0.000000e+00> : vector<256xf32>
    %7 = vector.multi_reduction <add>, %6, %cst_4 [0] : vector<4x256xf32> to vector<256xf32>
    %8 = vector.shape_cast %7 : vector<256xf32> to vector<1x256xf32>
    %9 = arith.addf %3, %8 : vector<1x256xf32>
    %cst_5 = arith.constant dense<0xFF800000> : vector<256xf32>
    %10 = vector.multi_reduction <maximumf>, %6, %cst_5 [0] : vector<4x256xf32> to vector<256xf32>
    %11 = vector.shape_cast %10 : vector<256xf32> to vector<1x256xf32>
    %12 = arith.maximumf %4, %11 : vector<1x256xf32>
    %c0_6 = arith.constant 0 : index
    %c0_7 = arith.constant 0 : index
    %13 = vector.load %arg5[%c0_6, %c0_7] : memref<1x256xf32, #tpu.memory_space<vmem>>, vector<1x256xf32>
    %14 = arith.addf %13, %9 : vector<1x256xf32>
    %c0_8 = arith.constant 0 : index
    %c0_9 = arith.constant 0 : index
    %15 = vector.load %arg5[%c0_8, %c0_9] : memref<1x256xf32, #tpu.memory_space<vmem>>, vector<1x256xf32>
    tpu.vector_store %arg5[%c0_8, %c0_9], %14 {strides = array<i32>} : memref<1x256xf32, #tpu.memory_space<vmem>>, vector<1x256xf32>,
    %c0_10 = arith.constant 0 : index
    %c0_11 = arith.constant 0 : index
    %16 = vector.load %arg6[%c0_10, %c0_11] : memref<1x256xf32, #tpu.memory_space<vmem>>, vector<1x256xf32>
    %17 = arith.maximumf %16, %12 : vector<1x256xf32>
    %c0_12 = arith.constant 0 : index
    %c0_13 = arith.constant 0 : index
    %18 = vector.load %arg6[%c0_12, %c0_13] : memref<1x256xf32, #tpu.memory_space<vmem>>, vector<1x256xf32>
    tpu.vector_store %arg6[%c0_12, %c0_13], %17 {strides = array<i32>} : memref<1x256xf32, #tpu.memory_space<vmem>>, vector<1x256xf32>,
    %c0_i32_14 = arith.constant 0 : i32
    %19 = arith.cmpi eq, %arg1, %c0_i32_14 : i32
    %20 = arith.extui %19 : i1 to i32
    %c0_i32_15 = arith.constant 0 : i32
    %21 = arith.cmpi ne, %20, %c0_i32_15 : i32
    scf.if %21 {
      %cst_16 = arith.constant 0.000000e+00 : f32
      %22 = vector.broadcast %cst_16 : f32 to vector<3x22xf32>
      %cst_17 = arith.constant 0.000000e+00 : f32
      %23 = vector.broadcast %cst_17 : f32 to vector<16x3xf32>
      %c0_18 = arith.constant 0 : index
      %c0_19 = arith.constant 0 : index
      %24 = vector.load %arg7[%c0_18, %c0_19] : memref<22x22xf32, #tpu.memory_space<vmem>>, vector<3x22xf32>
      tpu.vector_store %arg7[%c0_18, %c0_19], %22 {strides = array<i32>} : memref<22x22xf32, #tpu.memory_space<vmem>>, vector<3x22xf32>,
      %c19 = arith.constant 19 : index
      %c0_20 = arith.constant 0 : index
      %25 = vector.load %arg7[%c19, %c0_20] : memref<22x22xf32, #tpu.memory_space<vmem>>, vector<3x22xf32>
      tpu.vector_store %arg7[%c19, %c0_20], %22 {strides = array<i32>} : memref<22x22xf32, #tpu.memory_space<vmem>>, vector<3x22xf32>,
      %c3 = arith.constant 3 : index
      %c0_21 = arith.constant 0 : index
      %26 = vector.load %arg7[%c3, %c0_21] : memref<22x22xf32, #tpu.memory_space<vmem>>, vector<16x3xf32>
      tpu.vector_store %arg7[%c3, %c0_21], %23 {strides = array<i32>} : memref<22x22xf32, #tpu.memory_space<vmem>>, vector<16x3xf32>,
      %c3_22 = arith.constant 3 : index
      %c19_23 = arith.constant 19 : index
      %27 = vector.load %arg7[%c3_22, %c19_23] : memref<22x22xf32, #tpu.memory_space<vmem>>, vector<16x3xf32>
      tpu.vector_store %arg7[%c3_22, %c19_23], %23 {strides = array<i32>} : memref<22x22xf32, #tpu.memory_space<vmem>>, vector<16x3xf32>,
      %c0_24 = arith.constant 0 : index
      %c0_25 = arith.constant 0 : index
      %28 = vector.load %arg8[%c0_24, %c0_25] : memref<22x22xf32, #tpu.memory_space<vmem>>, vector<3x22xf32>
      tpu.vector_store %arg8[%c0_24, %c0_25], %22 {strides = array<i32>} : memref<22x22xf32, #tpu.memory_space<vmem>>, vector<3x22xf32>,
      %c19_26 = arith.constant 19 : index
      %c0_27 = arith.constant 0 : index
      %29 = vector.load %arg8[%c19_26, %c0_27] : memref<22x22xf32, #tpu.memory_space<vmem>>, vector<3x22xf32>
      tpu.vector_store %arg8[%c19_26, %c0_27], %22 {strides = array<i32>} : memref<22x22xf32, #tpu.memory_space<vmem>>, vector<3x22xf32>,
      %c3_28 = arith.constant 3 : index
      %c0_29 = arith.constant 0 : index
      %30 = vector.load %arg8[%c3_28, %c0_29] : memref<22x22xf32, #tpu.memory_space<vmem>>, vector<16x3xf32>
      tpu.vector_store %arg8[%c3_28, %c0_29], %23 {strides = array<i32>} : memref<22x22xf32, #tpu.memory_space<vmem>>, vector<16x3xf32>,
      %c3_30 = arith.constant 3 : index
      %c19_31 = arith.constant 19 : index
      %31 = vector.load %arg8[%c3_30, %c19_31] : memref<22x22xf32, #tpu.memory_space<vmem>>, vector<16x3xf32>
      tpu.vector_store %arg8[%c3_30, %c19_31], %23 {strides = array<i32>} : memref<22x22xf32, #tpu.memory_space<vmem>>, vector<16x3xf32>,
      %c0_32 = arith.constant 0 : index
      %c0_33 = arith.constant 0 : index
      %32 = vector.load %arg5[%c0_32, %c0_33] : memref<1x256xf32, #tpu.memory_space<vmem>>, vector<1x16xf32>
      %c0_34 = arith.constant 0 : index
      %c0_35 = arith.constant 0 : index
      %33 = vector.load %arg6[%c0_34, %c0_35] : memref<1x256xf32, #tpu.memory_space<vmem>>, vector<1x16xf32>
      %cst_36 = arith.constant 2.500000e-01 : f32
      %34 = vector.broadcast %cst_36 : f32 to vector<1x16xf32>
      %35 = arith.mulf %32, %34 : vector<1x16xf32>
      %c3_37 = arith.constant 3 : index
      %c3_38 = arith.constant 3 : index
      %36 = vector.load %arg7[%c3_37, %c3_38] : memref<22x22xf32, #tpu.memory_space<vmem>>, vector<1x16xf32>
      tpu.vector_store %arg7[%c3_37, %c3_38], %35 {strides = array<i32>} : memref<22x22xf32, #tpu.memory_space<vmem>>, vector<1x16xf32>,
      %c3_39 = arith.constant 3 : index
      %c3_40 = arith.constant 3 : index
      %37 = vector.load %arg8[%c3_39, %c3_40] : memref<22x22xf32, #tpu.memory_space<vmem>>, vector<1x16xf32>
      tpu.vector_store %arg8[%c3_39, %c3_40], %33 {strides = array<i32>} : memref<22x22xf32, #tpu.memory_space<vmem>>, vector<1x16xf32>,
      %c0_41 = arith.constant 0 : index
      %c16 = arith.constant 16 : index
      %38 = vector.load %arg5[%c0_41, %c16] : memref<1x256xf32, #tpu.memory_space<vmem>>, vector<1x16xf32>
      %c0_42 = arith.constant 0 : index
      %c16_43 = arith.constant 16 : index
      %39 = vector.load %arg6[%c0_42, %c16_43] : memref<1x256xf32, #tpu.memory_space<vmem>>, vector<1x16xf32>
      %cst_44 = arith.constant 2.500000e-01 : f32
      %40 = vector.broadcast %cst_44 : f32 to vector<1x16xf32>
      %41 = arith.mulf %38, %40 : vector<1x16xf32>
      %c4 = arith.constant 4 : index
      %c3_45 = arith.constant 3 : index
      %42 = vector.load %arg7[%c4, %c3_45] : memref<22x22xf32, #tpu.memory_space<vmem>>, vector<1x16xf32>
      tpu.vector_store %arg7[%c4, %c3_45], %41 {strides = array<i32>} : memref<22x22xf32, #tpu.memory_space<vmem>>, vector<1x16xf32>,
      %c4_46 = arith.constant 4 : index
      %c3_47 = arith.constant 3 : index
      %43 = vector.load %arg8[%c4_46, %c3_47] : memref<22x22xf32, #tpu.memory_space<vmem>>, vector<1x16xf32>
      tpu.vector_store %arg8[%c4_46, %c3_47], %39 {strides = array<i32>} : memref<22x22xf32, #tpu.memory_space<vmem>>, vector<1x16xf32>,
      %c0_48 = arith.constant 0 : index
      %c32 = arith.constant 32 : index
      %44 = vector.load %arg5[%c0_48, %c32] : memref<1x256xf32, #tpu.memory_space<vmem>>, vector<1x16xf32>
      %c0_49 = arith.constant 0 : index
      %c32_50 = arith.constant 32 : index
      %45 = vector.load %arg6[%c0_49, %c32_50] : memref<1x256xf32, #tpu.memory_space<vmem>>, vector<1x16xf32>
      %cst_51 = arith.constant 2.500000e-01 : f32
      %46 = vector.broadcast %cst_51 : f32 to vector<1x16xf32>
      %47 = arith.mulf %44, %46 : vector<1x16xf32>
      %c5 = arith.constant 5 : index
      %c3_52 = arith.constant 3 : index
      %48 = vector.load %arg7[%c5, %c3_52] : memref<22x22xf32, #tpu.memory_space<vmem>>, vector<1x16xf32>
      tpu.vector_store %arg7[%c5, %c3_52], %47 {strides = array<i32>} : memref<22x22xf32, #tpu.memory_space<vmem>>, vector<1x16xf32>,
      %c5_53 = arith.constant 5 : index
      %c3_54 = arith.constant 3 : index
      %49 = vector.load %arg8[%c5_53, %c3_54] : memref<22x22xf32, #tpu.memory_space<vmem>>, vector<1x16xf32>
      tpu.vector_store %arg8[%c5_53, %c3_54], %45 {strides = array<i32>} : memref<22x22xf32, #tpu.memory_space<vmem>>, vector<1x16xf32>,
      %c0_55 = arith.constant 0 : index
      %c48 = arith.constant 48 : index
      %50 = vector.load %arg5[%c0_55, %c48] : memref<1x256xf32, #tpu.memory_space<vmem>>, vector<1x16xf32>
      %c0_56 = arith.constant 0 : index
      %c48_57 = arith.constant 48 : index
      %51 = vector.load %arg6[%c0_56, %c48_57] : memref<1x256xf32, #tpu.memory_space<vmem>>, vector<1x16xf32>
      %cst_58 = arith.constant 2.500000e-01 : f32
      %52 = vector.broadcast %cst_58 : f32 to vector<1x16xf32>
      %53 = arith.mulf %50, %52 : vector<1x16xf32>
      %c6 = arith.constant 6 : index
      %c3_59 = arith.constant 3 : index
      %54 = vector.load %arg7[%c6, %c3_59] : memref<22x22xf32, #tpu.memory_space<vmem>>, vector<1x16xf32>
      tpu.vector_store %arg7[%c6, %c3_59], %53 {strides = array<i32>} : memref<22x22xf32, #tpu.memory_space<vmem>>, vector<1x16xf32>,
      %c6_60 = arith.constant 6 : index
      %c3_61 = arith.constant 3 : index
      %55 = vector.load %arg8[%c6_60, %c3_61] : memref<22x22xf32, #tpu.memory_space<vmem>>, vector<1x16xf32>
      tpu.vector_store %arg8[%c6_60, %c3_61], %51 {strides = array<i32>} : memref<22x22xf32, #tpu.memory_space<vmem>>, vector<1x16xf32>,
      %c0_62 = arith.constant 0 : index
      %c64 = arith.constant 64 : index
      %56 = vector.load %arg5[%c0_62, %c64] : memref<1x256xf32, #tpu.memory_space<vmem>>, vector<1x16xf32>
      %c0_63 = arith.constant 0 : index
      %c64_64 = arith.constant 64 : index
      %57 = vector.load %arg6[%c0_63, %c64_64] : memref<1x256xf32, #tpu.memory_space<vmem>>, vector<1x16xf32>
      %cst_65 = arith.constant 2.500000e-01 : f32
      %58 = vector.broadcast %cst_65 : f32 to vector<1x16xf32>
      %59 = arith.mulf %56, %58 : vector<1x16xf32>
      %c7 = arith.constant 7 : index
      %c3_66 = arith.constant 3 : index
      %60 = vector.load %arg7[%c7, %c3_66] : memref<22x22xf32, #tpu.memory_space<vmem>>, vector<1x16xf32>
      tpu.vector_store %arg7[%c7, %c3_66], %59 {strides = array<i32>} : memref<22x22xf32, #tpu.memory_space<vmem>>, vector<1x16xf32>,
      %c7_67 = arith.constant 7 : index
      %c3_68 = arith.constant 3 : index
      %61 = vector.load %arg8[%c7_67, %c3_68] : memref<22x22xf32, #tpu.memory_space<vmem>>, vector<1x16xf32>
      tpu.vector_store %arg8[%c7_67, %c3_68], %57 {strides = array<i32>} : memref<22x22xf32, #tpu.memory_space<vmem>>, vector<1x16xf32>,
      %c0_69 = arith.constant 0 : index
      %c80 = arith.constant 80 : index
      %62 = vector.load %arg5[%c0_69, %c80] : memref<1x256xf32, #tpu.memory_space<vmem>>, vector<1x16xf32>
      %c0_70 = arith.constant 0 : index
      %c80_71 = arith.constant 80 : index
      %63 = vector.load %arg6[%c0_70, %c80_71] : memref<1x256xf32, #tpu.memory_space<vmem>>, vector<1x16xf32>
      %cst_72 = arith.constant 2.500000e-01 : f32
      %64 = vector.broadcast %cst_72 : f32 to vector<1x16xf32>
      %65 = arith.mulf %62, %64 : vector<1x16xf32>
      %c8 = arith.constant 8 : index
      %c3_73 = arith.constant 3 : index
      %66 = vector.load %arg7[%c8, %c3_73] : memref<22x22xf32, #tpu.memory_space<vmem>>, vector<1x16xf32>
      tpu.vector_store %arg7[%c8, %c3_73], %65 {strides = array<i32>} : memref<22x22xf32, #tpu.memory_space<vmem>>, vector<1x16xf32>,
      %c8_74 = arith.constant 8 : index
      %c3_75 = arith.constant 3 : index
      %67 = vector.load %arg8[%c8_74, %c3_75] : memref<22x22xf32, #tpu.memory_space<vmem>>, vector<1x16xf32>
      tpu.vector_store %arg8[%c8_74, %c3_75], %63 {strides = array<i32>} : memref<22x22xf32, #tpu.memory_space<vmem>>, vector<1x16xf32>,
      %c0_76 = arith.constant 0 : index
      %c96 = arith.constant 96 : index
      %68 = vector.load %arg5[%c0_76, %c96] : memref<1x256xf32, #tpu.memory_space<vmem>>, vector<1x16xf32>
      %c0_77 = arith.constant 0 : index
      %c96_78 = arith.constant 96 : index
      %69 = vector.load %arg6[%c0_77, %c96_78] : memref<1x256xf32, #tpu.memory_space<vmem>>, vector<1x16xf32>
      %cst_79 = arith.constant 2.500000e-01 : f32
      %70 = vector.broadcast %cst_79 : f32 to vector<1x16xf32>
      %71 = arith.mulf %68, %70 : vector<1x16xf32>
      %c9 = arith.constant 9 : index
      %c3_80 = arith.constant 3 : index
      %72 = vector.load %arg7[%c9, %c3_80] : memref<22x22xf32, #tpu.memory_space<vmem>>, vector<1x16xf32>
      tpu.vector_store %arg7[%c9, %c3_80], %71 {strides = array<i32>} : memref<22x22xf32, #tpu.memory_space<vmem>>, vector<1x16xf32>,
      %c9_81 = arith.constant 9 : index
      %c3_82 = arith.constant 3 : index
      %73 = vector.load %arg8[%c9_81, %c3_82] : memref<22x22xf32, #tpu.memory_space<vmem>>, vector<1x16xf32>
      tpu.vector_store %arg8[%c9_81, %c3_82], %69 {strides = array<i32>} : memref<22x22xf32, #tpu.memory_space<vmem>>, vector<1x16xf32>,
      %c0_83 = arith.constant 0 : index
      %c112 = arith.constant 112 : index
      %74 = vector.load %arg5[%c0_83, %c112] : memref<1x256xf32, #tpu.memory_space<vmem>>, vector<1x16xf32>
      %c0_84 = arith.constant 0 : index
      %c112_85 = arith.constant 112 : index
      %75 = vector.load %arg6[%c0_84, %c112_85] : memref<1x256xf32, #tpu.memory_space<vmem>>, vector<1x16xf32>
      %cst_86 = arith.constant 2.500000e-01 : f32
      %76 = vector.broadcast %cst_86 : f32 to vector<1x16xf32>
      %77 = arith.mulf %74, %76 : vector<1x16xf32>
      %c10 = arith.constant 10 : index
      %c3_87 = arith.constant 3 : index
      %78 = vector.load %arg7[%c10, %c3_87] : memref<22x22xf32, #tpu.memory_space<vmem>>, vector<1x16xf32>
      tpu.vector_store %arg7[%c10, %c3_87], %77 {strides = array<i32>} : memref<22x22xf32, #tpu.memory_space<vmem>>, vector<1x16xf32>,
      %c10_88 = arith.constant 10 : index
      %c3_89 = arith.constant 3 : index
      %79 = vector.load %arg8[%c10_88, %c3_89] : memref<22x22xf32, #tpu.memory_space<vmem>>, vector<1x16xf32>
      tpu.vector_store %arg8[%c10_88, %c3_89], %75 {strides = array<i32>} : memref<22x22xf32, #tpu.memory_space<vmem>>, vector<1x16xf32>,
      %c0_90 = arith.constant 0 : index
      %c128 = arith.constant 128 : index
      %80 = vector.load %arg5[%c0_90, %c128] : memref<1x256xf32, #tpu.memory_space<vmem>>, vector<1x16xf32>
      %c0_91 = arith.constant 0 : index
      %c128_92 = arith.constant 128 : index
      %81 = vector.load %arg6[%c0_91, %c128_92] : memref<1x256xf32, #tpu.memory_space<vmem>>, vector<1x16xf32>
      %cst_93 = arith.constant 2.500000e-01 : f32
      %82 = vector.broadcast %cst_93 : f32 to vector<1x16xf32>
      %83 = arith.mulf %80, %82 : vector<1x16xf32>
      %c11 = arith.constant 11 : index
      %c3_94 = arith.constant 3 : index
      %84 = vector.load %arg7[%c11, %c3_94] : memref<22x22xf32, #tpu.memory_space<vmem>>, vector<1x16xf32>
      tpu.vector_store %arg7[%c11, %c3_94], %83 {strides = array<i32>} : memref<22x22xf32, #tpu.memory_space<vmem>>, vector<1x16xf32>,
      %c11_95 = arith.constant 11 : index
      %c3_96 = arith.constant 3 : index
      %85 = vector.load %arg8[%c11_95, %c3_96] : memref<22x22xf32, #tpu.memory_space<vmem>>, vector<1x16xf32>
      tpu.vector_store %arg8[%c11_95, %c3_96], %81 {strides = array<i32>} : memref<22x22xf32, #tpu.memory_space<vmem>>, vector<1x16xf32>,
      %c0_97 = arith.constant 0 : index
      %c144 = arith.constant 144 : index
      %86 = vector.load %arg5[%c0_97, %c144] : memref<1x256xf32, #tpu.memory_space<vmem>>, vector<1x16xf32>
      %c0_98 = arith.constant 0 : index
      %c144_99 = arith.constant 144 : index
      %87 = vector.load %arg6[%c0_98, %c144_99] : memref<1x256xf32, #tpu.memory_space<vmem>>, vector<1x16xf32>
      %cst_100 = arith.constant 2.500000e-01 : f32
      %88 = vector.broadcast %cst_100 : f32 to vector<1x16xf32>
      %89 = arith.mulf %86, %88 : vector<1x16xf32>
      %c12 = arith.constant 12 : index
      %c3_101 = arith.constant 3 : index
      %90 = vector.load %arg7[%c12, %c3_101] : memref<22x22xf32, #tpu.memory_space<vmem>>, vector<1x16xf32>
      tpu.vector_store %arg7[%c12, %c3_101], %89 {strides = array<i32>} : memref<22x22xf32, #tpu.memory_space<vmem>>, vector<1x16xf32>,
      %c12_102 = arith.constant 12 : index
      %c3_103 = arith.constant 3 : index
      %91 = vector.load %arg8[%c12_102, %c3_103] : memref<22x22xf32, #tpu.memory_space<vmem>>, vector<1x16xf32>
      tpu.vector_store %arg8[%c12_102, %c3_103], %87 {strides = array<i32>} : memref<22x22xf32, #tpu.memory_space<vmem>>, vector<1x16xf32>,
      %c0_104 = arith.constant 0 : index
      %c160 = arith.constant 160 : index
      %92 = vector.load %arg5[%c0_104, %c160] : memref<1x256xf32, #tpu.memory_space<vmem>>, vector<1x16xf32>
      %c0_105 = arith.constant 0 : index
      %c160_106 = arith.constant 160 : index
      %93 = vector.load %arg6[%c0_105, %c160_106] : memref<1x256xf32, #tpu.memory_space<vmem>>, vector<1x16xf32>
      %cst_107 = arith.constant 2.500000e-01 : f32
      %94 = vector.broadcast %cst_107 : f32 to vector<1x16xf32>
      %95 = arith.mulf %92, %94 : vector<1x16xf32>
      %c13 = arith.constant 13 : index
      %c3_108 = arith.constant 3 : index
      %96 = vector.load %arg7[%c13, %c3_108] : memref<22x22xf32, #tpu.memory_space<vmem>>, vector<1x16xf32>
      tpu.vector_store %arg7[%c13, %c3_108], %95 {strides = array<i32>} : memref<22x22xf32, #tpu.memory_space<vmem>>, vector<1x16xf32>,
      %c13_109 = arith.constant 13 : index
      %c3_110 = arith.constant 3 : index
      %97 = vector.load %arg8[%c13_109, %c3_110] : memref<22x22xf32, #tpu.memory_space<vmem>>, vector<1x16xf32>
      tpu.vector_store %arg8[%c13_109, %c3_110], %93 {strides = array<i32>} : memref<22x22xf32, #tpu.memory_space<vmem>>, vector<1x16xf32>,
      %c0_111 = arith.constant 0 : index
      %c176 = arith.constant 176 : index
      %98 = vector.load %arg5[%c0_111, %c176] : memref<1x256xf32, #tpu.memory_space<vmem>>, vector<1x16xf32>
      %c0_112 = arith.constant 0 : index
      %c176_113 = arith.constant 176 : index
      %99 = vector.load %arg6[%c0_112, %c176_113] : memref<1x256xf32, #tpu.memory_space<vmem>>, vector<1x16xf32>
      %cst_114 = arith.constant 2.500000e-01 : f32
      %100 = vector.broadcast %cst_114 : f32 to vector<1x16xf32>
      %101 = arith.mulf %98, %100 : vector<1x16xf32>
      %c14 = arith.constant 14 : index
      %c3_115 = arith.constant 3 : index
      %102 = vector.load %arg7[%c14, %c3_115] : memref<22x22xf32, #tpu.memory_space<vmem>>, vector<1x16xf32>
      tpu.vector_store %arg7[%c14, %c3_115], %101 {strides = array<i32>} : memref<22x22xf32, #tpu.memory_space<vmem>>, vector<1x16xf32>,
      %c14_116 = arith.constant 14 : index
      %c3_117 = arith.constant 3 : index
      %103 = vector.load %arg8[%c14_116, %c3_117] : memref<22x22xf32, #tpu.memory_space<vmem>>, vector<1x16xf32>
      tpu.vector_store %arg8[%c14_116, %c3_117], %99 {strides = array<i32>} : memref<22x22xf32, #tpu.memory_space<vmem>>, vector<1x16xf32>,
      %c0_118 = arith.constant 0 : index
      %c192 = arith.constant 192 : index
      %104 = vector.load %arg5[%c0_118, %c192] : memref<1x256xf32, #tpu.memory_space<vmem>>, vector<1x16xf32>
      %c0_119 = arith.constant 0 : index
      %c192_120 = arith.constant 192 : index
      %105 = vector.load %arg6[%c0_119, %c192_120] : memref<1x256xf32, #tpu.memory_space<vmem>>, vector<1x16xf32>
      %cst_121 = arith.constant 2.500000e-01 : f32
      %106 = vector.broadcast %cst_121 : f32 to vector<1x16xf32>
      %107 = arith.mulf %104, %106 : vector<1x16xf32>
      %c15 = arith.constant 15 : index
      %c3_122 = arith.constant 3 : index
      %108 = vector.load %arg7[%c15, %c3_122] : memref<22x22xf32, #tpu.memory_space<vmem>>, vector<1x16xf32>
      tpu.vector_store %arg7[%c15, %c3_122], %107 {strides = array<i32>} : memref<22x22xf32, #tpu.memory_space<vmem>>, vector<1x16xf32>,
      %c15_123 = arith.constant 15 : index
      %c3_124 = arith.constant 3 : index
      %109 = vector.load %arg8[%c15_123, %c3_124] : memref<22x22xf32, #tpu.memory_space<vmem>>, vector<1x16xf32>
      tpu.vector_store %arg8[%c15_123, %c3_124], %105 {strides = array<i32>} : memref<22x22xf32, #tpu.memory_space<vmem>>, vector<1x16xf32>,
      %c0_125 = arith.constant 0 : index
      %c208 = arith.constant 208 : index
      %110 = vector.load %arg5[%c0_125, %c208] : memref<1x256xf32, #tpu.memory_space<vmem>>, vector<1x16xf32>
      %c0_126 = arith.constant 0 : index
      %c208_127 = arith.constant 208 : index
      %111 = vector.load %arg6[%c0_126, %c208_127] : memref<1x256xf32, #tpu.memory_space<vmem>>, vector<1x16xf32>
      %cst_128 = arith.constant 2.500000e-01 : f32
      %112 = vector.broadcast %cst_128 : f32 to vector<1x16xf32>
      %113 = arith.mulf %110, %112 : vector<1x16xf32>
      %c16_129 = arith.constant 16 : index
      %c3_130 = arith.constant 3 : index
      %114 = vector.load %arg7[%c16_129, %c3_130] : memref<22x22xf32, #tpu.memory_space<vmem>>, vector<1x16xf32>
      tpu.vector_store %arg7[%c16_129, %c3_130], %113 {strides = array<i32>} : memref<22x22xf32, #tpu.memory_space<vmem>>, vector<1x16xf32>,
      %c16_131 = arith.constant 16 : index
      %c3_132 = arith.constant 3 : index
      %115 = vector.load %arg8[%c16_131, %c3_132] : memref<22x22xf32, #tpu.memory_space<vmem>>, vector<1x16xf32>
      tpu.vector_store %arg8[%c16_131, %c3_132], %111 {strides = array<i32>} : memref<22x22xf32, #tpu.memory_space<vmem>>, vector<1x16xf32>,
      %c0_133 = arith.constant 0 : index
      %c224 = arith.constant 224 : index
      %116 = vector.load %arg5[%c0_133, %c224] : memref<1x256xf32, #tpu.memory_space<vmem>>, vector<1x16xf32>
      %c0_134 = arith.constant 0 : index
      %c224_135 = arith.constant 224 : index
      %117 = vector.load %arg6[%c0_134, %c224_135] : memref<1x256xf32, #tpu.memory_space<vmem>>, vector<1x16xf32>
      %cst_136 = arith.constant 2.500000e-01 : f32
      %118 = vector.broadcast %cst_136 : f32 to vector<1x16xf32>
      %119 = arith.mulf %116, %118 : vector<1x16xf32>
      %c17 = arith.constant 17 : index
      %c3_137 = arith.constant 3 : index
      %120 = vector.load %arg7[%c17, %c3_137] : memref<22x22xf32, #tpu.memory_space<vmem>>, vector<1x16xf32>
      tpu.vector_store %arg7[%c17, %c3_137], %119 {strides = array<i32>} : memref<22x22xf32, #tpu.memory_space<vmem>>, vector<1x16xf32>,
      %c17_138 = arith.constant 17 : index
      %c3_139 = arith.constant 3 : index
      %121 = vector.load %arg8[%c17_138, %c3_139] : memref<22x22xf32, #tpu.memory_space<vmem>>, vector<1x16xf32>
      tpu.vector_store %arg8[%c17_138, %c3_139], %117 {strides = array<i32>} : memref<22x22xf32, #tpu.memory_space<vmem>>, vector<1x16xf32>,
      %c0_140 = arith.constant 0 : index
      %c240 = arith.constant 240 : index
      %122 = vector.load %arg5[%c0_140, %c240] : memref<1x256xf32, #tpu.memory_space<vmem>>, vector<1x16xf32>
      %c0_141 = arith.constant 0 : index
      %c240_142 = arith.constant 240 : index
      %123 = vector.load %arg6[%c0_141, %c240_142] : memref<1x256xf32, #tpu.memory_space<vmem>>, vector<1x16xf32>
      %cst_143 = arith.constant 2.500000e-01 : f32
      %124 = vector.broadcast %cst_143 : f32 to vector<1x16xf32>
      %125 = arith.mulf %122, %124 : vector<1x16xf32>
      %c18 = arith.constant 18 : index
      %c3_144 = arith.constant 3 : index
      %126 = vector.load %arg7[%c18, %c3_144] : memref<22x22xf32, #tpu.memory_space<vmem>>, vector<1x16xf32>
      tpu.vector_store %arg7[%c18, %c3_144], %125 {strides = array<i32>} : memref<22x22xf32, #tpu.memory_space<vmem>>, vector<1x16xf32>,
      %c18_145 = arith.constant 18 : index
      %c3_146 = arith.constant 3 : index
      %127 = vector.load %arg8[%c18_145, %c3_146] : memref<22x22xf32, #tpu.memory_space<vmem>>, vector<1x16xf32>
      tpu.vector_store %arg8[%c18_145, %c3_146], %123 {strides = array<i32>} : memref<22x22xf32, #tpu.memory_space<vmem>>, vector<1x16xf32>,
      %cst_147 = arith.constant 0.000000e+00 : f32
      %128 = vector.broadcast %cst_147 : f32 to vector<16x16xf32>
      %cst_148 = arith.constant 0.000000e+00 : f32
      %129 = vector.broadcast %cst_148 : f32 to vector<16x16xf32>
      %cst_149 = arith.constant 0.000000e+00 : f32
      %130 = vector.broadcast %cst_149 : f32 to vector<16x16xf32>
      %cst_150 = arith.constant 0.000000e+00 : f32
      %131 = vector.broadcast %cst_150 : f32 to vector<16x16xf32>
      %c0_151 = arith.constant 0 : index
      %132 = memref.load %arg2[%c0_151] : memref<98xf32, #tpu.memory_space<smem>>
      %c49 = arith.constant 49 : index
      %133 = memref.load %arg2[%c49] : memref<98xf32, #tpu.memory_space<smem>>
      %c0_152 = arith.constant 0 : index
      %c0_153 = arith.constant 0 : index
      %134 = vector.load %arg7[%c0_152, %c0_153] : memref<22x22xf32, #tpu.memory_space<vmem>>, vector<16x16xf32>
      %c0_154 = arith.constant 0 : index
      %c0_155 = arith.constant 0 : index
      %135 = vector.load %arg8[%c0_154, %c0_155] : memref<22x22xf32, #tpu.memory_space<vmem>>, vector<16x16xf32>
      %136 = vector.broadcast %132 : f32 to vector<16x16xf32>
      %137 = arith.mulf %136, %134 : vector<16x16xf32>
      %138 = arith.addf %128, %137 : vector<16x16xf32>
      %139 = vector.broadcast %133 : f32 to vector<16x16xf32>
      %140 = arith.mulf %139, %135 : vector<16x16xf32>
      %141 = arith.addf %130, %140 : vector<16x16xf32>
      %c1 = arith.constant 1 : index
      %142 = memref.load %arg2[%c1] : memref<98xf32, #tpu.memory_space<smem>>
      %c50 = arith.constant 50 : index
      %143 = memref.load %arg2[%c50] : memref<98xf32, #tpu.memory_space<smem>>
      %c0_156 = arith.constant 0 : index
      %c1_157 = arith.constant 1 : index
      %144 = vector.load %arg7[%c0_156, %c1_157] : memref<22x22xf32, #tpu.memory_space<vmem>>, vector<16x16xf32>
      %c0_158 = arith.constant 0 : index
      %c1_159 = arith.constant 1 : index
      %145 = vector.load %arg8[%c0_158, %c1_159] : memref<22x22xf32, #tpu.memory_space<vmem>>, vector<16x16xf32>
      %146 = vector.broadcast %142 : f32 to vector<16x16xf32>
      %147 = arith.mulf %146, %144 : vector<16x16xf32>
      %148 = arith.addf %138, %147 : vector<16x16xf32>
      %149 = vector.broadcast %143 : f32 to vector<16x16xf32>
      %150 = arith.mulf %149, %145 : vector<16x16xf32>
      %151 = arith.addf %141, %150 : vector<16x16xf32>
      %c2 = arith.constant 2 : index
      %152 = memref.load %arg2[%c2] : memref<98xf32, #tpu.memory_space<smem>>
      %c51 = arith.constant 51 : index
      %153 = memref.load %arg2[%c51] : memref<98xf32, #tpu.memory_space<smem>>
      %c0_160 = arith.constant 0 : index
      %c2_161 = arith.constant 2 : index
      %154 = vector.load %arg7[%c0_160, %c2_161] : memref<22x22xf32, #tpu.memory_space<vmem>>, vector<16x16xf32>
      %c0_162 = arith.constant 0 : index
      %c2_163 = arith.constant 2 : index
      %155 = vector.load %arg8[%c0_162, %c2_163] : memref<22x22xf32, #tpu.memory_space<vmem>>, vector<16x16xf32>
      %156 = vector.broadcast %152 : f32 to vector<16x16xf32>
      %157 = arith.mulf %156, %154 : vector<16x16xf32>
      %158 = arith.addf %148, %157 : vector<16x16xf32>
      %159 = vector.broadcast %153 : f32 to vector<16x16xf32>
      %160 = arith.mulf %159, %155 : vector<16x16xf32>
      %161 = arith.addf %151, %160 : vector<16x16xf32>
      %c3_164 = arith.constant 3 : index
      %162 = memref.load %arg2[%c3_164] : memref<98xf32, #tpu.memory_space<smem>>
      %c52 = arith.constant 52 : index
      %163 = memref.load %arg2[%c52] : memref<98xf32, #tpu.memory_space<smem>>
      %c0_165 = arith.constant 0 : index
      %c3_166 = arith.constant 3 : index
      %164 = vector.load %arg7[%c0_165, %c3_166] : memref<22x22xf32, #tpu.memory_space<vmem>>, vector<16x16xf32>
      %c0_167 = arith.constant 0 : index
      %c3_168 = arith.constant 3 : index
      %165 = vector.load %arg8[%c0_167, %c3_168] : memref<22x22xf32, #tpu.memory_space<vmem>>, vector<16x16xf32>
      %166 = vector.broadcast %162 : f32 to vector<16x16xf32>
      %167 = arith.mulf %166, %164 : vector<16x16xf32>
      %168 = arith.addf %158, %167 : vector<16x16xf32>
      %169 = vector.broadcast %163 : f32 to vector<16x16xf32>
      %170 = arith.mulf %169, %165 : vector<16x16xf32>
      %171 = arith.addf %161, %170 : vector<16x16xf32>
      %c4_169 = arith.constant 4 : index
      %172 = memref.load %arg2[%c4_169] : memref<98xf32, #tpu.memory_space<smem>>
      %c53 = arith.constant 53 : index
      %173 = memref.load %arg2[%c53] : memref<98xf32, #tpu.memory_space<smem>>
      %c0_170 = arith.constant 0 : index
      %c4_171 = arith.constant 4 : index
      %174 = vector.load %arg7[%c0_170, %c4_171] : memref<22x22xf32, #tpu.memory_space<vmem>>, vector<16x16xf32>
      %c0_172 = arith.constant 0 : index
      %c4_173 = arith.constant 4 : index
      %175 = vector.load %arg8[%c0_172, %c4_173] : memref<22x22xf32, #tpu.memory_space<vmem>>, vector<16x16xf32>
      %176 = vector.broadcast %172 : f32 to vector<16x16xf32>
      %177 = arith.mulf %176, %174 : vector<16x16xf32>
      %178 = arith.addf %168, %177 : vector<16x16xf32>
      %179 = vector.broadcast %173 : f32 to vector<16x16xf32>
      %180 = arith.mulf %179, %175 : vector<16x16xf32>
      %181 = arith.addf %171, %180 : vector<16x16xf32>
      %c5_174 = arith.constant 5 : index
      %182 = memref.load %arg2[%c5_174] : memref<98xf32, #tpu.memory_space<smem>>
      %c54 = arith.constant 54 : index
      %183 = memref.load %arg2[%c54] : memref<98xf32, #tpu.memory_space<smem>>
      %c0_175 = arith.constant 0 : index
      %c5_176 = arith.constant 5 : index
      %184 = vector.load %arg7[%c0_175, %c5_176] : memref<22x22xf32, #tpu.memory_space<vmem>>, vector<16x16xf32>
      %c0_177 = arith.constant 0 : index
      %c5_178 = arith.constant 5 : index
      %185 = vector.load %arg8[%c0_177, %c5_178] : memref<22x22xf32, #tpu.memory_space<vmem>>, vector<16x16xf32>
      %186 = vector.broadcast %182 : f32 to vector<16x16xf32>
      %187 = arith.mulf %186, %184 : vector<16x16xf32>
      %188 = arith.addf %178, %187 : vector<16x16xf32>
      %189 = vector.broadcast %183 : f32 to vector<16x16xf32>
      %190 = arith.mulf %189, %185 : vector<16x16xf32>
      %191 = arith.addf %181, %190 : vector<16x16xf32>
      %c6_179 = arith.constant 6 : index
      %192 = memref.load %arg2[%c6_179] : memref<98xf32, #tpu.memory_space<smem>>
      %c55 = arith.constant 55 : index
      %193 = memref.load %arg2[%c55] : memref<98xf32, #tpu.memory_space<smem>>
      %c0_180 = arith.constant 0 : index
      %c6_181 = arith.constant 6 : index
      %194 = vector.load %arg7[%c0_180, %c6_181] : memref<22x22xf32, #tpu.memory_space<vmem>>, vector<16x16xf32>
      %c0_182 = arith.constant 0 : index
      %c6_183 = arith.constant 6 : index
      %195 = vector.load %arg8[%c0_182, %c6_183] : memref<22x22xf32, #tpu.memory_space<vmem>>, vector<16x16xf32>
      %196 = vector.broadcast %192 : f32 to vector<16x16xf32>
      %197 = arith.mulf %196, %194 : vector<16x16xf32>
      %198 = arith.addf %188, %197 : vector<16x16xf32>
      %199 = vector.broadcast %193 : f32 to vector<16x16xf32>
      %200 = arith.mulf %199, %195 : vector<16x16xf32>
      %201 = arith.addf %191, %200 : vector<16x16xf32>
      %c7_184 = arith.constant 7 : index
      %202 = memref.load %arg2[%c7_184] : memref<98xf32, #tpu.memory_space<smem>>
      %c56 = arith.constant 56 : index
      %203 = memref.load %arg2[%c56] : memref<98xf32, #tpu.memory_space<smem>>
      %c1_185 = arith.constant 1 : index
      %c0_186 = arith.constant 0 : index
      %204 = vector.load %arg7[%c1_185, %c0_186] : memref<22x22xf32, #tpu.memory_space<vmem>>, vector<16x16xf32>
      %c1_187 = arith.constant 1 : index
      %c0_188 = arith.constant 0 : index
      %205 = vector.load %arg8[%c1_187, %c0_188] : memref<22x22xf32, #tpu.memory_space<vmem>>, vector<16x16xf32>
      %206 = vector.broadcast %202 : f32 to vector<16x16xf32>
      %207 = arith.mulf %206, %204 : vector<16x16xf32>
      %208 = arith.addf %129, %207 : vector<16x16xf32>
      %209 = vector.broadcast %203 : f32 to vector<16x16xf32>
      %210 = arith.mulf %209, %205 : vector<16x16xf32>
      %211 = arith.addf %131, %210 : vector<16x16xf32>
      %c8_189 = arith.constant 8 : index
      %212 = memref.load %arg2[%c8_189] : memref<98xf32, #tpu.memory_space<smem>>
      %c57 = arith.constant 57 : index
      %213 = memref.load %arg2[%c57] : memref<98xf32, #tpu.memory_space<smem>>
      %c1_190 = arith.constant 1 : index
      %c1_191 = arith.constant 1 : index
      %214 = vector.load %arg7[%c1_190, %c1_191] : memref<22x22xf32, #tpu.memory_space<vmem>>, vector<16x16xf32>
      %c1_192 = arith.constant 1 : index
      %c1_193 = arith.constant 1 : index
      %215 = vector.load %arg8[%c1_192, %c1_193] : memref<22x22xf32, #tpu.memory_space<vmem>>, vector<16x16xf32>
      %216 = vector.broadcast %212 : f32 to vector<16x16xf32>
      %217 = arith.mulf %216, %214 : vector<16x16xf32>
      %218 = arith.addf %208, %217 : vector<16x16xf32>
      %219 = vector.broadcast %213 : f32 to vector<16x16xf32>
      %220 = arith.mulf %219, %215 : vector<16x16xf32>
      %221 = arith.addf %211, %220 : vector<16x16xf32>
      %c9_194 = arith.constant 9 : index
      %222 = memref.load %arg2[%c9_194] : memref<98xf32, #tpu.memory_space<smem>>
      %c58 = arith.constant 58 : index
      %223 = memref.load %arg2[%c58] : memref<98xf32, #tpu.memory_space<smem>>
      %c1_195 = arith.constant 1 : index
      %c2_196 = arith.constant 2 : index
      %224 = vector.load %arg7[%c1_195, %c2_196] : memref<22x22xf32, #tpu.memory_space<vmem>>, vector<16x16xf32>
      %c1_197 = arith.constant 1 : index
      %c2_198 = arith.constant 2 : index
      %225 = vector.load %arg8[%c1_197, %c2_198] : memref<22x22xf32, #tpu.memory_space<vmem>>, vector<16x16xf32>
      %226 = vector.broadcast %222 : f32 to vector<16x16xf32>
      %227 = arith.mulf %226, %224 : vector<16x16xf32>
      %228 = arith.addf %218, %227 : vector<16x16xf32>
      %229 = vector.broadcast %223 : f32 to vector<16x16xf32>
      %230 = arith.mulf %229, %225 : vector<16x16xf32>
      %231 = arith.addf %221, %230 : vector<16x16xf32>
      %c10_199 = arith.constant 10 : index
      %232 = memref.load %arg2[%c10_199] : memref<98xf32, #tpu.memory_space<smem>>
      %c59 = arith.constant 59 : index
      %233 = memref.load %arg2[%c59] : memref<98xf32, #tpu.memory_space<smem>>
      %c1_200 = arith.constant 1 : index
      %c3_201 = arith.constant 3 : index
      %234 = vector.load %arg7[%c1_200, %c3_201] : memref<22x22xf32, #tpu.memory_space<vmem>>, vector<16x16xf32>
      %c1_202 = arith.constant 1 : index
      %c3_203 = arith.constant 3 : index
      %235 = vector.load %arg8[%c1_202, %c3_203] : memref<22x22xf32, #tpu.memory_space<vmem>>, vector<16x16xf32>
      %236 = vector.broadcast %232 : f32 to vector<16x16xf32>
      %237 = arith.mulf %236, %234 : vector<16x16xf32>
      %238 = arith.addf %228, %237 : vector<16x16xf32>
      %239 = vector.broadcast %233 : f32 to vector<16x16xf32>
      %240 = arith.mulf %239, %235 : vector<16x16xf32>
      %241 = arith.addf %231, %240 : vector<16x16xf32>
      %c11_204 = arith.constant 11 : index
      %242 = memref.load %arg2[%c11_204] : memref<98xf32, #tpu.memory_space<smem>>
      %c60 = arith.constant 60 : index
      %243 = memref.load %arg2[%c60] : memref<98xf32, #tpu.memory_space<smem>>
      %c1_205 = arith.constant 1 : index
      %c4_206 = arith.constant 4 : index
      %244 = vector.load %arg7[%c1_205, %c4_206] : memref<22x22xf32, #tpu.memory_space<vmem>>, vector<16x16xf32>
      %c1_207 = arith.constant 1 : index
      %c4_208 = arith.constant 4 : index
      %245 = vector.load %arg8[%c1_207, %c4_208] : memref<22x22xf32, #tpu.memory_space<vmem>>, vector<16x16xf32>
      %246 = vector.broadcast %242 : f32 to vector<16x16xf32>
      %247 = arith.mulf %246, %244 : vector<16x16xf32>
      %248 = arith.addf %238, %247 : vector<16x16xf32>
      %249 = vector.broadcast %243 : f32 to vector<16x16xf32>
      %250 = arith.mulf %249, %245 : vector<16x16xf32>
      %251 = arith.addf %241, %250 : vector<16x16xf32>
      %c12_209 = arith.constant 12 : index
      %252 = memref.load %arg2[%c12_209] : memref<98xf32, #tpu.memory_space<smem>>
      %c61 = arith.constant 61 : index
      %253 = memref.load %arg2[%c61] : memref<98xf32, #tpu.memory_space<smem>>
      %c1_210 = arith.constant 1 : index
      %c5_211 = arith.constant 5 : index
      %254 = vector.load %arg7[%c1_210, %c5_211] : memref<22x22xf32, #tpu.memory_space<vmem>>, vector<16x16xf32>
      %c1_212 = arith.constant 1 : index
      %c5_213 = arith.constant 5 : index
      %255 = vector.load %arg8[%c1_212, %c5_213] : memref<22x22xf32, #tpu.memory_space<vmem>>, vector<16x16xf32>
      %256 = vector.broadcast %252 : f32 to vector<16x16xf32>
      %257 = arith.mulf %256, %254 : vector<16x16xf32>
      %258 = arith.addf %248, %257 : vector<16x16xf32>
      %259 = vector.broadcast %253 : f32 to vector<16x16xf32>
      %260 = arith.mulf %259, %255 : vector<16x16xf32>
      %261 = arith.addf %251, %260 : vector<16x16xf32>
      %c13_214 = arith.constant 13 : index
      %262 = memref.load %arg2[%c13_214] : memref<98xf32, #tpu.memory_space<smem>>
      %c62 = arith.constant 62 : index
      %263 = memref.load %arg2[%c62] : memref<98xf32, #tpu.memory_space<smem>>
      %c1_215 = arith.constant 1 : index
      %c6_216 = arith.constant 6 : index
      %264 = vector.load %arg7[%c1_215, %c6_216] : memref<22x22xf32, #tpu.memory_space<vmem>>, vector<16x16xf32>
      %c1_217 = arith.constant 1 : index
      %c6_218 = arith.constant 6 : index
      %265 = vector.load %arg8[%c1_217, %c6_218] : memref<22x22xf32, #tpu.memory_space<vmem>>, vector<16x16xf32>
      %266 = vector.broadcast %262 : f32 to vector<16x16xf32>
      %267 = arith.mulf %266, %264 : vector<16x16xf32>
      %268 = arith.addf %258, %267 : vector<16x16xf32>
      %269 = vector.broadcast %263 : f32 to vector<16x16xf32>
      %270 = arith.mulf %269, %265 : vector<16x16xf32>
      %271 = arith.addf %261, %270 : vector<16x16xf32>
      %c14_219 = arith.constant 14 : index
      %272 = memref.load %arg2[%c14_219] : memref<98xf32, #tpu.memory_space<smem>>
      %c63 = arith.constant 63 : index
      %273 = memref.load %arg2[%c63] : memref<98xf32, #tpu.memory_space<smem>>
      %c2_220 = arith.constant 2 : index
      %c0_221 = arith.constant 0 : index
      %274 = vector.load %arg7[%c2_220, %c0_221] : memref<22x22xf32, #tpu.memory_space<vmem>>, vector<16x16xf32>
      %c2_222 = arith.constant 2 : index
      %c0_223 = arith.constant 0 : index
      %275 = vector.load %arg8[%c2_222, %c0_223] : memref<22x22xf32, #tpu.memory_space<vmem>>, vector<16x16xf32>
      %276 = vector.broadcast %272 : f32 to vector<16x16xf32>
      %277 = arith.mulf %276, %274 : vector<16x16xf32>
      %278 = arith.addf %198, %277 : vector<16x16xf32>
      %279 = vector.broadcast %273 : f32 to vector<16x16xf32>
      %280 = arith.mulf %279, %275 : vector<16x16xf32>
      %281 = arith.addf %201, %280 : vector<16x16xf32>
      %c15_224 = arith.constant 15 : index
      %282 = memref.load %arg2[%c15_224] : memref<98xf32, #tpu.memory_space<smem>>
      %c64_225 = arith.constant 64 : index
      %283 = memref.load %arg2[%c64_225] : memref<98xf32, #tpu.memory_space<smem>>
      %c2_226 = arith.constant 2 : index
      %c1_227 = arith.constant 1 : index
      %284 = vector.load %arg7[%c2_226, %c1_227] : memref<22x22xf32, #tpu.memory_space<vmem>>, vector<16x16xf32>
      %c2_228 = arith.constant 2 : index
      %c1_229 = arith.constant 1 : index
      %285 = vector.load %arg8[%c2_228, %c1_229] : memref<22x22xf32, #tpu.memory_space<vmem>>, vector<16x16xf32>
      %286 = vector.broadcast %282 : f32 to vector<16x16xf32>
      %287 = arith.mulf %286, %284 : vector<16x16xf32>
      %288 = arith.addf %278, %287 : vector<16x16xf32>
      %289 = vector.broadcast %283 : f32 to vector<16x16xf32>
      %290 = arith.mulf %289, %285 : vector<16x16xf32>
      %291 = arith.addf %281, %290 : vector<16x16xf32>
      %c16_230 = arith.constant 16 : index
      %292 = memref.load %arg2[%c16_230] : memref<98xf32, #tpu.memory_space<smem>>
      %c65 = arith.constant 65 : index
      %293 = memref.load %arg2[%c65] : memref<98xf32, #tpu.memory_space<smem>>
      %c2_231 = arith.constant 2 : index
      %c2_232 = arith.constant 2 : index
      %294 = vector.load %arg7[%c2_231, %c2_232] : memref<22x22xf32, #tpu.memory_space<vmem>>, vector<16x16xf32>
      %c2_233 = arith.constant 2 : index
      %c2_234 = arith.constant 2 : index
      %295 = vector.load %arg8[%c2_233, %c2_234] : memref<22x22xf32, #tpu.memory_space<vmem>>, vector<16x16xf32>
      %296 = vector.broadcast %292 : f32 to vector<16x16xf32>
      %297 = arith.mulf %296, %294 : vector<16x16xf32>
      %298 = arith.addf %288, %297 : vector<16x16xf32>
      %299 = vector.broadcast %293 : f32 to vector<16x16xf32>
      %300 = arith.mulf %299, %295 : vector<16x16xf32>
      %301 = arith.addf %291, %300 : vector<16x16xf32>
      %c17_235 = arith.constant 17 : index
      %302 = memref.load %arg2[%c17_235] : memref<98xf32, #tpu.memory_space<smem>>
      %c66 = arith.constant 66 : index
      %303 = memref.load %arg2[%c66] : memref<98xf32, #tpu.memory_space<smem>>
      %c2_236 = arith.constant 2 : index
      %c3_237 = arith.constant 3 : index
      %304 = vector.load %arg7[%c2_236, %c3_237] : memref<22x22xf32, #tpu.memory_space<vmem>>, vector<16x16xf32>
      %c2_238 = arith.constant 2 : index
      %c3_239 = arith.constant 3 : index
      %305 = vector.load %arg8[%c2_238, %c3_239] : memref<22x22xf32, #tpu.memory_space<vmem>>, vector<16x16xf32>
      %306 = vector.broadcast %302 : f32 to vector<16x16xf32>
      %307 = arith.mulf %306, %304 : vector<16x16xf32>
      %308 = arith.addf %298, %307 : vector<16x16xf32>
      %309 = vector.broadcast %303 : f32 to vector<16x16xf32>
      %310 = arith.mulf %309, %305 : vector<16x16xf32>
      %311 = arith.addf %301, %310 : vector<16x16xf32>
      %c18_240 = arith.constant 18 : index
      %312 = memref.load %arg2[%c18_240] : memref<98xf32, #tpu.memory_space<smem>>
      %c67 = arith.constant 67 : index
      %313 = memref.load %arg2[%c67] : memref<98xf32, #tpu.memory_space<smem>>
      %c2_241 = arith.constant 2 : index
      %c4_242 = arith.constant 4 : index
      %314 = vector.load %arg7[%c2_241, %c4_242] : memref<22x22xf32, #tpu.memory_space<vmem>>, vector<16x16xf32>
      %c2_243 = arith.constant 2 : index
      %c4_244 = arith.constant 4 : index
      %315 = vector.load %arg8[%c2_243, %c4_244] : memref<22x22xf32, #tpu.memory_space<vmem>>, vector<16x16xf32>
      %316 = vector.broadcast %312 : f32 to vector<16x16xf32>
      %317 = arith.mulf %316, %314 : vector<16x16xf32>
      %318 = arith.addf %308, %317 : vector<16x16xf32>
      %319 = vector.broadcast %313 : f32 to vector<16x16xf32>
      %320 = arith.mulf %319, %315 : vector<16x16xf32>
      %321 = arith.addf %311, %320 : vector<16x16xf32>
      %c19_245 = arith.constant 19 : index
      %322 = memref.load %arg2[%c19_245] : memref<98xf32, #tpu.memory_space<smem>>
      %c68 = arith.constant 68 : index
      %323 = memref.load %arg2[%c68] : memref<98xf32, #tpu.memory_space<smem>>
      %c2_246 = arith.constant 2 : index
      %c5_247 = arith.constant 5 : index
      %324 = vector.load %arg7[%c2_246, %c5_247] : memref<22x22xf32, #tpu.memory_space<vmem>>, vector<16x16xf32>
      %c2_248 = arith.constant 2 : index
      %c5_249 = arith.constant 5 : index
      %325 = vector.load %arg8[%c2_248, %c5_249] : memref<22x22xf32, #tpu.memory_space<vmem>>, vector<16x16xf32>
      %326 = vector.broadcast %322 : f32 to vector<16x16xf32>
      %327 = arith.mulf %326, %324 : vector<16x16xf32>
      %328 = arith.addf %318, %327 : vector<16x16xf32>
      %329 = vector.broadcast %323 : f32 to vector<16x16xf32>
      %330 = arith.mulf %329, %325 : vector<16x16xf32>
      %331 = arith.addf %321, %330 : vector<16x16xf32>
      %c20 = arith.constant 20 : index
      %332 = memref.load %arg2[%c20] : memref<98xf32, #tpu.memory_space<smem>>
      %c69 = arith.constant 69 : index
      %333 = memref.load %arg2[%c69] : memref<98xf32, #tpu.memory_space<smem>>
      %c2_250 = arith.constant 2 : index
      %c6_251 = arith.constant 6 : index
      %334 = vector.load %arg7[%c2_250, %c6_251] : memref<22x22xf32, #tpu.memory_space<vmem>>, vector<16x16xf32>
      %c2_252 = arith.constant 2 : index
      %c6_253 = arith.constant 6 : index
      %335 = vector.load %arg8[%c2_252, %c6_253] : memref<22x22xf32, #tpu.memory_space<vmem>>, vector<16x16xf32>
      %336 = vector.broadcast %332 : f32 to vector<16x16xf32>
      %337 = arith.mulf %336, %334 : vector<16x16xf32>
      %338 = arith.addf %328, %337 : vector<16x16xf32>
      %339 = vector.broadcast %333 : f32 to vector<16x16xf32>
      %340 = arith.mulf %339, %335 : vector<16x16xf32>
      %341 = arith.addf %331, %340 : vector<16x16xf32>
      %c21 = arith.constant 21 : index
      %342 = memref.load %arg2[%c21] : memref<98xf32, #tpu.memory_space<smem>>
      %c70 = arith.constant 70 : index
      %343 = memref.load %arg2[%c70] : memref<98xf32, #tpu.memory_space<smem>>
      %c3_254 = arith.constant 3 : index
      %c0_255 = arith.constant 0 : index
      %344 = vector.load %arg7[%c3_254, %c0_255] : memref<22x22xf32, #tpu.memory_space<vmem>>, vector<16x16xf32>
      %c3_256 = arith.constant 3 : index
      %c0_257 = arith.constant 0 : index
      %345 = vector.load %arg8[%c3_256, %c0_257] : memref<22x22xf32, #tpu.memory_space<vmem>>, vector<16x16xf32>
      %346 = vector.broadcast %342 : f32 to vector<16x16xf32>
      %347 = arith.mulf %346, %344 : vector<16x16xf32>
      %348 = arith.addf %268, %347 : vector<16x16xf32>
      %349 = vector.broadcast %343 : f32 to vector<16x16xf32>
      %350 = arith.mulf %349, %345 : vector<16x16xf32>
      %351 = arith.addf %271, %350 : vector<16x16xf32>
      %c22 = arith.constant 22 : index
      %352 = memref.load %arg2[%c22] : memref<98xf32, #tpu.memory_space<smem>>
      %c71 = arith.constant 71 : index
      %353 = memref.load %arg2[%c71] : memref<98xf32, #tpu.memory_space<smem>>
      %c3_258 = arith.constant 3 : index
      %c1_259 = arith.constant 1 : index
      %354 = vector.load %arg7[%c3_258, %c1_259] : memref<22x22xf32, #tpu.memory_space<vmem>>, vector<16x16xf32>
      %c3_260 = arith.constant 3 : index
      %c1_261 = arith.constant 1 : index
      %355 = vector.load %arg8[%c3_260, %c1_261] : memref<22x22xf32, #tpu.memory_space<vmem>>, vector<16x16xf32>
      %356 = vector.broadcast %352 : f32 to vector<16x16xf32>
      %357 = arith.mulf %356, %354 : vector<16x16xf32>
      %358 = arith.addf %348, %357 : vector<16x16xf32>
      %359 = vector.broadcast %353 : f32 to vector<16x16xf32>
      %360 = arith.mulf %359, %355 : vector<16x16xf32>
      %361 = arith.addf %351, %360 : vector<16x16xf32>
      %c23 = arith.constant 23 : index
      %362 = memref.load %arg2[%c23] : memref<98xf32, #tpu.memory_space<smem>>
      %c72 = arith.constant 72 : index
      %363 = memref.load %arg2[%c72] : memref<98xf32, #tpu.memory_space<smem>>
      %c3_262 = arith.constant 3 : index
      %c2_263 = arith.constant 2 : index
      %364 = vector.load %arg7[%c3_262, %c2_263] : memref<22x22xf32, #tpu.memory_space<vmem>>, vector<16x16xf32>
      %c3_264 = arith.constant 3 : index
      %c2_265 = arith.constant 2 : index
      %365 = vector.load %arg8[%c3_264, %c2_265] : memref<22x22xf32, #tpu.memory_space<vmem>>, vector<16x16xf32>
      %366 = vector.broadcast %362 : f32 to vector<16x16xf32>
      %367 = arith.mulf %366, %364 : vector<16x16xf32>
      %368 = arith.addf %358, %367 : vector<16x16xf32>
      %369 = vector.broadcast %363 : f32 to vector<16x16xf32>
      %370 = arith.mulf %369, %365 : vector<16x16xf32>
      %371 = arith.addf %361, %370 : vector<16x16xf32>
      %c24 = arith.constant 24 : index
      %372 = memref.load %arg2[%c24] : memref<98xf32, #tpu.memory_space<smem>>
      %c73 = arith.constant 73 : index
      %373 = memref.load %arg2[%c73] : memref<98xf32, #tpu.memory_space<smem>>
      %c3_266 = arith.constant 3 : index
      %c3_267 = arith.constant 3 : index
      %374 = vector.load %arg7[%c3_266, %c3_267] : memref<22x22xf32, #tpu.memory_space<vmem>>, vector<16x16xf32>
      %c3_268 = arith.constant 3 : index
      %c3_269 = arith.constant 3 : index
      %375 = vector.load %arg8[%c3_268, %c3_269] : memref<22x22xf32, #tpu.memory_space<vmem>>, vector<16x16xf32>
      %376 = vector.broadcast %372 : f32 to vector<16x16xf32>
      %377 = arith.mulf %376, %374 : vector<16x16xf32>
      %378 = arith.addf %368, %377 : vector<16x16xf32>
      %379 = vector.broadcast %373 : f32 to vector<16x16xf32>
      %380 = arith.mulf %379, %375 : vector<16x16xf32>
      %381 = arith.addf %371, %380 : vector<16x16xf32>
      %c25 = arith.constant 25 : index
      %382 = memref.load %arg2[%c25] : memref<98xf32, #tpu.memory_space<smem>>
      %c74 = arith.constant 74 : index
      %383 = memref.load %arg2[%c74] : memref<98xf32, #tpu.memory_space<smem>>
      %c3_270 = arith.constant 3 : index
      %c4_271 = arith.constant 4 : index
      %384 = vector.load %arg7[%c3_270, %c4_271] : memref<22x22xf32, #tpu.memory_space<vmem>>, vector<16x16xf32>
      %c3_272 = arith.constant 3 : index
      %c4_273 = arith.constant 4 : index
      %385 = vector.load %arg8[%c3_272, %c4_273] : memref<22x22xf32, #tpu.memory_space<vmem>>, vector<16x16xf32>
      %386 = vector.broadcast %382 : f32 to vector<16x16xf32>
      %387 = arith.mulf %386, %384 : vector<16x16xf32>
      %388 = arith.addf %378, %387 : vector<16x16xf32>
      %389 = vector.broadcast %383 : f32 to vector<16x16xf32>
      %390 = arith.mulf %389, %385 : vector<16x16xf32>
      %391 = arith.addf %381, %390 : vector<16x16xf32>
      %c26 = arith.constant 26 : index
      %392 = memref.load %arg2[%c26] : memref<98xf32, #tpu.memory_space<smem>>
      %c75 = arith.constant 75 : index
      %393 = memref.load %arg2[%c75] : memref<98xf32, #tpu.memory_space<smem>>
      %c3_274 = arith.constant 3 : index
      %c5_275 = arith.constant 5 : index
      %394 = vector.load %arg7[%c3_274, %c5_275] : memref<22x22xf32, #tpu.memory_space<vmem>>, vector<16x16xf32>
      %c3_276 = arith.constant 3 : index
      %c5_277 = arith.constant 5 : index
      %395 = vector.load %arg8[%c3_276, %c5_277] : memref<22x22xf32, #tpu.memory_space<vmem>>, vector<16x16xf32>
      %396 = vector.broadcast %392 : f32 to vector<16x16xf32>
      %397 = arith.mulf %396, %394 : vector<16x16xf32>
      %398 = arith.addf %388, %397 : vector<16x16xf32>
      %399 = vector.broadcast %393 : f32 to vector<16x16xf32>
      %400 = arith.mulf %399, %395 : vector<16x16xf32>
      %401 = arith.addf %391, %400 : vector<16x16xf32>
      %c27 = arith.constant 27 : index
      %402 = memref.load %arg2[%c27] : memref<98xf32, #tpu.memory_space<smem>>
      %c76 = arith.constant 76 : index
      %403 = memref.load %arg2[%c76] : memref<98xf32, #tpu.memory_space<smem>>
      %c3_278 = arith.constant 3 : index
      %c6_279 = arith.constant 6 : index
      %404 = vector.load %arg7[%c3_278, %c6_279] : memref<22x22xf32, #tpu.memory_space<vmem>>, vector<16x16xf32>
      %c3_280 = arith.constant 3 : index
      %c6_281 = arith.constant 6 : index
      %405 = vector.load %arg8[%c3_280, %c6_281] : memref<22x22xf32, #tpu.memory_space<vmem>>, vector<16x16xf32>
      %406 = vector.broadcast %402 : f32 to vector<16x16xf32>
      %407 = arith.mulf %406, %404 : vector<16x16xf32>
      %408 = arith.addf %398, %407 : vector<16x16xf32>
      %409 = vector.broadcast %403 : f32 to vector<16x16xf32>
      %410 = arith.mulf %409, %405 : vector<16x16xf32>
      %411 = arith.addf %401, %410 : vector<16x16xf32>
      %c28 = arith.constant 28 : index
      %412 = memref.load %arg2[%c28] : memref<98xf32, #tpu.memory_space<smem>>
      %c77 = arith.constant 77 : index
      %413 = memref.load %arg2[%c77] : memref<98xf32, #tpu.memory_space<smem>>
      %c4_282 = arith.constant 4 : index
      %c0_283 = arith.constant 0 : index
      %414 = vector.load %arg7[%c4_282, %c0_283] : memref<22x22xf32, #tpu.memory_space<vmem>>, vector<16x16xf32>
      %c4_284 = arith.constant 4 : index
      %c0_285 = arith.constant 0 : index
      %415 = vector.load %arg8[%c4_284, %c0_285] : memref<22x22xf32, #tpu.memory_space<vmem>>, vector<16x16xf32>
      %416 = vector.broadcast %412 : f32 to vector<16x16xf32>
      %417 = arith.mulf %416, %414 : vector<16x16xf32>
      %418 = arith.addf %338, %417 : vector<16x16xf32>
      %419 = vector.broadcast %413 : f32 to vector<16x16xf32>
      %420 = arith.mulf %419, %415 : vector<16x16xf32>
      %421 = arith.addf %341, %420 : vector<16x16xf32>
      %c29 = arith.constant 29 : index
      %422 = memref.load %arg2[%c29] : memref<98xf32, #tpu.memory_space<smem>>
      %c78 = arith.constant 78 : index
      %423 = memref.load %arg2[%c78] : memref<98xf32, #tpu.memory_space<smem>>
      %c4_286 = arith.constant 4 : index
      %c1_287 = arith.constant 1 : index
      %424 = vector.load %arg7[%c4_286, %c1_287] : memref<22x22xf32, #tpu.memory_space<vmem>>, vector<16x16xf32>
      %c4_288 = arith.constant 4 : index
      %c1_289 = arith.constant 1 : index
      %425 = vector.load %arg8[%c4_288, %c1_289] : memref<22x22xf32, #tpu.memory_space<vmem>>, vector<16x16xf32>
      %426 = vector.broadcast %422 : f32 to vector<16x16xf32>
      %427 = arith.mulf %426, %424 : vector<16x16xf32>
      %428 = arith.addf %418, %427 : vector<16x16xf32>
      %429 = vector.broadcast %423 : f32 to vector<16x16xf32>
      %430 = arith.mulf %429, %425 : vector<16x16xf32>
      %431 = arith.addf %421, %430 : vector<16x16xf32>
      %c30 = arith.constant 30 : index
      %432 = memref.load %arg2[%c30] : memref<98xf32, #tpu.memory_space<smem>>
      %c79 = arith.constant 79 : index
      %433 = memref.load %arg2[%c79] : memref<98xf32, #tpu.memory_space<smem>>
      %c4_290 = arith.constant 4 : index
      %c2_291 = arith.constant 2 : index
      %434 = vector.load %arg7[%c4_290, %c2_291] : memref<22x22xf32, #tpu.memory_space<vmem>>, vector<16x16xf32>
      %c4_292 = arith.constant 4 : index
      %c2_293 = arith.constant 2 : index
      %435 = vector.load %arg8[%c4_292, %c2_293] : memref<22x22xf32, #tpu.memory_space<vmem>>, vector<16x16xf32>
      %436 = vector.broadcast %432 : f32 to vector<16x16xf32>
      %437 = arith.mulf %436, %434 : vector<16x16xf32>
      %438 = arith.addf %428, %437 : vector<16x16xf32>
      %439 = vector.broadcast %433 : f32 to vector<16x16xf32>
      %440 = arith.mulf %439, %435 : vector<16x16xf32>
      %441 = arith.addf %431, %440 : vector<16x16xf32>
      %c31 = arith.constant 31 : index
      %442 = memref.load %arg2[%c31] : memref<98xf32, #tpu.memory_space<smem>>
      %c80_294 = arith.constant 80 : index
      %443 = memref.load %arg2[%c80_294] : memref<98xf32, #tpu.memory_space<smem>>
      %c4_295 = arith.constant 4 : index
      %c3_296 = arith.constant 3 : index
      %444 = vector.load %arg7[%c4_295, %c3_296] : memref<22x22xf32, #tpu.memory_space<vmem>>, vector<16x16xf32>
      %c4_297 = arith.constant 4 : index
      %c3_298 = arith.constant 3 : index
      %445 = vector.load %arg8[%c4_297, %c3_298] : memref<22x22xf32, #tpu.memory_space<vmem>>, vector<16x16xf32>
      %446 = vector.broadcast %442 : f32 to vector<16x16xf32>
      %447 = arith.mulf %446, %444 : vector<16x16xf32>
      %448 = arith.addf %438, %447 : vector<16x16xf32>
      %449 = vector.broadcast %443 : f32 to vector<16x16xf32>
      %450 = arith.mulf %449, %445 : vector<16x16xf32>
      %451 = arith.addf %441, %450 : vector<16x16xf32>
      %c32_299 = arith.constant 32 : index
      %452 = memref.load %arg2[%c32_299] : memref<98xf32, #tpu.memory_space<smem>>
      %c81 = arith.constant 81 : index
      %453 = memref.load %arg2[%c81] : memref<98xf32, #tpu.memory_space<smem>>
      %c4_300 = arith.constant 4 : index
      %c4_301 = arith.constant 4 : index
      %454 = vector.load %arg7[%c4_300, %c4_301] : memref<22x22xf32, #tpu.memory_space<vmem>>, vector<16x16xf32>
      %c4_302 = arith.constant 4 : index
      %c4_303 = arith.constant 4 : index
      %455 = vector.load %arg8[%c4_302, %c4_303] : memref<22x22xf32, #tpu.memory_space<vmem>>, vector<16x16xf32>
      %456 = vector.broadcast %452 : f32 to vector<16x16xf32>
      %457 = arith.mulf %456, %454 : vector<16x16xf32>
      %458 = arith.addf %448, %457 : vector<16x16xf32>
      %459 = vector.broadcast %453 : f32 to vector<16x16xf32>
      %460 = arith.mulf %459, %455 : vector<16x16xf32>
      %461 = arith.addf %451, %460 : vector<16x16xf32>
      %c33 = arith.constant 33 : index
      %462 = memref.load %arg2[%c33] : memref<98xf32, #tpu.memory_space<smem>>
      %c82 = arith.constant 82 : index
      %463 = memref.load %arg2[%c82] : memref<98xf32, #tpu.memory_space<smem>>
      %c4_304 = arith.constant 4 : index
      %c5_305 = arith.constant 5 : index
      %464 = vector.load %arg7[%c4_304, %c5_305] : memref<22x22xf32, #tpu.memory_space<vmem>>, vector<16x16xf32>
      %c4_306 = arith.constant 4 : index
      %c5_307 = arith.constant 5 : index
      %465 = vector.load %arg8[%c4_306, %c5_307] : memref<22x22xf32, #tpu.memory_space<vmem>>, vector<16x16xf32>
      %466 = vector.broadcast %462 : f32 to vector<16x16xf32>
      %467 = arith.mulf %466, %464 : vector<16x16xf32>
      %468 = arith.addf %458, %467 : vector<16x16xf32>
      %469 = vector.broadcast %463 : f32 to vector<16x16xf32>
      %470 = arith.mulf %469, %465 : vector<16x16xf32>
      %471 = arith.addf %461, %470 : vector<16x16xf32>
      %c34 = arith.constant 34 : index
      %472 = memref.load %arg2[%c34] : memref<98xf32, #tpu.memory_space<smem>>
      %c83 = arith.constant 83 : index
      %473 = memref.load %arg2[%c83] : memref<98xf32, #tpu.memory_space<smem>>
      %c4_308 = arith.constant 4 : index
      %c6_309 = arith.constant 6 : index
      %474 = vector.load %arg7[%c4_308, %c6_309] : memref<22x22xf32, #tpu.memory_space<vmem>>, vector<16x16xf32>
      %c4_310 = arith.constant 4 : index
      %c6_311 = arith.constant 6 : index
      %475 = vector.load %arg8[%c4_310, %c6_311] : memref<22x22xf32, #tpu.memory_space<vmem>>, vector<16x16xf32>
      %476 = vector.broadcast %472 : f32 to vector<16x16xf32>
      %477 = arith.mulf %476, %474 : vector<16x16xf32>
      %478 = arith.addf %468, %477 : vector<16x16xf32>
      %479 = vector.broadcast %473 : f32 to vector<16x16xf32>
      %480 = arith.mulf %479, %475 : vector<16x16xf32>
      %481 = arith.addf %471, %480 : vector<16x16xf32>
      %c35 = arith.constant 35 : index
      %482 = memref.load %arg2[%c35] : memref<98xf32, #tpu.memory_space<smem>>
      %c84 = arith.constant 84 : index
      %483 = memref.load %arg2[%c84] : memref<98xf32, #tpu.memory_space<smem>>
      %c5_312 = arith.constant 5 : index
      %c0_313 = arith.constant 0 : index
      %484 = vector.load %arg7[%c5_312, %c0_313] : memref<22x22xf32, #tpu.memory_space<vmem>>, vector<16x16xf32>
      %c5_314 = arith.constant 5 : index
      %c0_315 = arith.constant 0 : index
      %485 = vector.load %arg8[%c5_314, %c0_315] : memref<22x22xf32, #tpu.memory_space<vmem>>, vector<16x16xf32>
      %486 = vector.broadcast %482 : f32 to vector<16x16xf32>
      %487 = arith.mulf %486, %484 : vector<16x16xf32>
      %488 = arith.addf %408, %487 : vector<16x16xf32>
      %489 = vector.broadcast %483 : f32 to vector<16x16xf32>
      %490 = arith.mulf %489, %485 : vector<16x16xf32>
      %491 = arith.addf %411, %490 : vector<16x16xf32>
      %c36 = arith.constant 36 : index
      %492 = memref.load %arg2[%c36] : memref<98xf32, #tpu.memory_space<smem>>
      %c85 = arith.constant 85 : index
      %493 = memref.load %arg2[%c85] : memref<98xf32, #tpu.memory_space<smem>>
      %c5_316 = arith.constant 5 : index
      %c1_317 = arith.constant 1 : index
      %494 = vector.load %arg7[%c5_316, %c1_317] : memref<22x22xf32, #tpu.memory_space<vmem>>, vector<16x16xf32>
      %c5_318 = arith.constant 5 : index
      %c1_319 = arith.constant 1 : index
      %495 = vector.load %arg8[%c5_318, %c1_319] : memref<22x22xf32, #tpu.memory_space<vmem>>, vector<16x16xf32>
      %496 = vector.broadcast %492 : f32 to vector<16x16xf32>
      %497 = arith.mulf %496, %494 : vector<16x16xf32>
      %498 = arith.addf %488, %497 : vector<16x16xf32>
      %499 = vector.broadcast %493 : f32 to vector<16x16xf32>
      %500 = arith.mulf %499, %495 : vector<16x16xf32>
      %501 = arith.addf %491, %500 : vector<16x16xf32>
      %c37 = arith.constant 37 : index
      %502 = memref.load %arg2[%c37] : memref<98xf32, #tpu.memory_space<smem>>
      %c86 = arith.constant 86 : index
      %503 = memref.load %arg2[%c86] : memref<98xf32, #tpu.memory_space<smem>>
      %c5_320 = arith.constant 5 : index
      %c2_321 = arith.constant 2 : index
      %504 = vector.load %arg7[%c5_320, %c2_321] : memref<22x22xf32, #tpu.memory_space<vmem>>, vector<16x16xf32>
      %c5_322 = arith.constant 5 : index
      %c2_323 = arith.constant 2 : index
      %505 = vector.load %arg8[%c5_322, %c2_323] : memref<22x22xf32, #tpu.memory_space<vmem>>, vector<16x16xf32>
      %506 = vector.broadcast %502 : f32 to vector<16x16xf32>
      %507 = arith.mulf %506, %504 : vector<16x16xf32>
      %508 = arith.addf %498, %507 : vector<16x16xf32>
      %509 = vector.broadcast %503 : f32 to vector<16x16xf32>
      %510 = arith.mulf %509, %505 : vector<16x16xf32>
      %511 = arith.addf %501, %510 : vector<16x16xf32>
      %c38 = arith.constant 38 : index
      %512 = memref.load %arg2[%c38] : memref<98xf32, #tpu.memory_space<smem>>
      %c87 = arith.constant 87 : index
      %513 = memref.load %arg2[%c87] : memref<98xf32, #tpu.memory_space<smem>>
      %c5_324 = arith.constant 5 : index
      %c3_325 = arith.constant 3 : index
      %514 = vector.load %arg7[%c5_324, %c3_325] : memref<22x22xf32, #tpu.memory_space<vmem>>, vector<16x16xf32>
      %c5_326 = arith.constant 5 : index
      %c3_327 = arith.constant 3 : index
      %515 = vector.load %arg8[%c5_326, %c3_327] : memref<22x22xf32, #tpu.memory_space<vmem>>, vector<16x16xf32>
      %516 = vector.broadcast %512 : f32 to vector<16x16xf32>
      %517 = arith.mulf %516, %514 : vector<16x16xf32>
      %518 = arith.addf %508, %517 : vector<16x16xf32>
      %519 = vector.broadcast %513 : f32 to vector<16x16xf32>
      %520 = arith.mulf %519, %515 : vector<16x16xf32>
      %521 = arith.addf %511, %520 : vector<16x16xf32>
      %c39 = arith.constant 39 : index
      %522 = memref.load %arg2[%c39] : memref<98xf32, #tpu.memory_space<smem>>
      %c88 = arith.constant 88 : index
      %523 = memref.load %arg2[%c88] : memref<98xf32, #tpu.memory_space<smem>>
      %c5_328 = arith.constant 5 : index
      %c4_329 = arith.constant 4 : index
      %524 = vector.load %arg7[%c5_328, %c4_329] : memref<22x22xf32, #tpu.memory_space<vmem>>, vector<16x16xf32>
      %c5_330 = arith.constant 5 : index
      %c4_331 = arith.constant 4 : index
      %525 = vector.load %arg8[%c5_330, %c4_331] : memref<22x22xf32, #tpu.memory_space<vmem>>, vector<16x16xf32>
      %526 = vector.broadcast %522 : f32 to vector<16x16xf32>
      %527 = arith.mulf %526, %524 : vector<16x16xf32>
      %528 = arith.addf %518, %527 : vector<16x16xf32>
      %529 = vector.broadcast %523 : f32 to vector<16x16xf32>
      %530 = arith.mulf %529, %525 : vector<16x16xf32>
      %531 = arith.addf %521, %530 : vector<16x16xf32>
      %c40 = arith.constant 40 : index
      %532 = memref.load %arg2[%c40] : memref<98xf32, #tpu.memory_space<smem>>
      %c89 = arith.constant 89 : index
      %533 = memref.load %arg2[%c89] : memref<98xf32, #tpu.memory_space<smem>>
      %c5_332 = arith.constant 5 : index
      %c5_333 = arith.constant 5 : index
      %534 = vector.load %arg7[%c5_332, %c5_333] : memref<22x22xf32, #tpu.memory_space<vmem>>, vector<16x16xf32>
      %c5_334 = arith.constant 5 : index
      %c5_335 = arith.constant 5 : index
      %535 = vector.load %arg8[%c5_334, %c5_335] : memref<22x22xf32, #tpu.memory_space<vmem>>, vector<16x16xf32>
      %536 = vector.broadcast %532 : f32 to vector<16x16xf32>
      %537 = arith.mulf %536, %534 : vector<16x16xf32>
      %538 = arith.addf %528, %537 : vector<16x16xf32>
      %539 = vector.broadcast %533 : f32 to vector<16x16xf32>
      %540 = arith.mulf %539, %535 : vector<16x16xf32>
      %541 = arith.addf %531, %540 : vector<16x16xf32>
      %c41 = arith.constant 41 : index
      %542 = memref.load %arg2[%c41] : memref<98xf32, #tpu.memory_space<smem>>
      %c90 = arith.constant 90 : index
      %543 = memref.load %arg2[%c90] : memref<98xf32, #tpu.memory_space<smem>>
      %c5_336 = arith.constant 5 : index
      %c6_337 = arith.constant 6 : index
      %544 = vector.load %arg7[%c5_336, %c6_337] : memref<22x22xf32, #tpu.memory_space<vmem>>, vector<16x16xf32>
      %c5_338 = arith.constant 5 : index
      %c6_339 = arith.constant 6 : index
      %545 = vector.load %arg8[%c5_338, %c6_339] : memref<22x22xf32, #tpu.memory_space<vmem>>, vector<16x16xf32>
      %546 = vector.broadcast %542 : f32 to vector<16x16xf32>
      %547 = arith.mulf %546, %544 : vector<16x16xf32>
      %548 = arith.addf %538, %547 : vector<16x16xf32>
      %549 = vector.broadcast %543 : f32 to vector<16x16xf32>
      %550 = arith.mulf %549, %545 : vector<16x16xf32>
      %551 = arith.addf %541, %550 : vector<16x16xf32>
      %c42 = arith.constant 42 : index
      %552 = memref.load %arg2[%c42] : memref<98xf32, #tpu.memory_space<smem>>
      %c91 = arith.constant 91 : index
      %553 = memref.load %arg2[%c91] : memref<98xf32, #tpu.memory_space<smem>>
      %c6_340 = arith.constant 6 : index
      %c0_341 = arith.constant 0 : index
      %554 = vector.load %arg7[%c6_340, %c0_341] : memref<22x22xf32, #tpu.memory_space<vmem>>, vector<16x16xf32>
      %c6_342 = arith.constant 6 : index
      %c0_343 = arith.constant 0 : index
      %555 = vector.load %arg8[%c6_342, %c0_343] : memref<22x22xf32, #tpu.memory_space<vmem>>, vector<16x16xf32>
      %556 = vector.broadcast %552 : f32 to vector<16x16xf32>
      %557 = arith.mulf %556, %554 : vector<16x16xf32>
      %558 = arith.addf %478, %557 : vector<16x16xf32>
      %559 = vector.broadcast %553 : f32 to vector<16x16xf32>
      %560 = arith.mulf %559, %555 : vector<16x16xf32>
      %561 = arith.addf %481, %560 : vector<16x16xf32>
      %c43 = arith.constant 43 : index
      %562 = memref.load %arg2[%c43] : memref<98xf32, #tpu.memory_space<smem>>
      %c92 = arith.constant 92 : index
      %563 = memref.load %arg2[%c92] : memref<98xf32, #tpu.memory_space<smem>>
      %c6_344 = arith.constant 6 : index
      %c1_345 = arith.constant 1 : index
      %564 = vector.load %arg7[%c6_344, %c1_345] : memref<22x22xf32, #tpu.memory_space<vmem>>, vector<16x16xf32>
      %c6_346 = arith.constant 6 : index
      %c1_347 = arith.constant 1 : index
      %565 = vector.load %arg8[%c6_346, %c1_347] : memref<22x22xf32, #tpu.memory_space<vmem>>, vector<16x16xf32>
      %566 = vector.broadcast %562 : f32 to vector<16x16xf32>
      %567 = arith.mulf %566, %564 : vector<16x16xf32>
      %568 = arith.addf %558, %567 : vector<16x16xf32>
      %569 = vector.broadcast %563 : f32 to vector<16x16xf32>
      %570 = arith.mulf %569, %565 : vector<16x16xf32>
      %571 = arith.addf %561, %570 : vector<16x16xf32>
      %c44 = arith.constant 44 : index
      %572 = memref.load %arg2[%c44] : memref<98xf32, #tpu.memory_space<smem>>
      %c93 = arith.constant 93 : index
      %573 = memref.load %arg2[%c93] : memref<98xf32, #tpu.memory_space<smem>>
      %c6_348 = arith.constant 6 : index
      %c2_349 = arith.constant 2 : index
      %574 = vector.load %arg7[%c6_348, %c2_349] : memref<22x22xf32, #tpu.memory_space<vmem>>, vector<16x16xf32>
      %c6_350 = arith.constant 6 : index
      %c2_351 = arith.constant 2 : index
      %575 = vector.load %arg8[%c6_350, %c2_351] : memref<22x22xf32, #tpu.memory_space<vmem>>, vector<16x16xf32>
      %576 = vector.broadcast %572 : f32 to vector<16x16xf32>
      %577 = arith.mulf %576, %574 : vector<16x16xf32>
      %578 = arith.addf %568, %577 : vector<16x16xf32>
      %579 = vector.broadcast %573 : f32 to vector<16x16xf32>
      %580 = arith.mulf %579, %575 : vector<16x16xf32>
      %581 = arith.addf %571, %580 : vector<16x16xf32>
      %c45 = arith.constant 45 : index
      %582 = memref.load %arg2[%c45] : memref<98xf32, #tpu.memory_space<smem>>
      %c94 = arith.constant 94 : index
      %583 = memref.load %arg2[%c94] : memref<98xf32, #tpu.memory_space<smem>>
      %c6_352 = arith.constant 6 : index
      %c3_353 = arith.constant 3 : index
      %584 = vector.load %arg7[%c6_352, %c3_353] : memref<22x22xf32, #tpu.memory_space<vmem>>, vector<16x16xf32>
      %c6_354 = arith.constant 6 : index
      %c3_355 = arith.constant 3 : index
      %585 = vector.load %arg8[%c6_354, %c3_355] : memref<22x22xf32, #tpu.memory_space<vmem>>, vector<16x16xf32>
      %586 = vector.broadcast %582 : f32 to vector<16x16xf32>
      %587 = arith.mulf %586, %584 : vector<16x16xf32>
      %588 = arith.addf %578, %587 : vector<16x16xf32>
      %589 = vector.broadcast %583 : f32 to vector<16x16xf32>
      %590 = arith.mulf %589, %585 : vector<16x16xf32>
      %591 = arith.addf %581, %590 : vector<16x16xf32>
      %c46 = arith.constant 46 : index
      %592 = memref.load %arg2[%c46] : memref<98xf32, #tpu.memory_space<smem>>
      %c95 = arith.constant 95 : index
      %593 = memref.load %arg2[%c95] : memref<98xf32, #tpu.memory_space<smem>>
      %c6_356 = arith.constant 6 : index
      %c4_357 = arith.constant 4 : index
      %594 = vector.load %arg7[%c6_356, %c4_357] : memref<22x22xf32, #tpu.memory_space<vmem>>, vector<16x16xf32>
      %c6_358 = arith.constant 6 : index
      %c4_359 = arith.constant 4 : index
      %595 = vector.load %arg8[%c6_358, %c4_359] : memref<22x22xf32, #tpu.memory_space<vmem>>, vector<16x16xf32>
      %596 = vector.broadcast %592 : f32 to vector<16x16xf32>
      %597 = arith.mulf %596, %594 : vector<16x16xf32>
      %598 = arith.addf %588, %597 : vector<16x16xf32>
      %599 = vector.broadcast %593 : f32 to vector<16x16xf32>
      %600 = arith.mulf %599, %595 : vector<16x16xf32>
      %601 = arith.addf %591, %600 : vector<16x16xf32>
      %c47 = arith.constant 47 : index
      %602 = memref.load %arg2[%c47] : memref<98xf32, #tpu.memory_space<smem>>
      %c96_360 = arith.constant 96 : index
      %603 = memref.load %arg2[%c96_360] : memref<98xf32, #tpu.memory_space<smem>>
      %c6_361 = arith.constant 6 : index
      %c5_362 = arith.constant 5 : index
      %604 = vector.load %arg7[%c6_361, %c5_362] : memref<22x22xf32, #tpu.memory_space<vmem>>, vector<16x16xf32>
      %c6_363 = arith.constant 6 : index
      %c5_364 = arith.constant 5 : index
      %605 = vector.load %arg8[%c6_363, %c5_364] : memref<22x22xf32, #tpu.memory_space<vmem>>, vector<16x16xf32>
      %606 = vector.broadcast %602 : f32 to vector<16x16xf32>
      %607 = arith.mulf %606, %604 : vector<16x16xf32>
      %608 = arith.addf %598, %607 : vector<16x16xf32>
      %609 = vector.broadcast %603 : f32 to vector<16x16xf32>
      %610 = arith.mulf %609, %605 : vector<16x16xf32>
      %611 = arith.addf %601, %610 : vector<16x16xf32>
      %c48_365 = arith.constant 48 : index
      %612 = memref.load %arg2[%c48_365] : memref<98xf32, #tpu.memory_space<smem>>
      %c97 = arith.constant 97 : index
      %613 = memref.load %arg2[%c97] : memref<98xf32, #tpu.memory_space<smem>>
      %c6_366 = arith.constant 6 : index
      %c6_367 = arith.constant 6 : index
      %614 = vector.load %arg7[%c6_366, %c6_367] : memref<22x22xf32, #tpu.memory_space<vmem>>, vector<16x16xf32>
      %c6_368 = arith.constant 6 : index
      %c6_369 = arith.constant 6 : index
      %615 = vector.load %arg8[%c6_368, %c6_369] : memref<22x22xf32, #tpu.memory_space<vmem>>, vector<16x16xf32>
      %616 = vector.broadcast %612 : f32 to vector<16x16xf32>
      %617 = arith.mulf %616, %614 : vector<16x16xf32>
      %618 = arith.addf %608, %617 : vector<16x16xf32>
      %619 = vector.broadcast %613 : f32 to vector<16x16xf32>
      %620 = arith.mulf %619, %615 : vector<16x16xf32>
      %621 = arith.addf %611, %620 : vector<16x16xf32>
      %622 = arith.addf %618, %548 : vector<16x16xf32>
      %623 = arith.addf %621, %551 : vector<16x16xf32>
      %624 = arith.addf %622, %623 : vector<16x16xf32>
      %625 = arith.negf %624 : vector<16x16xf32>
      %626 = math.exp %625 : vector<16x16xf32>
      %cst_370 = arith.constant 1.000000e+00 : f32
      %627 = vector.broadcast %cst_370 : f32 to vector<16x16xf32>
      %628 = arith.addf %627, %626 : vector<16x16xf32>
      %629 = arith.divf %627, %628 : vector<16x16xf32>
      %c0_371 = arith.constant 0 : index
      %c0_372 = arith.constant 0 : index
      %c0_373 = arith.constant 0 : index
      %c0_374 = arith.constant 0 : index
      %630 = vector.load %arg4[%c0_371, %c0_372, %c0_373, %c0_374] : memref<1x1x16x16xf32, #tpu.memory_space<vmem>>, vector<1x1x16x16xf32>
      %631 = vector.shape_cast %630 : vector<1x1x16x16xf32> to vector<16x16xf32>
      %632 = vector.shape_cast %629 : vector<16x16xf32> to vector<1x1x16x16xf32>
      tpu.vector_store %arg4[%c0_371, %c0_372, %c0_373, %c0_374], %632 {strides = array<i32>} : memref<1x1x16x16xf32, #tpu.memory_space<vmem>>, vector<1x1x16x16xf32>,
    } else {
    }
    return
  }
  func.func @transform_0(%arg0: i32, %arg1: i32) -> i32 {
    %c0_i32 = arith.constant 0 : i32
    %c0_i32_0 = arith.constant 0 : i32
    return %c0_i32 : i32
  }
  func.func @transform_1(%arg0: i32, %arg1: i32) -> (i32, i32, i32) {
    %c0_i32 = arith.constant 0 : i32
    %c0_i32_0 = arith.constant 0 : i32
    return %arg0, %arg1, %c0_i32 : i32, i32, i32
  }
  func.func @transform_2(%arg0: i32, %arg1: i32) -> (i32, i32, i32, i32) {
    %c0_i32 = arith.constant 0 : i32
    %c0_i32_0 = arith.constant 0 : i32
    %c0_i32_1 = arith.constant 0 : i32
    %c0_i32_2 = arith.constant 0 : i32
    return %arg0, %c0_i32, %c0_i32_0, %c0_i32_1 : i32, i32, i32, i32
  }
}

</mosaic_0001>

<bundles_post_ra>
// kernel: tpu_custom_call.1
= control target key start
LH: loop header
LB: loop body
LE: loop exit
PB: predicated region body
PF: predicated region fallthrough
CT: control target
= control target key end

     0   :  { %s3931_s0 = inlined_call_operand.hbm [shape: f32[98], index: 0, kind: input, shape index: {}]   ;;  %s3932_s1 = inlined_call_operand.hbm [shape: f32[2,4,256], index: 1, kind: input, shape index: {}]   ;;  %s3933_s2 = inlined_call_operand.hbm [shape: f32[2,1,16,16], index: 2, kind: output, shape index: {}]  }
   0x1   :  { %3954 = sst [smem:[#allocation20_spill]] %s3931_s0 }
   0x2   :  { %3955 = sst [smem:[#allocation21_spill]] %s3932_s1 }
   0x3   :  { %7 = vsyncpa [#allocation9], 0 }
   0x4   :  { %8 = vsyncpa [#allocation7], 0 }
   0x5   :  { %10 = vsyncpa [#allocation7 + $0x1], 0 }
   0x6   :  { %11 = vsyncpa [#allocation8], 0 }
   0x7   :  { %13 = vsyncpa [#allocation8 + $0x1], 0  ;;  %s2456_s9 = smov 0   ;;  %s2458_s10 = smov 0  }
   0x8   :  { %s2460_s11 = smov 0   ;;  %s2462_s12 = smov 0  }
   0x9   :  { %s2464_s13 = smov 0   ;;  %s2466_s14 = smov 0  }
   0xa LB: > { %3956 = sst [smem:[#allocation15_spill]] %s2401_s10  ;;  %s2053_s15 = sadd.s32 4294967295, %s2417_s14   ;;  %s2417_s14 = sphi %s2466_s14, %s19_s14   ;;  %s2413_s13 = sphi %s2464_s13, %s3990_s13   ;;  %s2409_s12 = sphi %s2462_s12, %s3989_s12   ;;  %s2405_s11 = sphi %s2460_s11, %s3988_s11   ;;  %s2401_s10 = sphi %s2458_s10, %s3987_s10   ;;  %s2397_s9 = sphi %s2456_s9, %s3986_s9  }
   0xb   : > { %3957 = sst [smem:[#allocation16_spill]] %s2405_s11  ;;  %s2054_s16 = sadd.s32 4294967294, %s2417_s14  }
   0xc   : > { %3958 = sst [smem:[#allocation17_spill]] %s2413_s13  ;;  %p74_p0 = scmp.ne.s32.totalorder %s2401_s10, %s2397_s9 }
   0xd   : > { %p2490_p1 = scmp.eq.s32.totalorder %s2053_s15, 0  ;;  %p2494_p2 = scmp.eq.s32.totalorder %s2053_s15, 1 }
   0xe   : > { %p104_p3 = scmp.eq.s32.totalorder %s2054_s16, 1  ;;  %p2055_p5 = scmp.ge.s32.totalorder %s2417_s14, 1 }
   0xf   : > { %s3959_s17 = scalar_select %p2490_p1, 1, 0 }
  0x10   : > { %p2500_p4 = por %p2490_p1, %p74_p0  ;;  %p2505_p6 = por %p104_p3, %p74_p0 }
  0x11   : > { %p111_p7 = scmp.lt.s32.totalorder %s2417_s14, 3  ;;  %s31_s22 = sadd.s32 1, %s2413_s13 }
  0x12   : > { %s3961_s19 = scalar_select %p2500_p4, 1, 0 }
  0x13   : > { %s3962_s20 = scalar_select %p2505_p6, 1, 0 }
  0x14   : > { %p2510_p8 = pnand %p2055_p5, %p111_p7  ;;  %p2524_p12 = scmp.ge.s32.totalorder %s31_s22, 2 }
  0x15   : > { %s61_s25 = sadd.s32 1, %s2405_s11  ;;  %p68_p13 = scmp.ne.s32.totalorder %s2405_s11, %s2401_s10 }
  0x16   : > { %p2195_p10 = pneg %p2510_p8  ;;  %p69_p0 = scmp.eq.s32.totalorder %s2417_s14, 0 }
  0x17   : > { %s3966_s0 = sld [smem:[#allocation20_spill]] }
  0x18   : > { %p2520_p11 = pnand %p2195_p10, %p2490_p1 }
  0x1a   : > { %p2290_p5 = pneg %p2520_p11 }
  0x1d   : > { %s2288_s28 = scalar_lea.hbm %s3966_s0, 16 }
  0x1e   : > { %p2289_p3 = scmp.ne.s32.totalorder %s3966_s0, %s2288_s28  ;;  %p2295_p9 = scmp.lt.u32.totalorder %s2288_s28, %s3966_s0 }
  0x20   : > { %p2291_p7 = pnand %p2290_p5, %p2289_p3 }
  0x22   : > { %p2292_p10 = pneg %p2291_p7 }
  0x24   : > { %p2297_p6 = pnand %p2295_p9, %p2292_p10 }
  0x26   : > { %2300 = shalt.err (!%p2297_p6)
}
  0x27   : > { %s2419_s5 = smov [#allocation6]   ;;  %s3992_s22 = smov (%p2524_p12, %s31_s22), 0 }
  0x28   : > { %2198 = dma.hbm_to_smem (!%p2520_p11), %s3966_s0, 16, %s2419_s5, [#allocation9]  }
  0x29   : > { %3967 = sst [smem:[#allocation18_spill]] %s3992_s22  ;;  %p2555_p6 = por %p69_p0, %p68_p13 }
  0x2a   : > { %p2564_p9 = por %p2494_p2, %p68_p13  ;;  %s56_s16 = ssub.s32 %s2413_s13, %s3992_s22 }
  0x2b   : > { %p2208_p3 = scmp.lt.s32.totalorder %s2417_s14, 2  ;;  %p59_p5 = scmp.eq.s32.totalorder %s56_s16, 0 }
  0x2c   : > { %s3969_s15 = scalar_select %p2564_p9, 1, 0 }
  0x2d   : > { %s133_s23 = sand.u32 1, %s2405_s11   ;;  %s2185_s27 = sshll.u32 %s2413_s13, 7 }
  0x2e   : > { %s2058_s24 = sshll.u32 %s133_s23, 3  ;;  %s3971_s1 = sld [smem:[#allocation21_spill]] }
  0x2f   : > { %s2573_s26 = scalar_select %p59_p5, %s2405_s11, %s61_s25  }
  0x30   : > { %s137_s18 = scalar_lea.vmem [#allocation10], %s2058_s24  ;;  %p2585_p2 = pnand %p2208_p3, %p2555_p6 }
  0x31   : > { %3970 = sst [smem:[#allocation19_spill]] %s2573_s26  ;;  %s147_s3 = sshll.u32 %s137_s18, 4  ;;  %s2581_s3 = int_to_ptr.vmem [resolvable:$true] %s147_s3 }
  0x32   : > { %s134_s25 = scalar_lea.sflag [#allocation7], %s133_s23  ;;  %p2303_p12 = pneg %p2585_p2 }
  0x34   : > { %s2579_s30 = scalar_lea.hbm %s3971_s1, %s2185_s27  ;;  %s2306_s16 = scalar_lea.hbm %s3971_s1, 256 }
  0x35   : > { %s2301_s5 = scalar_lea.hbm %s2579_s30, 128  ;;  %p2307_p7 = scmp.lt.u32.totalorder %s2579_s30, %s3971_s1 }
  0x36   : > { %p2302_p11 = scmp.ne.s32.totalorder %s2579_s30, %s2301_s5  ;;  %p2308_p10 = scmp.lt.u32.totalorder %s2306_s16, %s2301_s5 }
  0x37   : > { %p2310_p3 = scmp.lt.u32.totalorder %s2301_s5, %s2579_s30 }
  0x38   : > { %p2304_p13 = pnand %p2303_p12, %p2302_p11  ;;  %p2309_p6 = por %p2308_p10, %p2307_p7 }
  0x3a   : > { %p2305_p0 = pneg %p2304_p13  ;;  %p2311_p5 = por %p2310_p3, %p2309_p6 }
  0x3c   : > { %p2312_p9 = pnand %p2311_p5, %p2305_p0 }
  0x3e   : > { %2315 = shalt.err (!%p2312_p9)
}
  0x3f   : > { %s2316_s23 = scalar_lea.vmem %s2581_s3, 128  ;;  %s2420_s27 = smov [#allocation10]  }
  0x40   : > { %p2317_p11 = scmp.ne.s32.totalorder %s2581_s3, %s2316_s23  ;;  %s2321_s28 = sshll.u32 %s2420_s27, 4  ;;  %s2322_s28 = int_to_ptr.vmem [resolvable:$false] %s2321_s28 }
  0x41   : > { %s2323_s29 = scalar_lea.vmem %s2322_s28, 256  ;;  %p2324_p1 = scmp.lt.s32.totalorder %s2581_s3, %s2322_s28 }
  0x42   : > { %p2319_p13 = pnand %p2317_p11, %p2303_p12  ;;  %p2325_p7 = scmp.lt.s32.totalorder %s2323_s29, %s2316_s23 }
  0x44   : > { %p2320_p4 = pneg %p2319_p13  ;;  %p2326_p10 = por %p2325_p7, %p2324_p1 }
  0x46   : > { %p2327_p6 = pnand %p2326_p10, %p2320_p4 }
  0x48   : > { %2330 = shalt.err (!%p2327_p6)
}
  0x49   : > { %2202 = dma.hbm_to_vmem [thread:$0]  (!%p2585_p2), %s2579_s30, 128, %s2581_s3, %s134_s25  }
  0x4a   : > { %156 = sbr.rel (%p2510_p8) target bundleno = 787 (0x313), region = 28  ;;  %p3973_p9 = scmp.ne.s32.totalorder (!%p2510_p8), %s3959_s17, 0 }
  0x51   : > { %2384 = dma.done.wait (%p3973_p9), [#allocation9], 16  }
  0x52   : > { %2386 = vsyncadd (%p3973_p9), [#allocation9], 4294967280  ;;  %s2621_s18 = sand.u32 1, %s2401_s10   ;;  %p3974_p1 = scmp.ne.s32.totalorder %s3961_s19, 0 }
  0x53   : > { %s2063_s5 = sshll.u32 %s2621_s18, 3  ;;  %s163_s4 = scalar_lea.sflag [#allocation7], %s2621_s18 }
  0x54   : > { %s166_s6 = scalar_lea.vmem [#allocation10], %s2063_s5 }
  0x55   : > { %2388 = dma.done.wait (%p3974_p1), %s163_s4, 128  }
  0x56   : > { %2390 = vsyncadd (%p3974_p1), %s163_s4, 4294967168 }
  0x57   : > { %171 = sfence }
  0x58   : > { %v192_v0 = vlaneseq  ;;  %v198_v1 = vld [vmem:[%s166_s6] sm:$0xff]  ;;  %vm202_vm0 = vcmask 1043456   ;;  %v2421_v8 = vmov -inf   ;;  %v2422_v11 = vmov 0.0   ;;  %s2424_s17 = smov 115   ;;  %s2425_s19 = smov 3  }
  0x59   : > { %v200_v2 = vcombine.high %v198_v1, %v198_v1  ;;  %v203_v3 = vsel %vm202_vm0, %v198_v1, 0.0  ;;  %v219_v4 = vsel %vm202_vm0, %v198_v1, -inf  ;;  %vm285_vm2 = vcmask 23552   ;;  %s2426_s21 = smov 99   ;;  %s2427_s30 = smov 83  }
  0x5a   : > { %vm2629_vm1 = vcmp.lt.s32.totalorder %v192_v0, 256  ;;  %v204_v6 = vrot.slane %v203_v3, 4  ;;  %v220_v7 = vrot.slane %v219_v4, 4  ;;  %293 = vst.msk [vmem:[#allocation5 + $0x3] sm:$0xff] %vm285_vm2, %v2422_v11  ;;  %286 = vst.msk [vmem:[#allocation4 + $0x3] sm:$0xff] %vm285_vm2, %v2422_v11  ;;  %vm288_vm3 = vcmask 179352  }
  0x5b   : > { %197 = vst.msk [vmem:[#allocation3] sm:$0x3] %vm2629_vm1, %v2421_v8  ;;  %v210_v9 = vsel %vm202_vm0, %v200_v2, 0.0  ;;  %v226_v10 = vsel %vm202_vm0, %v200_v2, -inf  ;;  %196 = vst.msk [vmem:[#allocation2] sm:$0x3] %vm2629_vm1, %v2422_v11 }
  0x5c   : > { %v211_v12 = vrot.slane %v210_v9, 4  ;;  %v221_v13 = vmax.f32 %v219_v4, %v220_v7  ;;  %v227_v14 = vrot.slane %v226_v10, 4  ;;  %287 = vst.msk [vmem:[#allocation4 + $0xb] sm:$0xff] %vm285_vm2, %v2422_v11  ;;  %294 = vst.msk [vmem:[#allocation5 + $0xb] sm:$0xff] %vm285_vm2, %v2422_v11  ;;  %v205_v15 = vadd.f32 %v204_v6, %v203_v3  ;;  %s2428_s3 = smov 67   ;;  %s2429_s25 = smov 51  }
  0x5d   : > { %v2423_v18 = vmov 1966171168   ;;  %295 = vst.msk [vmem:[#allocation5 + $0x3] sm:$0xff] %vm288_vm3, %v2422_v11  ;;  %289 = vst.msk [vmem:[#allocation4 + $0x3] sm:$0xff] %vm288_vm3, %v2422_v11  ;;  %v241_v25 = vshrl.u32 %v192_v0, 7  ;;  %vm282_vm4 = vcmask 174080  }
  0x5e   : > { %v222_v16 = vrot.slane %v221_v13, 2  ;;  %v228_v17 = vmax.f32 %v226_v10, %v227_v14  ;;  %v238_v19 = vunpack.c.l.s4 %v2423_v18  ;;  %v212_v20 = vadd.f32 %v211_v12, %v210_v9  ;;  %290 = vst.msk [vmem:[#allocation4 + $0xb] sm:$0xff] %vm288_vm3, %v2422_v11  ;;  %296 = vst.msk [vmem:[#allocation5 + $0xb] sm:$0xff] %vm288_vm3, %v2422_v11  ;;  %s2430_s7 = smov 35   ;;  %s2431_s16 = smov 19  }
  0x5f   : > { %v206_v21 = vrot.slane %v205_v15, 2  ;;  %v2641_v49 = vsub.s32 0, %v241_v25  ;;  %291 = vst.msk [vmem:[#allocation5] sm:$0x7] %vm282_vm4, %v2422_v11  ;;  %283 = vst.msk [vmem:[#allocation4] sm:$0x7] %vm282_vm4, %v2422_v11 }
  0x60   : > { %v223_v22 = vmax.f32 %v221_v13, %v222_v16  ;;  %v229_v23 = vrot.slane %v228_v17, 2  ;;  %v213_v24 = vrot.slane %v212_v20, 2  ;;  %v239_v29 = vunpack.c.0.s8 %v238_v19  ;;  %284 = vst.msk [vmem:[#allocation4 + $0x13] sm:$0x7] %vm282_vm4, %v2422_v11  ;;  %292 = vst.msk [vmem:[#allocation5 + $0x13] sm:$0x7] %vm282_vm4, %v2422_v11 }
  0x61   : > { %v207_v26 = vadd.f32 %v206_v21, %v205_v15  ;;  %vm308_vm5 = vcmask 147480   ;;  %s2697_s8 = sld [smem:[#allocation6 + $0x32]]  ;;  %s2701_s24 = sld [smem:[#allocation6 + $0x33]]  ;;  %vm1940_vm6 = vcmask 130048  }
  0x62   : > { %v224_v27 = vrot.slane %v223_v22, 1  ;;  %v230_v28 = vmax.f32 %v228_v17, %v229_v23  ;;  %v214_v30 = vadd.f32 %v213_v24, %v212_v20  ;;  %v242_v37 = vsub.s32 %v239_v29, %v241_v25  ;;  %v258_v43 = vld [vmem:[#allocation3] sm:$0x3]  ;;  %v233_v44 = vld [vmem:[#allocation2] sm:$0x3]  ;;  %s2706_s23 = sld [smem:[#allocation6 + $0x34]] }
  0x63   : > { %v208_v31 = vrot.slane %v207_v26, 1  ;;  %s2716_s27 = sld [smem:[#allocation6 + $0x35]]  ;;  %s3942_s28 = smov 127  }
  0x64   : > { %v225_v32 = vmax.f32 %v223_v22, %v224_v27  ;;  %v231_v33 = vrot.slane %v230_v28, 1  ;;  %v215_v34 = vrot.slane %v214_v30, 1  ;;  %s2725_s29 = sld [smem:[#allocation6 + $0x36]]  ;;  %s3946_s5 = smov 126  }
  0x65   : > { %v209_v35 = vadd.f32 %v208_v31, %v207_v26  ;;  %s2734_s4 = sld [smem:[#allocation6 + $0x37]]  ;;  %s3944_s6 = smov 125  }
  0x66   : > { %v232_v36 = vmax.f32 %v230_v28, %v231_v33  ;;  %v216_v38 = vadd.f32 %v215_v34, %v214_v30  ;;  %s2974_s0 = sld [smem:[#allocation6 + $0x11]]  ;;  %s3009_s1 = sld [smem:[#allocation6 + $0x43]] }
  0x67   : > { %s3982_s22 = smov 124   ;;  %s3052_s13 = sld [smem:[#allocation6 + $0x3f]] }
  0x68   : > { %v261_v39 = vcombine.low %v225_v32, %v232_v36  ;;  %v236_v40 = vcombine.low %v209_v35, %v216_v38  ;;  %s3095_s26 = sld [smem:[#allocation6 + $0x38]]  ;;  %s3140_s11 = sld [smem:[#allocation6 + $0x46]] }
  0x69   : > { %s3182_s10 = sld [smem:[#allocation6]]  ;;  %p3983_p8 = scmp.ne.s32.totalorder %s3969_s15, 0 }
  0x6a   : > { %v268_v41 = vrot.slane %v261_v39, %v242_v37  ;;  %v243_v42 = vrot.slane %v236_v40, %v242_v37 }
  0x6c   : > { %v275_v45 = vrot.slane %v268_v41, %v242_v37  ;;  %v250_v46 = vrot.slane %v243_v42, %v242_v37 }
  0x6e   : > { %v277_v47 = vmax.f32 %v258_v43, %v275_v45  ;;  %v252_v48 = vadd.f32 %v250_v46, %v233_v44  ;;  %v665_v46 = vstv %s2697_s8  ;;  %s2817_s8 = sld [smem:[#allocation6 + $0x2]] }
  0x70   : > { %278 = vst.msk [vmem:[#allocation3] sm:$0x3] %vm2629_vm1, %v277_v47  ;;  %257 = vst.msk [vmem:[#allocation2] sm:$0x3] %vm2629_vm1, %v252_v48 }
  0x77   : > { %v2066_v50 = vld [vmem:[#allocation3] ss:$0 sm:$0xff]  ;;  %v297_v51 = vld [vmem:[#allocation2] sm:$0x1]  ;;  %v466_v7 = vld [vmem:[#allocation2 + $0x1] sm:$0x1] }
  0x78   : > { %v340_v52 = vld [vmem:[#allocation2] sm:$0x1]  ;;  %336 = vrot.lane.b32.xlu1 %v2066_v50, %s2424_s17  ;;  %315 = vrot.lane.b32.xlu0 %v2066_v50, %s2425_s19  ;;  %v299_v53 = vmul.f32 0.25, %v297_v51  ;;  %v468_v9 = vmul.f32 0.25, %v466_v7  ;;  %v2073_v10 = vld [vmem:[#allocation3 + $0x1] ss:$0 sm:$0xff]  ;;  %v693_v51 = vstv %s2701_s24 }
  0x79   : > { %v342_v54 = vmul.f32 0.25, %v340_v52  ;;  %v361_v55 = vld [vmem:[#allocation2] sm:$0x1]  ;;  %v487_v12 = vld [vmem:[#allocation2 + $0x1] sm:$0x1]  ;;  %s2828_s24 = sld [smem:[#allocation6 + $0x3]] }
  0x7a   : > { %v304_v56 = vrot.slane %v299_v53, %v2641_v49  ;;  %v363_v58 = vmul.f32 0.25, %v361_v55  ;;  %v382_v59 = vld [vmem:[#allocation2] sm:$0x1]  ;;  %v473_v14 = vrot.slane %v468_v9, %v2641_v49  ;;  %v489_v15 = vmul.f32 0.25, %v487_v12  ;;  %v508_v16 = vld [vmem:[#allocation2 + $0x1] sm:$0x1] }
  0x7b   : > { %v347_v57 = vrot.slane %v342_v54, %v2641_v49  ;;  %v384_v61 = vmul.f32 0.25, %v382_v59  ;;  %v403_v62 = vld [vmem:[#allocation2] sm:$0x1]  ;;  %v510_v19 = vmul.f32 0.25, %v508_v16  ;;  %v529_v20 = vld [vmem:[#allocation2 + $0x1] sm:$0x1]  ;;  %v721_v55 = vstv %s2706_s23 }
  0x7c   : > { %357 = vrot.lane.b32.xlu1 %v2066_v50, %s2426_s21  ;;  %305 = vrot.lane.b32.xlu0 %v304_v56, %s2425_s19  ;;  %v368_v60 = vrot.slane %v363_v58, %v2641_v49  ;;  %v405_v0 = vmul.f32 0.25, %v403_v62  ;;  %v424_v1 = vld [vmem:[#allocation2] sm:$0x1]  ;;  %v494_v18 = vrot.slane %v489_v15, %v2641_v49  ;;  %v531_v22 = vmul.f32 0.25, %v529_v20  ;;  %v550_v23 = vld [vmem:[#allocation2 + $0x1] sm:$0x1] }
  0x7d   : > { %v389_v63 = vrot.slane %v384_v61, %v2641_v49  ;;  %v426_v3 = vmul.f32 0.25, %v424_v1  ;;  %v445_v4 = vld [vmem:[#allocation2] sm:$0x1]  ;;  %v515_v21 = vrot.slane %v510_v19, %v2641_v49  ;;  %v552_v25 = vmul.f32 0.25, %v550_v23  ;;  %v571_v26 = vld [vmem:[#allocation2 + $0x1] sm:$0x1] }
  0x7e   : > { %v410_v2 = vrot.slane %v405_v0, %v2641_v49  ;;  %v447_v6 = vmul.f32 0.25, %v445_v4  ;;  %v319_v11 = vld [vmem:[#allocation2] sm:$0x1]  ;;  %v536_v24 = vrot.slane %v531_v22, %v2641_v49  ;;  %v573_v28 = vmul.f32 0.25, %v571_v26  ;;  %v592_v29 = vld [vmem:[#allocation2 + $0x1] sm:$0x1] }
  0x7f   : > { %v431_v5 = vrot.slane %v426_v3, %v2641_v49  ;;  %v321_v13 = vmul.f32 0.25, %v319_v11  ;;  %v557_v27 = vrot.slane %v552_v25, %v2641_v49  ;;  %v594_v31 = vmul.f32 0.25, %v592_v29  ;;  %v613_v32 = vld [vmem:[#allocation2 + $0x1] sm:$0x1]  ;;  %s2837_s23 = sld [smem:[#allocation6 + $0x4]] }
  0x80   : > { %378 = vrot.lane.b32.xlu1 %v2066_v50, %s2427_s30  ;;  %348 = vrot.lane.b32.xlu0 %v347_v57, %s2426_s21  ;;  %v452_v8 = vrot.slane %v447_v6, %v2641_v49  ;;  %v578_v30 = vrot.slane %v573_v28, %v2641_v49  ;;  %v615_v34 = vmul.f32 0.25, %v613_v32  ;;  %v749_v59 = vstv %s2716_s27  ;;  %s2857_s27 = sld [smem:[#allocation6 + $0x6]] }
  0x81   : > { %v326_v17 = vrot.slane %v321_v13, %v2641_v49  ;;  %v599_v33 = vrot.slane %v594_v31, %v2641_v49  ;;  %v805_v3 = vstv %s2734_s4  ;;  %s2866_s4 = sld [smem:[#allocation6 + $0x8]] }
  0x82   : > { %v620_v35 = vrot.slane %v615_v34, %v2641_v49 }
  0x84   : > { %399 = vrot.lane.b32.xlu1 %v2066_v50, %s2428_s3  ;;  %369 = vrot.lane.b32.xlu0 %v368_v60, %s2427_s30 }
  0x88   : > { %420 = vrot.lane.b32.xlu1 %v2066_v50, %s2429_s25  ;;  %390 = vrot.lane.b32.xlu0 %v389_v63, %s2428_s3  ;;  %v777_v63 = vstv %s2725_s29  ;;  %s3980_s29 = smov 125  }
  0x8c   : > { %441 = vrot.lane.b32.xlu1 %v2066_v50, %s2430_s7  ;;  %411 = vrot.lane.b32.xlu0 %v410_v2, %s2429_s25 }
  0x90   : > { %462 = vrot.lane.b32.xlu1 %v2066_v50, %s2431_s16  ;;  %432 = vrot.lane.b32.xlu0 %v431_v5, %s2430_s7 }
  0x94   : > { %483 = vrot.lane.b32.xlu1 %v2073_v10, %s2425_s19  ;;  %453 = vrot.lane.b32.xlu0 %v452_v8, %s2431_s16 }
  0x98   : > { %504 = vrot.lane.b32.xlu1 %v2073_v10, %s2424_s17  ;;  %474 = vrot.lane.b32.xlu0 %v473_v14, %s2425_s19  ;;  %s3948_s19 = smov 124  }
  0x9c   : > { %327 = vrot.lane.b32.xlu1 %v326_v17, %s2424_s17  ;;  %495 = vrot.lane.b32.xlu0 %v494_v18, %s2424_s17  ;;  %s2743_s17 = sld [smem:[#allocation6 + $0x39]] }
  0xa0   : > { %525 = vrot.lane.b32.xlu1 %v2073_v10, %s2426_s21  ;;  %516 = vrot.lane.b32.xlu0 %v515_v21, %s2426_s21  ;;  %s2752_s21 = sld [smem:[#allocation6 + $0x3a]] }
  0xa2   : > { %v849_v8 = vstv %s2743_s17  ;;  %s2877_s17 = sld [smem:[#allocation6 + $0x9]] }
  0xa4   : > { %546 = vrot.lane.b32.xlu1 %v2073_v10, %s2427_s30  ;;  %537 = vrot.lane.b32.xlu0 %v536_v24, %s2427_s30  ;;  %s3940_s30 = smov 123  }
  0xa6   : > { %v877_v12 = vstv %s2752_s21  ;;  %s2890_s21 = sld [smem:[#allocation6 + $0xa]] }
  0xa8   : > { %567 = vrot.lane.b32.xlu1 %v2073_v10, %s2428_s3  ;;  %558 = vrot.lane.b32.xlu0 %v557_v27, %s2428_s3  ;;  %s2763_s3 = sld [smem:[#allocation6 + $0x3b]] }
  0xac   : > { %588 = vrot.lane.b32.xlu1 %v2073_v10, %s2429_s25  ;;  %579 = vrot.lane.b32.xlu0 %v578_v30, %s2429_s25  ;;  %s3938_s25 = smov 122  }
  0xae   : > { %v905_v16 = vstv %s2763_s3  ;;  %s2901_s3 = sld [smem:[#allocation6 + $0xb]] }
  0xb0   : > { %609 = vrot.lane.b32.xlu1 %v2073_v10, %s2430_s7  ;;  %600 = vrot.lane.b32.xlu0 %v599_v33, %s2430_s7  ;;  %s2772_s7 = sld [smem:[#allocation6 + $0x3c]] }
  0xb4   : > { %630 = vrot.lane.b32.xlu1 %v2073_v10, %s2431_s16  ;;  %621 = vrot.lane.b32.xlu0 %v620_v35, %s2431_s16  ;;  %s2781_s16 = sld [smem:[#allocation6 + $0x3d]] }
  0xb6   : > { %v933_v20 = vstv %s2772_s7  ;;  %s2912_s7 = sld [smem:[#allocation6 + $0xc]] }
  0xba   : > { %v961_v26 = vstv %s2781_s16  ;;  %s2923_s16 = sld [smem:[#allocation6 + $0xd]] }
  0xea   : > { %v337_v36 = vpop.permute.xlu1 %336  ;;  %v316_v37 = vpop.permute.xlu0 %315 }
  0xeb   : > { %339 = vst.msk [vmem:[#allocation5 + $0x4] sm:$0x1] %vm308_vm5, %v337_v36  ;;  %318 = vst.msk [vmem:[#allocation5 + $0x3] sm:$0x1] %vm308_vm5, %v316_v37 }
  0xee   : > { %v358_v38 = vpop.permute.xlu1 %357  ;;  %v306_v39 = vpop.permute.xlu0 %305 }
  0xef   : > { %360 = vst.msk [vmem:[#allocation5 + $0x5] sm:$0x1] %vm308_vm5, %v358_v38  ;;  %309 = vst.msk [vmem:[#allocation4 + $0x3] sm:$0x1] %vm308_vm5, %v306_v39  ;;  %v680_v38 = vstv %s2817_s8  ;;  %s2932_s8 = sld [smem:[#allocation6 + $0xf]] }
  0xf2   : > { %v379_v40 = vpop.permute.xlu1 %378  ;;  %v349_v41 = vpop.permute.xlu0 %348 }
  0xf3   : > { %381 = vst.msk [vmem:[#allocation5 + $0x6] sm:$0x1] %vm308_vm5, %v379_v40  ;;  %351 = vst.msk [vmem:[#allocation4 + $0x5] sm:$0x1] %vm308_vm5, %v349_v41  ;;  %v708_v41 = vstv %s2828_s24  ;;  %s2941_s24 = sld [smem:[#allocation6 + $0x40]] }
  0xf6   : > { %v400_v42 = vpop.permute.xlu1 %399  ;;  %v370_v43 = vpop.permute.xlu0 %369 }
  0xf7   : > { %402 = vst.msk [vmem:[#allocation5 + $0x7] sm:$0x1] %vm308_vm5, %v400_v42  ;;  %372 = vst.msk [vmem:[#allocation4 + $0x6] sm:$0x1] %vm308_vm5, %v370_v43 }
  0xfa   : > { %v421_v44 = vpop.permute.xlu1 %420  ;;  %v391_v45 = vpop.permute.xlu0 %390 }
  0xfb   : > { %423 = vst.msk [vmem:[#allocation5 + $0x8] sm:$0x1] %vm308_vm5, %v421_v44  ;;  %393 = vst.msk [vmem:[#allocation4 + $0x7] sm:$0x1] %vm308_vm5, %v391_v45  ;;  %v736_v45 = vstv %s2837_s23  ;;  %s2952_s23 = sld [smem:[#allocation6 + $0x10]] }
  0xfe   : > { %v442_v47 = vpop.permute.xlu1 %441  ;;  %v2708_v48 = vld [vmem:[#allocation5] sm:$0xff]  ;;  %v412_v49 = vpop.permute.xlu0 %411 }
  0xff   : > { %444 = vst.msk [vmem:[#allocation5 + $0x9] sm:$0x1] %vm308_vm5, %v442_v47  ;;  %v666_v50 = vmul.f32 %v665_v46, %v2708_v48  ;;  %414 = vst.msk [vmem:[#allocation4 + $0x8] sm:$0x1] %vm308_vm5, %v412_v49  ;;  %v694_v54 = vmul.f32 %v693_v51, %v2708_v48  ;;  %v722_v58 = vmul.f32 %v721_v55, %v2708_v48 }
 0x100   : > { %v750_v62 = vmul.f32 %v749_v59, %v2708_v48  ;;  %v778_v2 = vmul.f32 %v777_v63, %v2708_v48  ;;  %v806_v6 = vmul.f32 %v805_v3, %v2708_v48 }
 0x101   : > { %670 = vrot.lane.b32.xlu0 %v666_v50, %s3942_s28 }
 0x102   : > { %v463_v52 = vpop.permute.xlu1 %462  ;;  %v433_v53 = vpop.permute.xlu0 %432  ;;  %v2760_v7 = vld [vmem:[#allocation5 + $0x1] sm:$0xff] }
 0x103   : > { %465 = vst.msk [vmem:[#allocation5 + $0xa] sm:$0x1] %vm308_vm5, %v463_v52  ;;  %435 = vst.msk [vmem:[#allocation4 + $0x9] sm:$0x1] %vm308_vm5, %v433_v53  ;;  %v850_v11 = vmul.f32 %v849_v8, %v2760_v7  ;;  %v878_v15 = vmul.f32 %v877_v12, %v2760_v7  ;;  %v906_v19 = vmul.f32 %v905_v16, %v2760_v7  ;;  %v792_v52 = vstv %s2857_s27  ;;  %s2998_s27 = sld [smem:[#allocation6 + $0x12]] }
 0x104   : > { %v934_v25 = vmul.f32 %v933_v20, %v2760_v7  ;;  %v962_v30 = vmul.f32 %v961_v26, %v2760_v7 }
 0x105   : > { %698 = vrot.lane.b32.xlu0 %v694_v54, %s3946_s5 }
 0x106   : > { %v484_v56 = vpop.permute.xlu1 %483  ;;  %v454_v57 = vpop.permute.xlu0 %453 }
 0x107   : > { %486 = vst.msk [vmem:[#allocation5 + $0xb] sm:$0x1] %vm308_vm5, %v484_v56  ;;  %456 = vst.msk [vmem:[#allocation4 + $0xa] sm:$0x1] %vm308_vm5, %v454_v57  ;;  %v836_v56 = vstv %s2866_s4  ;;  %s3013_s4 = sld [smem:[#allocation6 + $0x31]] }
 0x109   : > { %726 = vrot.lane.b32.xlu0 %v722_v58, %s3944_s6 }
 0x10a   : > { %v505_v60 = vpop.permute.xlu1 %504  ;;  %v475_v61 = vpop.permute.xlu0 %474 }
 0x10b   : > { %507 = vst.msk [vmem:[#allocation5 + $0xc] sm:$0x1] %vm308_vm5, %v505_v60  ;;  %477 = vst.msk [vmem:[#allocation4 + $0xb] sm:$0x1] %vm308_vm5, %v475_v61 }
 0x10d   : > { %754 = vrot.lane.b32.xlu0 %v750_v62, %s3948_s19  ;;  %v892_v62 = vstv %s2890_s21  ;;  %s3033_s21 = sld [smem:[#allocation6 + $0x44]] }
 0x10e   : > { %v328_v0 = vpop.permute.xlu1 %327  ;;  %v496_v1 = vpop.permute.xlu0 %495 }
 0x10f   : > { %330 = vst.msk [vmem:[#allocation4 + $0x4] sm:$0x1] %vm308_vm5, %v328_v0  ;;  %498 = vst.msk [vmem:[#allocation4 + $0xc] sm:$0x1] %vm308_vm5, %v496_v1  ;;  %v920_v1 = vstv %s2901_s3  ;;  %s3048_s3 = sld [smem:[#allocation6 + $0x14]] }
 0x111   : > { %782 = vrot.lane.b32.xlu0 %v778_v2, %s3940_s30  ;;  %s2804_s30 = sld [smem:[#allocation6 + $0x1]] }
 0x112   : > { %v526_v4 = vpop.permute.xlu1 %525  ;;  %v517_v5 = vpop.permute.xlu0 %516 }
 0x113   : > { %528 = vst.msk [vmem:[#allocation5 + $0xd] sm:$0x1] %vm308_vm5, %v526_v4  ;;  %519 = vst.msk [vmem:[#allocation4 + $0xd] sm:$0x1] %vm308_vm5, %v517_v5  ;;  %v948_v5 = vstv %s2912_s7  ;;  %s3063_s7 = sld [smem:[#allocation6 + $0x45]] }
 0x115   : > { %810 = vrot.lane.b32.xlu0 %v806_v6, %s3938_s25  ;;  %s2790_s25 = sld [smem:[#allocation6 + $0x3e]] }
 0x116   : > { %v547_v9 = vpop.permute.xlu1 %546  ;;  %v538_v10 = vpop.permute.xlu0 %537  ;;  %v2825_v34 = vld [vmem:[#allocation4] sm:$0xff] }
 0x117   : > { %549 = vst.msk [vmem:[#allocation5 + $0xe] sm:$0x1] %vm308_vm5, %v547_v9  ;;  %540 = vst.msk [vmem:[#allocation4 + $0xe] sm:$0x1] %vm308_vm5, %v538_v10  ;;  %v652_v35 = vstv %s2804_s30  ;;  %s3979_s30 = smov 127   ;;  %v681_v40 = vmul.f32 %v680_v38, %v2825_v34  ;;  %v709_v43 = vmul.f32 %v708_v41, %v2825_v34  ;;  %v737_v47 = vmul.f32 %v736_v45, %v2825_v34 }
 0x118   : > { %v653_v37 = vmul.f32 %v652_v35, %v2825_v34  ;;  %v793_v54 = vmul.f32 %v792_v52, %v2825_v34  ;;  %v976_v9 = vstv %s2923_s16  ;;  %s3076_s16 = sld [smem:[#allocation6 + $0x16]] }
 0x119   : > { %854 = vrot.lane.b32.xlu0 %v850_v11, %s3942_s28 }
 0x11a   : > { %v568_v13 = vpop.permute.xlu1 %567  ;;  %v559_v14 = vpop.permute.xlu0 %558 }
 0x11b   : > { %570 = vst.msk [vmem:[#allocation5 + $0xf] sm:$0x1] %vm308_vm5, %v568_v13  ;;  %561 = vst.msk [vmem:[#allocation4 + $0xf] sm:$0x1] %vm308_vm5, %v559_v14  ;;  %v989_v31 = vstv %s2790_s25  ;;  %s3978_s25 = smov 122   ;;  %v1020_v13 = vstv %s2932_s8  ;;  %s3088_s8 = sld [smem:[#allocation6 + $0x47]] }
 0x11c   : > { %v990_v33 = vmul.f32 %v989_v31, %v2760_v7 }
 0x11d   : > { %882 = vrot.lane.b32.xlu0 %v878_v15, %s3946_s5 }
 0x11e   : > { %v589_v17 = vpop.permute.xlu1 %588  ;;  %v580_v18 = vpop.permute.xlu0 %579 }
 0x11f   : > { %591 = vst.msk [vmem:[#allocation5 + $0x10] sm:$0x1] %vm308_vm5, %v589_v17  ;;  %582 = vst.msk [vmem:[#allocation4 + $0x10] sm:$0x1] %vm308_vm5, %v580_v18  ;;  %v1033_v17 = vstv %s2941_s24  ;;  %s3108_s24 = sld [smem:[#allocation6 + $0x17]] }
 0x121   : > { %910 = vrot.lane.b32.xlu0 %v906_v19, %s3944_s6 }
 0x122   : > { %v610_v21 = vpop.permute.xlu1 %609  ;;  %v2793_v22 = vld [vmem:[#allocation5 + $0x8] sm:$0xff]  ;;  %v601_v23 = vpop.permute.xlu0 %600  ;;  %v2921_v2 = vld [vmem:[#allocation4 + $0x8] sm:$0xff] }
 0x123   : > { %612 = vst.msk [vmem:[#allocation5 + $0x11] sm:$0x1] %vm308_vm5, %v610_v21  ;;  %v667_v24 = vmul.f32 %v665_v46, %v2793_v22  ;;  %603 = vst.msk [vmem:[#allocation4 + $0x11] sm:$0x1] %vm308_vm5, %v601_v23  ;;  %v695_v29 = vmul.f32 %v693_v51, %v2793_v22  ;;  %v723_v32 = vmul.f32 %v721_v55, %v2793_v22  ;;  %v2887_v55 = vld [vmem:[#allocation4 + $0x1] sm:$0xff] }
 0x124   : > { %v751_v36 = vmul.f32 %v749_v59, %v2793_v22  ;;  %v779_v39 = vmul.f32 %v777_v63, %v2793_v22  ;;  %v807_v42 = vmul.f32 %v805_v3, %v2793_v22  ;;  %v837_v58 = vmul.f32 %v836_v56, %v2887_v55 }
 0x125   : > { %672 = vrot.lane.b32.xlu1 %v667_v24, %s3942_s28  ;;  %938 = vrot.lane.b32.xlu0 %v934_v25, %s3948_s19  ;;  %s3977_s28 = smov 123   ;;  %v864_v59 = vstv %s2877_s17  ;;  %v893_v0 = vmul.f32 %v892_v62, %v2887_v55  ;;  %v921_v3 = vmul.f32 %v920_v1, %v2887_v55  ;;  %v654_v4 = vmul.f32 %v652_v35, %v2921_v2  ;;  %s3022_s17 = sld [smem:[#allocation6 + $0x13]] }
 0x126   : > { %v631_v27 = vpop.permute.xlu1 %630  ;;  %v622_v28 = vpop.permute.xlu0 %621  ;;  %v2854_v44 = vld [vmem:[#allocation5 + $0x9] sm:$0xff]  ;;  %v865_v61 = vmul.f32 %v864_v59, %v2887_v55  ;;  %v949_v6 = vmul.f32 %v948_v5, %v2887_v55  ;;  %v977_v10 = vmul.f32 %v976_v9, %v2887_v55  ;;  %v710_v11 = vmul.f32 %v708_v41, %v2921_v2  ;;  %v2985_v25 = vld [vmem:[#allocation4 + $0x9] sm:$0xff] }
 0x127   : > { %633 = vst.msk [vmem:[#allocation5 + $0x12] sm:$0x1] %vm308_vm5, %v631_v27  ;;  %624 = vst.msk [vmem:[#allocation4 + $0x12] sm:$0x1] %vm308_vm5, %v622_v28  ;;  %v851_v46 = vmul.f32 %v849_v8, %v2854_v44  ;;  %v879_v50 = vmul.f32 %v877_v12, %v2854_v44  ;;  %v907_v53 = vmul.f32 %v905_v16, %v2854_v44  ;;  %v2949_v12 = vld [vmem:[#allocation4 + $0x2] sm:$0xff]  ;;  %v2960_v16 = vld [vmem:[#allocation5 + $0x2] sm:$0xff]  ;;  %v1076_v28 = vstv %s2974_s0 }
 0x128   : > { %v935_v57 = vmul.f32 %v933_v20, %v2854_v44  ;;  %v963_v60 = vmul.f32 %v961_v26, %v2854_v44  ;;  %v991_v63 = vmul.f32 %v989_v31, %v2854_v44  ;;  %v682_v8 = vmul.f32 %v680_v38, %v2921_v2  ;;  %s3149_s0 = sld [smem:[#allocation6 + $0x49]] }
 0x129   : > { %700 = vrot.lane.b32.xlu1 %v695_v29, %s3946_s5  ;;  %966 = vrot.lane.b32.xlu0 %v962_v30, %s3977_s28  ;;  %v1021_v14 = vmul.f32 %v1020_v13, %v2949_v12  ;;  %v738_v15 = vmul.f32 %v736_v45, %v2921_v2  ;;  %v1034_v18 = vmul.f32 %v1033_v17, %v2960_v16  ;;  %v1048_v20 = vstv %s2952_s23  ;;  %s3121_s23 = sld [smem:[#allocation6 + $0x48]] }
 0x12a   : > { %v1049_v21 = vmul.f32 %v1048_v20, %v2949_v12  ;;  %v794_v23 = vmul.f32 %v792_v52, %v2921_v2  ;;  %v838_v27 = vmul.f32 %v836_v56, %v2985_v25  ;;  %v1077_v29 = vmul.f32 %v1076_v28, %v2949_v12 }
 0x12b   : > { %v866_v30 = vmul.f32 %v864_v59, %v2985_v25  ;;  %v894_v35 = vmul.f32 %v892_v62, %v2985_v25  ;;  %v645_v41 = vstv %s3013_s4  ;;  %v950_v45 = vmul.f32 %v948_v5, %v2985_v25  ;;  %v3074_v62 = vld [vmem:[#allocation5 + $0xa] sm:$0xff]  ;;  %s3204_s4 = sld [smem:[#allocation6 + $0x4b]] }
 0x12d   : > { %728 = vrot.lane.b32.xlu1 %v723_v32, %s3944_s6  ;;  %994 = vrot.lane.b32.xlu0 %v990_v33, %s3978_s25  ;;  %s2846_s6 = sld [smem:[#allocation6 + $0x5]] }
 0x131   : > { %756 = vrot.lane.b32.xlu1 %v751_v36, %s3948_s19  ;;  %657 = vrot.lane.b32.xlu0 %v653_v37, %s3979_s30  ;;  %v1104_v36 = vstv %s2998_s27  ;;  %s3175_s27 = sld [smem:[#allocation6 + $0x4a]] }
 0x132   : > { %v1105_v38 = vmul.f32 %v1104_v36, %v2949_v12 }
 0x133   : > { %v764_v49 = vstv %s2846_s6  ;;  %s2987_s6 = sld [smem:[#allocation6 + $0x42]] }
 0x134   : > { %v765_v51 = vmul.f32 %v764_v49, %v2825_v34  ;;  %v766_v19 = vmul.f32 %v764_v49, %v2921_v2 }
 0x135   : > { %784 = vrot.lane.b32.xlu1 %v779_v39, %s3977_s28  ;;  %685 = vrot.lane.b32.xlu0 %v681_v40, %s3946_s5  ;;  %v922_v39 = vmul.f32 %v920_v1, %v2985_v25  ;;  %v1117_v40 = vstv %s3009_s1  ;;  %s3193_s1 = sld [smem:[#allocation6 + $0x1a]] }
 0x139   : > { %812 = vrot.lane.b32.xlu1 %v807_v42, %s3978_s25  ;;  %713 = vrot.lane.b32.xlu0 %v709_v43, %s3980_s29  ;;  %v1089_v31 = vstv %s2987_s6  ;;  %v1118_v43 = vmul.f32 %v1117_v40, %v2960_v16  ;;  %s3160_s6 = sld [smem:[#allocation6 + $0x19]] }
 0x13a   : > { %v1090_v33 = vmul.f32 %v1089_v31, %v2960_v16 }
 0x13d   : > { %856 = vrot.lane.b32.xlu1 %v851_v46, %s3979_s30  ;;  %741 = vrot.lane.b32.xlu0 %v737_v47, %s3948_s19  ;;  %v646_v46 = vmul.f32 %v645_v41, %v2708_v48  ;;  %v1132_v47 = vstv %s3022_s17  ;;  %v978_v48 = vmul.f32 %v976_v9, %v2985_v25  ;;  %s3219_s17 = sld [smem:[#allocation6 + $0x1b]] }
 0x141   : > { %884 = vrot.lane.b32.xlu1 %v879_v50, %s3946_s5  ;;  %769 = vrot.lane.b32.xlu0 %v765_v51, %s3977_s28  ;;  %v1133_v51 = vmul.f32 %v1132_v47, %v2949_v12 }
 0x145   : > { %912 = vrot.lane.b32.xlu1 %v907_v53, %s3980_s29  ;;  %797 = vrot.lane.b32.xlu0 %v793_v54, %s3978_s25  ;;  %v1145_v53 = vstv %s3033_s21  ;;  %v3061_v54 = vld [vmem:[#allocation4 + $0xa] sm:$0xff]  ;;  %s3226_s21 = sld [smem:[#allocation6 + $0xe]] }
 0x146   : > { %v1022_v59 = vmul.f32 %v1020_v13, %v3061_v54  ;;  %v1050_v13 = vmul.f32 %v1048_v20, %v3061_v54  ;;  %v1217_v20 = vstv %s3088_s8  ;;  %s3300_s8 = sld [smem:[#allocation6 + $0x4f]] }
 0x149   : > { %940 = vrot.lane.b32.xlu1 %v935_v57, %s3948_s19  ;;  %841 = vrot.lane.b32.xlu0 %v837_v58, %s3979_s30  ;;  %v1146_v58 = vmul.f32 %v1145_v53, %v2960_v16 }
 0x14d   : > { %968 = vrot.lane.b32.xlu1 %v963_v60, %s3977_s28  ;;  %869 = vrot.lane.b32.xlu0 %v865_v61, %s3946_s5  ;;  %v1160_v61 = vstv %s3048_s3  ;;  %s3252_s3 = sld [smem:[#allocation6 + $0x1d]] }
 0x151   : > { %996 = vrot.lane.b32.xlu1 %v991_v63, %s3978_s25  ;;  %897 = vrot.lane.b32.xlu0 %v893_v0, %s3980_s29  ;;  %v1013_v63 = vstv %s3052_s13  ;;  %s3239_s13 = sld [smem:[#allocation6 + $0x4c]] }
 0x155   : > { %925 = vrot.lane.b32.xlu0 %v921_v3, %s3948_s19  ;;  %659 = vrot.lane.b32.xlu1 %v654_v4, %s3979_s30  ;;  %v1161_v3 = vmul.f32 %v1160_v61, %v2949_v12  ;;  %v1035_v4 = vmul.f32 %v1033_v17, %v3074_v62 }
 0x159   : > { %953 = vrot.lane.b32.xlu0 %v949_v6, %s3977_s28  ;;  %687 = vrot.lane.b32.xlu1 %v682_v8, %s3946_s5  ;;  %s2963_s5 = sld [smem:[#allocation6 + $0x41]]  ;;  %v1173_v6 = vstv %s3063_s7  ;;  %v1014_v8 = vmul.f32 %v1013_v63, %v2960_v16  ;;  %s3267_s7 = sld [smem:[#allocation6 + $0x4e]] }
 0x15d   : > { %981 = vrot.lane.b32.xlu0 %v977_v10, %s3978_s25  ;;  %715 = vrot.lane.b32.xlu1 %v710_v11, %s3980_s29  ;;  %v1174_v11 = vmul.f32 %v1173_v6, %v2960_v16 }
 0x15f   : > { %v1061_v24 = vstv %s2963_s5  ;;  %s3136_s5 = sld [smem:[#allocation6 + $0x18]] }
 0x160   : > { %v1062_v26 = vmul.f32 %v1061_v24, %v2960_v16 }
 0x161   : > { %1025 = vrot.lane.b32.xlu0 %v1021_v14, %s3979_s30  ;;  %743 = vrot.lane.b32.xlu1 %v738_v15, %s3948_s19  ;;  %s3981_s19 = smov 126   ;;  %v3105_v14 = vld [vmem:[#allocation4 + $0x3] sm:$0xff]  ;;  %v1204_v15 = vstv %s3076_s16  ;;  %s3274_s16 = sld [smem:[#allocation6 + $0x7]] }
 0x162   : > { %v1205_v16 = vmul.f32 %v1204_v15, %v3105_v14 }
 0x165   : > { %1038 = vrot.lane.b32.xlu0 %v1034_v18, %s3979_s30  ;;  %771 = vrot.lane.b32.xlu1 %v766_v19, %s3977_s28  ;;  %v1063_v18 = vmul.f32 %v1061_v24, %v3074_v62  ;;  %v3118_v19 = vld [vmem:[#allocation5 + $0x3] sm:$0xff]  ;;  %v1078_v24 = vmul.f32 %v1076_v28, %v3061_v54 }
 0x169   : > { %1053 = vrot.lane.b32.xlu0 %v1049_v21, %s3981_s19  ;;  %799 = vrot.lane.b32.xlu1 %v794_v23, %s3978_s25  ;;  %v829_v21 = vstv %s3095_s26  ;;  %s3287_s26 = sld [smem:[#allocation6 + $0x1e]] }
 0x16d   : > { %1066 = vrot.lane.b32.xlu0 %v1062_v26, %s3981_s19  ;;  %843 = vrot.lane.b32.xlu1 %v838_v27, %s3979_s30  ;;  %v1218_v26 = vmul.f32 %v1217_v20, %v3118_v19  ;;  %v830_v27 = vmul.f32 %v829_v21, %v2760_v7  ;;  %v1091_v7 = vmul.f32 %v1089_v31, %v3074_v62 }
 0x16e   : > { %v1106_v31 = vmul.f32 %v1104_v36, %v3061_v54  ;;  %v1119_v36 = vmul.f32 %v1117_v40, %v3074_v62 }
 0x171   : > { %1081 = vrot.lane.b32.xlu0 %v1077_v29, %s3980_s29  ;;  %871 = vrot.lane.b32.xlu1 %v866_v30, %s3981_s19  ;;  %v1232_v29 = vstv %s3108_s24  ;;  %s3315_s24 = sld [smem:[#allocation6 + $0x1f]] }
 0x172   : > { %v1233_v28 = vmul.f32 %v1232_v29, %v3105_v14 }
 0x173   : > { %v671_v32 = vpop.permute.xlu0 %670 }
 0x174   : > { %v676_v49 = vadd.f32 %v671_v32, %v646_v46  ;;  %v1260_v46 = vstv %s3136_s5  ;;  %s3344_s5 = sld [smem:[#allocation6 + $0x20]] }
 0x175   : > { %1094 = vrot.lane.b32.xlu0 %v1090_v33, %s3980_s29  ;;  %899 = vrot.lane.b32.xlu1 %v894_v35, %s3980_s29 }
 0x177   : > { %v699_v37 = vpop.permute.xlu0 %698 }
 0x178   : > { %v704_v52 = vadd.f32 %v699_v37, %v676_v49  ;;  %v1245_v37 = vstv %s3121_s23  ;;  %v1197_v49 = vstv %s3140_s11  ;;  %s3322_s23 = sld [smem:[#allocation6 + $0x15]]  ;;  %s3333_s11 = sld [smem:[#allocation6 + $0x50]] }
 0x179   : > { %1109 = vrot.lane.b32.xlu0 %v1105_v38, %s3982_s22  ;;  %927 = vrot.lane.b32.xlu1 %v922_v39, %s3982_s22 }
 0x17b   : > { %v727_v42 = vpop.permute.xlu0 %726 }
 0x17c   : > { %v732_v56 = vadd.f32 %v727_v42, %v704_v52  ;;  %v1261_v52 = vmul.f32 %v1260_v46, %v3105_v14 }
 0x17d   : > { %1122 = vrot.lane.b32.xlu0 %v1118_v43, %s3982_s22  ;;  %955 = vrot.lane.b32.xlu1 %v950_v45, %s3977_s28  ;;  %v1246_v43 = vmul.f32 %v1245_v37, %v3118_v19 }
 0x17f   : > { %v755_v50 = vpop.permute.xlu0 %754 }
 0x180   : > { %v760_v60 = vadd.f32 %v755_v50, %v732_v56  ;;  %v647_v56 = vmul.f32 %v645_v41, %v2793_v22 }
 0x181   : > { %1137 = vrot.lane.b32.xlu0 %v1133_v51, %s3977_s28  ;;  %983 = vrot.lane.b32.xlu1 %v978_v48, %s3978_s25 }
 0x183   : > { %v783_v57 = vpop.permute.xlu0 %782 }
 0x184   : > { %v788_v0 = vadd.f32 %v783_v57, %v760_v60 }
 0x185   : > { %1150 = vrot.lane.b32.xlu0 %v1146_v58, %s3977_s28  ;;  %1027 = vrot.lane.b32.xlu1 %v1022_v59, %s3979_s30  ;;  %v1273_v58 = vstv %s3149_s0  ;;  %v1198_v59 = vmul.f32 %v1197_v49, %v3118_v19  ;;  %s3359_s0 = sld [smem:[#allocation6 + $0x51]] }
 0x187   : > { %v811_v1 = vpop.permute.xlu0 %810 }
 0x188   : > { %v816_v5 = vadd.f32 %v811_v1, %v788_v0  ;;  %v1274_v0 = vmul.f32 %v1273_v58, %v3118_v19  ;;  %v1134_v1 = vmul.f32 %v1132_v47, %v3061_v54  ;;  %v1147_v47 = vmul.f32 %v1145_v53, %v3074_v62 }
 0x189   : > { %1165 = vrot.lane.b32.xlu0 %v1161_v3, %s3978_s25  ;;  %1040 = vrot.lane.b32.xlu1 %v1035_v4, %s3979_s30  ;;  %v1288_v4 = vstv %s3160_s6  ;;  %v1162_v53 = vmul.f32 %v1160_v61, %v3061_v54  ;;  %s3390_s6 = sld [smem:[#allocation6 + $0x52]] }
 0x18a   : > { %v3097_v9 = vadd.f32 %v1014_v8, %v816_v5 }
 0x18b   : > { %v855_v10 = vpop.permute.xlu0 %854 }
 0x18c   : > { %v860_v30 = vadd.f32 %v855_v10, %v830_v27 }
 0x18d   : > { %1178 = vrot.lane.b32.xlu0 %v1174_v11, %s3978_s25  ;;  %1055 = vrot.lane.b32.xlu1 %v1050_v13, %s3981_s19  ;;  %v1289_v11 = vmul.f32 %v1288_v4, %v3105_v14 }
 0x18f   : > { %v883_v17 = vpop.permute.xlu0 %882 }
 0x190   : > { %v888_v35 = vadd.f32 %v883_v17, %v860_v30  ;;  %v1301_v17 = vstv %s3175_s27  ;;  %s3403_s27 = sld [smem:[#allocation6 + $0x22]] }
 0x191   : > { %1209 = vrot.lane.b32.xlu0 %v1205_v16, %s3979_s30  ;;  %1068 = vrot.lane.b32.xlu1 %v1063_v18, %s3981_s19  ;;  %v640_v16 = vstv %s3182_s10  ;;  %s3377_s10 = sld [smem:[#allocation6 + $0x21]] }
 0x192   : > { %v641_v27 = vmul.f32 %v640_v16, %v2825_v34 }
 0x193   : > { %v911_v23 = vpop.permute.xlu0 %910 }
 0x194   : > { %v916_v38 = vadd.f32 %v911_v23, %v888_v35 }
 0x195   : > { %1222 = vrot.lane.b32.xlu0 %v1218_v26, %s3979_s30  ;;  %1083 = vrot.lane.b32.xlu1 %v1078_v24, %s3980_s29  ;;  %v1302_v24 = vmul.f32 %v1301_v17, %v3118_v19 }
 0x197   : > { %v673_v32 = vpop.permute.xlu1 %672  ;;  %v939_v33 = vpop.permute.xlu0 %938 }
 0x198   : > { %v944_v45 = vadd.f32 %v939_v33, %v916_v38  ;;  %v677_v40 = vadd.f32 %v673_v32, %v647_v56  ;;  %v1316_v32 = vstv %s3193_s1  ;;  %v1015_v33 = vmul.f32 %v1013_v63, %v3074_v62  ;;  %s3423_s1 = sld [smem:[#allocation6 + $0x53]] }
 0x199   : > { %1237 = vrot.lane.b32.xlu0 %v1233_v28, %s3981_s19  ;;  %1096 = vrot.lane.b32.xlu1 %v1091_v7, %s3980_s29  ;;  %v1317_v35 = vmul.f32 %v1316_v32, %v3105_v14  ;;  %v1175_v63 = vmul.f32 %v1173_v6, %v3074_v62 }
 0x19b   : > { %v701_v39 = vpop.permute.xlu1 %700  ;;  %v967_v42 = vpop.permute.xlu0 %966 }
 0x19c   : > { %v972_v50 = vadd.f32 %v967_v42, %v944_v45  ;;  %v705_v3 = vadd.f32 %v701_v39, %v677_v40  ;;  %v1329_v39 = vstv %s3204_s4  ;;  %v3237_v42 = vld [vmem:[#allocation4 + $0xb] sm:$0xff]  ;;  %v831_v40 = vmul.f32 %v829_v21, %v2854_v44  ;;  %s3436_s4 = sld [smem:[#allocation6 + $0x24]] }
 0x19d   : > { %1250 = vrot.lane.b32.xlu0 %v1246_v43, %s3981_s19  ;;  %1111 = vrot.lane.b32.xlu1 %v1106_v31, %s3982_s22  ;;  %v1330_v62 = vmul.f32 %v1329_v39, %v3118_v19  ;;  %v1206_v6 = vmul.f32 %v1204_v15, %v3237_v42 }
 0x19f   : > { %v729_v51 = vpop.permute.xlu1 %728  ;;  %v995_v48 = vpop.permute.xlu0 %994 }
 0x1a0   : > { %v1000_v57 = vadd.f32 %v995_v48, %v972_v50  ;;  %v733_v5 = vadd.f32 %v729_v51, %v705_v3  ;;  %v1344_v51 = vstv %s3219_s17  ;;  %v3250_v48 = vld [vmem:[#allocation5 + $0xb] sm:$0xff]  ;;  %s3450_s17 = sld [smem:[#allocation6 + $0x55]] }
 0x1a1   : > { %1265 = vrot.lane.b32.xlu0 %v1261_v52, %s3980_s29  ;;  %1124 = vrot.lane.b32.xlu1 %v1119_v36, %s3982_s22  ;;  %v1008_v52 = vstv %s3226_s21  ;;  %v1345_v15 = vmul.f32 %v1344_v51, %v3105_v14  ;;  %s3463_s21 = sld [smem:[#allocation6 + $0x2b]] }
 0x1a2   : > { %v3184_v60 = vadd.f32 %v1198_v59, %v1000_v57  ;;  %v1219_v59 = vmul.f32 %v1217_v20, %v3250_v48 }
 0x1a3   : > { %v757_v22 = vpop.permute.xlu1 %756  ;;  %v658_v41 = vpop.permute.xlu0 %657 }
 0x1a4   : > { %v761_v13 = vadd.f32 %v757_v22, %v733_v5  ;;  %v663_v28 = vadd.f32 %v658_v41, %v641_v27  ;;  %v1357_v41 = vstv %s3239_s13  ;;  %s3476_s13 = sld [smem:[#allocation6 + $0x5c]] }
 0x1a5   : > { %1278 = vrot.lane.b32.xlu0 %v1274_v0, %s3980_s29  ;;  %1139 = vrot.lane.b32.xlu1 %v1134_v1, %s3977_s28  ;;  %v1009_v0 = vmul.f32 %v1008_v52, %v2949_v12  ;;  %v1358_v3 = vmul.f32 %v1357_v41, %v3118_v19  ;;  %v1234_v12 = vmul.f32 %v1232_v29, %v3237_v42 }
 0x1a6   : > { %v1247_v29 = vmul.f32 %v1245_v37, %v3250_v48 }
 0x1a7   : > { %v785_v8 = vpop.permute.xlu1 %784  ;;  %v686_v10 = vpop.permute.xlu0 %685 }
 0x1a8   : > { %v789_v18 = vadd.f32 %v785_v8, %v761_v13  ;;  %v691_v38 = vadd.f32 %v686_v10, %v663_v28  ;;  %v3284_v8 = vld [vmem:[#allocation4 + $0x4] sm:$0xff]  ;;  %v1388_v10 = vstv %s3252_s3  ;;  %s3480_s3 = sld [smem:[#allocation6 + $0x1c]] }
 0x1a9   : > { %1293 = vrot.lane.b32.xlu0 %v1289_v11, %s3982_s22  ;;  %1152 = vrot.lane.b32.xlu1 %v1147_v47, %s3977_s28  ;;  %v1389_v13 = vmul.f32 %v1388_v10, %v3284_v8 }
 0x1ab   : > { %v813_v23 = vpop.permute.xlu1 %812  ;;  %v714_v26 = vpop.permute.xlu0 %713 }
 0x1ac   : > { %v817_v30 = vadd.f32 %v813_v23, %v789_v18  ;;  %v719_v43 = vadd.f32 %v714_v26, %v691_v38  ;;  %v3297_v23 = vld [vmem:[#allocation5 + $0x4] sm:$0xff]  ;;  %v1401_v26 = vstv %s3267_s7  ;;  %s3494_s7 = sld [smem:[#allocation6 + $0x25]] }
 0x1ad   : > { %1306 = vrot.lane.b32.xlu0 %v1302_v24, %s3982_s22  ;;  %1167 = vrot.lane.b32.xlu1 %v1162_v53, %s3978_s25  ;;  %v824_v24 = vstv %s3274_s16  ;;  %s3501_s16 = sld [smem:[#allocation6 + $0x4d]] }
 0x1ae   : > { %v3228_v61 = vadd.f32 %v1015_v33, %v817_v30  ;;  %v1262_v30 = vmul.f32 %v1260_v46, %v3237_v42  ;;  %v1402_v33 = vmul.f32 %v1401_v26, %v3297_v23  ;;  %v825_v28 = vmul.f32 %v824_v24, %v2887_v55 }
 0x1af   : > { %v857_v7 = vpop.permute.xlu1 %856  ;;  %v742_v34 = vpop.permute.xlu0 %741 }
 0x1b0   : > { %v747_v50 = vadd.f32 %v742_v34, %v719_v43  ;;  %v861_v1 = vadd.f32 %v857_v7, %v831_v40  ;;  %v1416_v34 = vstv %s3287_s26  ;;  %v1275_v43 = vmul.f32 %v1273_v58, %v3250_v48  ;;  %s3519_s26 = sld [smem:[#allocation6 + $0x56]] }
 0x1b1   : > { %1321 = vrot.lane.b32.xlu0 %v1317_v35, %s3977_s28  ;;  %1180 = vrot.lane.b32.xlu1 %v1175_v63, %s3978_s25  ;;  %v1199_v35 = vmul.f32 %v1197_v49, %v3250_v48  ;;  %v1417_v49 = vmul.f32 %v1416_v34, %v3284_v8  ;;  %v1290_v58 = vmul.f32 %v1288_v4, %v3237_v42 }
 0x1b2   : > { %v1303_v4 = vmul.f32 %v1301_v17, %v3250_v48 }
 0x1b3   : > { %v885_v31 = vpop.permute.xlu1 %884  ;;  %v770_v45 = vpop.permute.xlu0 %769 }
 0x1b4   : > { %v775_v36 = vadd.f32 %v770_v45, %v747_v50  ;;  %v889_v5 = vadd.f32 %v885_v31, %v861_v1  ;;  %v1429_v45 = vstv %s3300_s8  ;;  %v642_v1 = vmul.f32 %v640_v16, %v2921_v2  ;;  %s3533_s8 = sld [smem:[#allocation6 + $0x2c]] }
 0x1b5   : > { %1334 = vrot.lane.b32.xlu0 %v1330_v62, %s3977_s28  ;;  %1211 = vrot.lane.b32.xlu1 %v1206_v6, %s3979_s30  ;;  %v1318_v2 = vmul.f32 %v1316_v32, %v3237_v42  ;;  %v1331_v32 = vmul.f32 %v1329_v39, %v3250_v48  ;;  %v1346_v39 = vmul.f32 %v1344_v51, %v3237_v42 }
 0x1b7   : > { %v913_v56 = vpop.permute.xlu1 %912  ;;  %v798_v57 = vpop.permute.xlu0 %797 }
 0x1b8   : > { %v803_v22 = vadd.f32 %v798_v57, %v775_v36  ;;  %v917_v11 = vadd.f32 %v913_v56, %v889_v5  ;;  %v1430_v36 = vmul.f32 %v1429_v45, %v3297_v23  ;;  %v1444_v57 = vstv %s3315_s24  ;;  %s3552_s24 = sld [smem:[#allocation6 + $0x5d]] }
 0x1b9   : > { %1349 = vrot.lane.b32.xlu0 %v1345_v15, %s3978_s25  ;;  %1224 = vrot.lane.b32.xlu1 %v1219_v59, %s3979_s30  ;;  %v1192_v15 = vstv %s3322_s23  ;;  %s3571_s23 = sld [smem:[#allocation6 + $0x26]] }
 0x1ba   : > { %v3276_v20 = vadd.f32 %v1009_v0, %v803_v22  ;;  %v1445_v0 = vmul.f32 %v1444_v57, %v3284_v8 }
 0x1bb   : > { %v941_v44 = vpop.permute.xlu1 %940  ;;  %v842_v21 = vpop.permute.xlu0 %841 }
 0x1bc   : > { %v945_v18 = vadd.f32 %v941_v44, %v917_v11  ;;  %v847_v46 = vadd.f32 %v842_v21, %v825_v28  ;;  %v1457_v21 = vstv %s3333_s11  ;;  %s3583_s11 = sld [smem:[#allocation6 + $0x57]] }
 0x1bd   : > { %1362 = vrot.lane.b32.xlu0 %v1358_v3, %s3978_s25  ;;  %1239 = vrot.lane.b32.xlu1 %v1234_v12, %s3981_s19  ;;  %v1193_v3 = vmul.f32 %v1192_v15, %v3105_v14  ;;  %v1458_v16 = vmul.f32 %v1457_v21, %v3297_v23 }
 0x1bf   : > { %v969_v47 = vpop.permute.xlu1 %968  ;;  %v870_v19 = vpop.permute.xlu0 %869 }
 0x1c0   : > { %v973_v53 = vadd.f32 %v969_v47, %v945_v18  ;;  %v875_v31 = vadd.f32 %v870_v19, %v847_v46  ;;  %v1472_v47 = vstv %s3344_s5  ;;  %v1010_v46 = vmul.f32 %v1008_v52, %v3061_v54  ;;  %s3594_s5 = sld [smem:[#allocation6 + $0x2d]] }
 0x1c1   : > { %1252 = vrot.lane.b32.xlu1 %v1247_v29, %s3981_s19  ;;  %1393 = vrot.lane.b32.xlu0 %v1389_v13, %s3979_s30  ;;  %v1473_v18 = vmul.f32 %v1472_v47, %v3284_v8  ;;  %v1513_v54 = vstv %s3390_s6  ;;  %s3632_s6 = sld [smem:[#allocation6 + $0x58]] }
 0x1c3   : > { %v997_v27 = vpop.permute.xlu1 %996  ;;  %v898_v37 = vpop.permute.xlu0 %897 }
 0x1c4   : > { %v1001_v7 = vadd.f32 %v997_v27, %v973_v53  ;;  %v903_v62 = vadd.f32 %v898_v37, %v875_v31  ;;  %v1485_v27 = vstv %s3359_s0  ;;  %v3420_v31 = vld [vmem:[#allocation4 + $0xc] sm:$0xff]  ;;  %s3607_s0 = sld [smem:[#allocation6 + $0x5e]] }
 0x1c5   : > { %1267 = vrot.lane.b32.xlu1 %v1262_v30, %s3980_s29  ;;  %1406 = vrot.lane.b32.xlu0 %v1402_v33, %s3979_s30  ;;  %v1486_v28 = vmul.f32 %v1485_v27, %v3297_v23 }
 0x1c6   : > { %v3324_v63 = vadd.f32 %v1199_v35, %v1001_v7  ;;  %v1500_v35 = vstv %s3377_s10  ;;  %s3620_s10 = sld [smem:[#allocation6 + $0x27]] }
 0x1c7   : > { %v660_v55 = vpop.permute.xlu1 %659  ;;  %v926_v38 = vpop.permute.xlu0 %925 }
 0x1c8   : > { %v931_v56 = vadd.f32 %v926_v38, %v903_v62  ;;  %v664_v17 = vadd.f32 %v660_v55, %v642_v1 }
 0x1c9   : > { %1280 = vrot.lane.b32.xlu1 %v1275_v43, %s3980_s29  ;;  %1421 = vrot.lane.b32.xlu0 %v1417_v49, %s3981_s19  ;;  %v1359_v43 = vmul.f32 %v1357_v41, %v3250_v48  ;;  %v1501_v49 = vmul.f32 %v1500_v35, %v3284_v8  ;;  %v1390_v48 = vmul.f32 %v1388_v10, %v3420_v31 }
 0x1ca   : > { %v1514_v41 = vmul.f32 %v1513_v54, %v3297_v23 }
 0x1cb   : > { %v688_v6 = vpop.permute.xlu1 %687  ;;  %v954_v50 = vpop.permute.xlu0 %953 }
 0x1cc   : > { %v959_v59 = vadd.f32 %v954_v50, %v931_v56  ;;  %v692_v14 = vadd.f32 %v688_v6, %v664_v17  ;;  %v3433_v6 = vld [vmem:[#allocation5 + $0xc] sm:$0xff]  ;;  %v1528_v50 = vstv %s3403_s27  ;;  %s3652_s27 = sld [smem:[#allocation6 + $0x2e]] }
 0x1cd   : > { %1295 = vrot.lane.b32.xlu1 %v1290_v58, %s3982_s22  ;;  %1434 = vrot.lane.b32.xlu0 %v1430_v36, %s3981_s19  ;;  %v1403_v10 = vmul.f32 %v1401_v26, %v3433_v6  ;;  %v1529_v56 = vmul.f32 %v1528_v50, %v3284_v8  ;;  %v1418_v26 = vmul.f32 %v1416_v34, %v3420_v31 }
 0x1ce   : > { %v1431_v34 = vmul.f32 %v1429_v45, %v3433_v6 }
 0x1cf   : > { %v716_v40 = vpop.permute.xlu1 %715  ;;  %v982_v22 = vpop.permute.xlu0 %981 }
 0x1d0   : > { %v987_v44 = vadd.f32 %v982_v22, %v959_v59  ;;  %v720_v19 = vadd.f32 %v716_v40, %v692_v14  ;;  %v826_v59 = vmul.f32 %v824_v24, %v2985_v25  ;;  %v1541_v40 = vstv %s3423_s1  ;;  %v3460_v24 = vld [vmem:[#allocation4 + $0x5] sm:$0xff]  ;;  %v3473_v14 = vld [vmem:[#allocation5 + $0x5] sm:$0xff]  ;;  %s3663_s1 = sld [smem:[#allocation6 + $0x5f]] }
 0x1d1   : > { %1308 = vrot.lane.b32.xlu1 %v1303_v4, %s3982_s22  ;;  %1449 = vrot.lane.b32.xlu0 %v1445_v0, %s3980_s29  ;;  %v1542_v1 = vmul.f32 %v1541_v40, %v3297_v23 }
 0x1d2   : > { %v3366_v12 = vadd.f32 %v1193_v3, %v987_v44  ;;  %v1572_v44 = vstv %s3436_s4  ;;  %s3670_s4 = sld [smem:[#allocation6 + $0x23]] }
 0x1d3   : > { %v744_v5 = vpop.permute.xlu1 %743  ;;  %v3368_v11 = vpop.permute.xlu0 %1025 }
 0x1d4   : > { %v748_v53 = vadd.f32 %v744_v5, %v720_v19  ;;  %v1585_v19 = vstv %s3450_s17  ;;  %v1031_v45 = vadd.f32 %v3368_v11, %v3276_v20  ;;  %v1194_v20 = vmul.f32 %v1192_v15, %v3237_v42  ;;  %s3688_s17 = sld [smem:[#allocation6 + $0x54]] }
 0x1d5   : > { %1323 = vrot.lane.b32.xlu1 %v1318_v2, %s3977_s28  ;;  %1462 = vrot.lane.b32.xlu0 %v1458_v16, %s3980_s29  ;;  %v1573_v2 = vmul.f32 %v1572_v44, %v3460_v24  ;;  %v1459_v42 = vmul.f32 %v1457_v21, %v3433_v6 }
 0x1d7   : > { %v772_v29 = vpop.permute.xlu1 %771  ;;  %v3381_v13 = vpop.permute.xlu0 %1038 }
 0x1d8   : > { %v776_v37 = vadd.f32 %v772_v29, %v748_v53  ;;  %v1446_v53 = vmul.f32 %v1444_v57, %v3420_v31  ;;  %v1044_v57 = vadd.f32 %v3381_v13, %v3097_v9  ;;  %v1769_v9 = vstv %s3476_s13  ;;  %s3713_s13 = sld [smem:[#allocation6 + $0x2f]] }
 0x1d9   : > { %1336 = vrot.lane.b32.xlu1 %v1331_v32, %s3977_s28  ;;  %1477 = vrot.lane.b32.xlu0 %v1473_v18, %s3982_s22  ;;  %v1376_v13 = vstv %s3480_s3  ;;  %s3730_s3 = sld [smem:[#allocation6 + $0x60]] }
 0x1db   : > { %v800_v30 = vpop.permute.xlu1 %799  ;;  %v3394_v33 = vpop.permute.xlu0 %1053 }
 0x1dc   : > { %v804_v7 = vadd.f32 %v800_v30, %v776_v37  ;;  %v1586_v37 = vmul.f32 %v1585_v19, %v3473_v14  ;;  %v1059_v30 = vadd.f32 %v3394_v33, %v1031_v45 }
 0x1dd   : > { %1351 = vrot.lane.b32.xlu1 %v1346_v39, %s3978_s25  ;;  %1490 = vrot.lane.b32.xlu0 %v1486_v28, %s3982_s22  ;;  %v3491_v28 = vld [vmem:[#allocation4 + $0x6] sm:$0xff] }
 0x1de   : > { %v3410_v55 = vadd.f32 %v1010_v46, %v804_v7  ;;  %v1756_v7 = vstv %s3463_s21  ;;  %s3700_s21 = sld [smem:[#allocation6 + $0x59]] }
 0x1df   : > { %v844_v51 = vpop.permute.xlu1 %843  ;;  %v3412_v38 = vpop.permute.xlu0 %1066  ;;  %v1757_v15 = vmul.f32 %v1756_v7, %v3491_v28 }
 0x1e0   : > { %v848_v22 = vadd.f32 %v844_v51, %v826_v59  ;;  %v1600_v59 = vstv %s3494_s7  ;;  %s3759_s7 = sld [smem:[#allocation6 + $0x5a]] }
 0x1e1   : > { %1364 = vrot.lane.b32.xlu1 %v1359_v43, %s3978_s25  ;;  %1505 = vrot.lane.b32.xlu0 %v1501_v49, %s3977_s28  ;;  %v1072_v43 = vadd.f32 %v3412_v38, %v1044_v57 }
 0x1e3   : > { %v872_v52 = vpop.permute.xlu1 %871  ;;  %v1082_v62 = vpop.permute.xlu0 %1081 }
 0x1e4   : > { %v876_v25 = vadd.f32 %v872_v52, %v848_v22  ;;  %v1087_v11 = vadd.f32 %v1082_v62, %v1059_v30  ;;  %v3516_v52 = vld [vmem:[#allocation5 + $0x6] sm:$0xff]  ;;  %v1381_v22 = vstv %s3501_s16  ;;  %s3770_s16 = sld [smem:[#allocation6 + $0x30]] }
 0x1e5   : > { %1395 = vrot.lane.b32.xlu1 %v1390_v48, %s3979_s30  ;;  %1518 = vrot.lane.b32.xlu0 %v1514_v41, %s3977_s28  ;;  %v1474_v41 = vmul.f32 %v1472_v47, %v3420_v31 }
 0x1e7   : > { %v900_v58 = vpop.permute.xlu1 %899  ;;  %v1095_v36 = vpop.permute.xlu0 %1094 }
 0x1e8   : > { %v904_v3 = vadd.f32 %v900_v58, %v876_v25  ;;  %v1100_v21 = vadd.f32 %v1095_v36, %v1072_v43  ;;  %v1770_v58 = vmul.f32 %v1769_v9, %v3516_v52  ;;  %v1377_v36 = vmul.f32 %v1376_v13, %v3284_v8 }
 0x1e9   : > { %1408 = vrot.lane.b32.xlu1 %v1403_v10, %s3979_s30  ;;  %1533 = vrot.lane.b32.xlu0 %v1529_v56, %s3978_s25  ;;  %v1601_v8 = vmul.f32 %v1600_v59, %v3460_v24  ;;  %v1641_v43 = vstv %s3583_s11 }
 0x1eb   : > { %v928_v4 = vpop.permute.xlu1 %927  ;;  %v1110_v0 = vpop.permute.xlu0 %1109 }
 0x1ec   : > { %v932_v16 = vadd.f32 %v928_v4, %v904_v3  ;;  %v1115_v49 = vadd.f32 %v1110_v0, %v1087_v11  ;;  %v1613_v3 = vstv %s3519_s26  ;;  %s3781_s26 = sld [smem:[#allocation6 + $0x61]] }
 0x1ed   : > { %1423 = vrot.lane.b32.xlu1 %v1418_v26, %s3981_s19  ;;  %1546 = vrot.lane.b32.xlu0 %v1542_v1, %s3978_s25  ;;  %v1487_v1 = vmul.f32 %v1485_v27, %v3433_v6 }
 0x1ef   : > { %v956_v17 = vpop.permute.xlu1 %955  ;;  %v1123_v5 = vpop.permute.xlu0 %1122 }
 0x1f0   : > { %v960_v29 = vadd.f32 %v956_v17, %v932_v16  ;;  %v1128_v10 = vadd.f32 %v1123_v5, %v1100_v21  ;;  %v1382_v17 = vmul.f32 %v1381_v22, %v3297_v23  ;;  %v1614_v16 = vmul.f32 %v1613_v3, %v3473_v14 }
 0x1f1   : > { %1436 = vrot.lane.b32.xlu1 %v1431_v34, %s3981_s19  ;;  %1577 = vrot.lane.b32.xlu0 %v1573_v2, %s3979_s30  ;;  %v1502_v2 = vmul.f32 %v1500_v35, %v3420_v31  ;;  %v1784_v23 = vstv %s3533_s8  ;;  %v1515_v35 = vmul.f32 %v1513_v54, %v3433_v6  ;;  %v1530_v54 = vmul.f32 %v1528_v50, %v3420_v31  ;;  %s3829_s8 = sld [smem:[#allocation6 + $0x5b]] }
 0x1f3   : > { %v984_v32 = vpop.permute.xlu1 %983  ;;  %v1138_v18 = vpop.permute.xlu0 %1137 }
 0x1f4   : > { %v988_v39 = vadd.f32 %v984_v32, %v960_v29  ;;  %v1143_v62 = vadd.f32 %v1138_v18, %v1115_v49  ;;  %v1785_v18 = vmul.f32 %v1784_v23, %v3491_v28 }
 0x1f5   : > { %1451 = vrot.lane.b32.xlu1 %v1446_v53, %s3980_s29  ;;  %1590 = vrot.lane.b32.xlu0 %v1586_v37, %s3979_s30  ;;  %v1797_v53 = vstv %s3552_s24 }
 0x1f6   : > { %v3505_v33 = vadd.f32 %v1194_v20, %v988_v39  ;;  %v1798_v39 = vmul.f32 %v1797_v53, %v3516_v52 }
 0x1f7   : > { %v3507_v46 = vpop.permute.xlu1 %1027  ;;  %v1151_v51 = vpop.permute.xlu0 %1150 }
 0x1f8   : > { %v1156_v47 = vadd.f32 %v1151_v51, %v1128_v10  ;;  %v1543_v51 = vmul.f32 %v1541_v40, %v3433_v6  ;;  %v1032_v10 = vadd.f32 %v3507_v46, %v3410_v55 }
 0x1f9   : > { %1464 = vrot.lane.b32.xlu1 %v1459_v42, %s3980_s29  ;;  %1761 = vrot.lane.b32.xlu0 %v1757_v15, %s3979_s30  ;;  %v3604_v15 = vld [vmem:[#allocation4 + $0xd] sm:$0xff] }
 0x1fa   : > { %v1574_v40 = vmul.f32 %v1572_v44, %v3604_v15 }
 0x1fb   : > { %v3524_v48 = vpop.permute.xlu1 %1040  ;;  %v1166_v38 = vpop.permute.xlu0 %1165 }
 0x1fc   : > { %v1171_v56 = vadd.f32 %v1166_v38, %v1143_v62  ;;  %v1642_v62 = vmul.f32 %v1641_v43, %v3473_v14  ;;  %v1045_v55 = vadd.f32 %v3524_v48, %v3228_v61  ;;  %v1656_v61 = vstv %s3620_s10 }
 0x1fd   : > { %1479 = vrot.lane.b32.xlu1 %v1474_v41, %s3982_s22  ;;  %1774 = vrot.lane.b32.xlu0 %v1770_v58, %s3979_s30  ;;  %v3617_v41 = vld [vmem:[#allocation5 + $0xd] sm:$0xff]  ;;  %v1812_v58 = vstv %s3594_s5 }
 0x1fe   : > { %v3541_v4 = vadd.f32 %v1377_v36, %v1171_v56  ;;  %v1587_v36 = vmul.f32 %v1585_v19, %v3617_v41 }
 0x1ff   : > { %v3543_v0 = vpop.permute.xlu1 %1055  ;;  %v1179_v26 = vpop.permute.xlu0 %1178 }
 0x200   : > { %v1184_v25 = vadd.f32 %v1179_v26, %v1156_v47  ;;  %v1813_v47 = vmul.f32 %v1812_v58, %v3491_v28  ;;  %v1060_v26 = vadd.f32 %v3543_v0, %v1032_v10  ;;  %v1853_v10 = vstv %s3663_s1 }
 0x201   : > { %1492 = vrot.lane.b32.xlu1 %v1487_v1, %s3982_s22  ;;  %1605 = vrot.lane.b32.xlu0 %v1601_v8, %s3981_s19  ;;  %v3635_v8 = vld [vmem:[#allocation4 + $0xe] sm:$0xff] }
 0x202   : > { %v3559_v5 = vadd.f32 %v1382_v17, %v1184_v25  ;;  %v1825_v25 = vstv %s3607_s0  ;;  %v1758_v0 = vmul.f32 %v1756_v7, %v3635_v8  ;;  %s1944_s0 = scalar_lea.sflag [#allocation8], %s2621_s18 }
 0x203   : > { %v3561_v27 = vpop.permute.xlu1 %1068  ;;  %v1210_v34 = vpop.permute.xlu0 %1209 }
 0x204   : > { %v1215_v45 = vadd.f32 %v1210_v34, %v3366_v12  ;;  %v1826_v34 = vmul.f32 %v1825_v25, %v3516_v52 }
 0x205   : > { %1507 = vrot.lane.b32.xlu1 %v1502_v2, %s3977_s28  ;;  %1618 = vrot.lane.b32.xlu0 %v1614_v16, %s3981_s19  ;;  %v1073_v2 = vadd.f32 %v3561_v27, %v1045_v55 }
 0x207   : > { %v1084_v29 = vpop.permute.xlu1 %1083  ;;  %v1223_v32 = vpop.permute.xlu0 %1222 }
 0x208   : > { %v1228_v12 = vadd.f32 %v1223_v32, %v3184_v60  ;;  %v1628_v60 = vstv %s3571_s23  ;;  %v1088_v19 = vadd.f32 %v1084_v29, %v1060_v26  ;;  %v3649_v32 = vld [vmem:[#allocation5 + $0xe] sm:$0xff] }
 0x209   : > { %1520 = vrot.lane.b32.xlu1 %v1515_v35, %s3977_s28  ;;  %1789 = vrot.lane.b32.xlu0 %v1785_v18, %s3981_s19  ;;  %v1629_v50 = vmul.f32 %v1628_v60, %v3460_v24  ;;  %v1771_v27 = vmul.f32 %v1769_v9, %v3649_v32  ;;  %v1657_v18 = vmul.f32 %v1656_v61, %v3460_v24 }
 0x20b   : > { %v1097_v37 = vpop.permute.xlu1 %1096  ;;  %v1238_v30 = vpop.permute.xlu0 %1237 }
 0x20c   : > { %v1243_v20 = vadd.f32 %v1238_v30, %v1215_v45  ;;  %v1101_v48 = vadd.f32 %v1097_v37, %v1073_v2  ;;  %v1378_v37 = vmul.f32 %v1376_v13, %v3420_v31 }
 0x20d   : > { %1535 = vrot.lane.b32.xlu1 %v1530_v54, %s3978_s25  ;;  %1802 = vrot.lane.b32.xlu0 %v1798_v39, %s3981_s19 }
 0x20f   : > { %v1112_v57 = vpop.permute.xlu1 %1111  ;;  %v1251_v11 = vpop.permute.xlu0 %1250 }
 0x210   : > { %v1256_v42 = vadd.f32 %v1251_v11, %v1228_v12  ;;  %v1116_v16 = vadd.f32 %v1112_v57, %v1088_v19  ;;  %v1669_v12 = vstv %s3632_s6  ;;  %v1565_v19 = vstv %s3688_s17 }
 0x211   : > { %1548 = vrot.lane.b32.xlu1 %v1543_v51, %s3978_s25  ;;  %1633 = vrot.lane.b32.xlu0 %v1629_v50, %s3980_s29  ;;  %v1602_v51 = vmul.f32 %v1600_v59, %v3604_v15  ;;  %v1670_v50 = vmul.f32 %v1669_v12, %v3473_v14 }
 0x213   : > { %v1125_v49 = vpop.permute.xlu1 %1124  ;;  %v1266_v21 = vpop.permute.xlu0 %1265 }
 0x214   : > { %v1271_v38 = vadd.f32 %v1266_v21, %v1243_v20  ;;  %v1129_v30 = vadd.f32 %v1125_v49, %v1101_v48  ;;  %v1383_v49 = vmul.f32 %v1381_v22, %v3433_v6 }
 0x215   : > { %1579 = vrot.lane.b32.xlu1 %v1574_v40, %s3979_s30  ;;  %1646 = vrot.lane.b32.xlu0 %v1642_v62, %s3980_s29  ;;  %v1615_v62 = vmul.f32 %v1613_v3, %v3617_v41 }
 0x217   : > { %v1140_v56 = vpop.permute.xlu1 %1139  ;;  %v1279_v44 = vpop.permute.xlu0 %1278 }
 0x218   : > { %v1284_v1 = vadd.f32 %v1279_v44, %v1256_v42  ;;  %v1144_v7 = vadd.f32 %v1140_v56, %v1116_v16  ;;  %v1840_v42 = vstv %s3652_s27  ;;  %v1560_v56 = vstv %s3670_s4 }
 0x219   : > { %1592 = vrot.lane.b32.xlu1 %v1587_v36, %s3979_s30  ;;  %1817 = vrot.lane.b32.xlu0 %v1813_v47, %s3980_s29  ;;  %v1786_v36 = vmul.f32 %v1784_v23, %v3635_v8  ;;  %v1561_v55 = vmul.f32 %v1560_v56, %v3460_v24  ;;  %v1697_v16 = vstv %s3700_s21 }
 0x21b   : > { %v1153_v46 = vpop.permute.xlu1 %1152  ;;  %v1294_v17 = vpop.permute.xlu0 %1293 }
 0x21c   : > { %v1299_v45 = vadd.f32 %v1294_v17, %v1271_v38  ;;  %v1157_v9 = vadd.f32 %v1153_v46, %v1129_v30  ;;  %v1841_v38 = vmul.f32 %v1840_v42, %v3491_v28  ;;  %v1868_v30 = vstv %s3713_s13 }
 0x21d   : > { %1763 = vrot.lane.b32.xlu1 %v1758_v0, %s3979_s30  ;;  %1830 = vrot.lane.b32.xlu0 %v1826_v34, %s3980_s29 }
 0x21f   : > { %v1168_v29 = vpop.permute.xlu1 %1167  ;;  %v1307_v35 = vpop.permute.xlu0 %1306 }
 0x220   : > { %v1172_v54 = vadd.f32 %v1168_v29, %v1144_v7  ;;  %v1312_v39 = vadd.f32 %v1307_v35, %v1284_v1  ;;  %v1630_v29 = vmul.f32 %v1628_v60, %v3604_v15  ;;  %v1698_v35 = vmul.f32 %v1697_v16, %v3473_v14 }
 0x221   : > { %1776 = vrot.lane.b32.xlu1 %v1771_v27, %s3979_s30  ;;  %1661 = vrot.lane.b32.xlu0 %v1657_v18, %s3982_s22  ;;  %s3681_s30 = sld [smem:[#allocation6 + $0x28]]  ;;  %v1643_v60 = vmul.f32 %v1641_v43, %v3617_v41  ;;  %v1814_v43 = vmul.f32 %v1812_v58, %v3635_v8  ;;  %v1827_v58 = vmul.f32 %v1825_v25, %v3649_v32 }
 0x222   : > { %v3672_v20 = vadd.f32 %v1378_v37, %v1172_v54  ;;  %v1869_v37 = vmul.f32 %v1868_v30, %v3491_v28  ;;  %v1658_v25 = vmul.f32 %v1656_v61, %v3604_v15 }
 0x223   : > { %v1181_v57 = vpop.permute.xlu1 %1180  ;;  %v1322_v11 = vpop.permute.xlu0 %1321 }
 0x224   : > { %v1185_v31 = vadd.f32 %v1181_v57, %v1157_v9  ;;  %v1327_v13 = vadd.f32 %v1322_v11, %v1299_v45  ;;  %v1566_v45 = vmul.f32 %v1565_v19, %v3473_v14  ;;  %v1881_v57 = vstv %s3730_s3 }
 0x225   : > { %1607 = vrot.lane.b32.xlu1 %v1602_v51, %s3981_s19  ;;  %1674 = vrot.lane.b32.xlu0 %v1670_v50, %s3982_s22  ;;  %v1882_v50 = vmul.f32 %v1881_v57, %v3516_v52 }
 0x226   : > { %v3690_v59 = vadd.f32 %v1383_v49, %v1185_v31 }
 0x227   : > { %v1212_v21 = vpop.permute.xlu1 %1211  ;;  %v1335_v40 = vpop.permute.xlu0 %1334  ;;  %v1684_v1 = vstv %s3681_s30 }
 0x228   : > { %v1216_v6 = vadd.f32 %v1212_v21, %v3505_v33  ;;  %v1340_v22 = vadd.f32 %v1335_v40, %v1312_v39  ;;  %v1854_v33 = vmul.f32 %v1853_v10, %v3516_v52  ;;  %v1685_v0 = vmul.f32 %v1684_v1, %v3460_v24 }
 0x229   : > { %1620 = vrot.lane.b32.xlu1 %v1615_v62, %s3981_s19  ;;  %1845 = vrot.lane.b32.xlu0 %v1841_v38, %s3982_s22 }
 0x22b   : > { %v1225_v44 = vpop.permute.xlu1 %1224  ;;  %v1350_v3 = vpop.permute.xlu0 %1349 }
 0x22c   : > { %v1229_v47 = vadd.f32 %v1225_v44, %v3324_v63  ;;  %v1355_v26 = vadd.f32 %v1350_v3, %v1327_v13  ;;  %v1799_v63 = vmul.f32 %v1797_v53, %v3649_v32 }
 0x22d   : > { %1791 = vrot.lane.b32.xlu1 %v1786_v36, %s3981_s19  ;;  %1858 = vrot.lane.b32.xlu0 %v1854_v33, %s3982_s22  ;;  %v1896_v33 = vstv %s3770_s16 }
 0x22e   : > { %v3721_v23 = vadd.f32 %v1561_v55, %v1355_v26  ;;  %v1671_v55 = vmul.f32 %v1669_v12, %v3617_v41  ;;  %v1897_v61 = vmul.f32 %v1896_v33, %v3491_v28 }
 0x22f   : > { %v1240_v46 = vpop.permute.xlu1 %1239  ;;  %v1363_v17 = vpop.permute.xlu0 %1362 }
 0x230   : > { %v1244_v34 = vadd.f32 %v1240_v46, %v1216_v6  ;;  %v1368_v2 = vadd.f32 %v1363_v17, %v1340_v22  ;;  %v1725_v6 = vstv %s3759_s7  ;;  %v1909_v17 = vstv %s3781_s26 }
 0x231   : > { %1804 = vrot.lane.b32.xlu1 %v1799_v63, %s3981_s19  ;;  %1689 = vrot.lane.b32.xlu0 %v1685_v0, %s3977_s28  ;;  %s3747_s19 = sld [smem:[#allocation6 + $0x29]]  ;;  %v1910_v12 = vmul.f32 %v1909_v17, %v3516_v52 }
 0x232   : > { %v3737_v48 = vadd.f32 %v1566_v45, %v1368_v2 }
 0x233   : > { %v1253_v53 = vpop.permute.xlu1 %1252  ;;  %v1394_v7 = vpop.permute.xlu0 %1393 }
 0x234   : > { %v1257_v27 = vadd.f32 %v1253_v53, %v1229_v47  ;;  %v1399_v18 = vadd.f32 %v1394_v7, %v3541_v4 }
 0x235   : > { %1635 = vrot.lane.b32.xlu1 %v1630_v29, %s3980_s29  ;;  %1702 = vrot.lane.b32.xlu0 %v1698_v35, %s3977_s28  ;;  %v1855_v29 = vmul.f32 %v1853_v10, %v3649_v32 }
 0x237   : > { %v1268_v54 = vpop.permute.xlu1 %1267  ;;  %v1407_v39 = vpop.permute.xlu0 %1406  ;;  %v1712_v13 = vstv %s3747_s19 }
 0x238   : > { %v1272_v9 = vadd.f32 %v1268_v54, %v1244_v34  ;;  %v1412_v4 = vadd.f32 %v1407_v39, %v3559_v5  ;;  %v1713_v40 = vmul.f32 %v1712_v13, %v3460_v24  ;;  %v1726_v24 = vmul.f32 %v1725_v6, %v3473_v14 }
 0x239   : > { %1648 = vrot.lane.b32.xlu1 %v1643_v60, %s3980_s29  ;;  %1873 = vrot.lane.b32.xlu0 %v1869_v37, %s3977_s28  ;;  %v1842_v34 = vmul.f32 %v1840_v42, %v3635_v8  ;;  %v1562_v42 = vmul.f32 %v1560_v56, %v3604_v15  ;;  %v1686_v60 = vmul.f32 %v1684_v1, %v3604_v15 }
 0x23b   : > { %v1281_v11 = vpop.permute.xlu1 %1280  ;;  %v1422_v51 = vpop.permute.xlu0 %1421 }
 0x23c   : > { %v1285_v31 = vadd.f32 %v1281_v11, %v1257_v27  ;;  %v1427_v5 = vadd.f32 %v1422_v51, %v1399_v18  ;;  %v1699_v51 = vmul.f32 %v1697_v16, %v3617_v41  ;;  %v1749_v16 = vstv %s3829_s8 }
 0x23d   : > { %1819 = vrot.lane.b32.xlu1 %v1814_v43, %s3980_s29  ;;  %1886 = vrot.lane.b32.xlu0 %v1882_v50, %s3977_s28 }
 0x23f   : > { %v1296_v49 = vpop.permute.xlu1 %1295  ;;  %v1435_v21 = vpop.permute.xlu0 %1434 }
 0x240   : > { %v1300_v62 = vadd.f32 %v1296_v49, %v1272_v9  ;;  %v1440_v38 = vadd.f32 %v1435_v21, %v1412_v4  ;;  %v1567_v9 = vmul.f32 %v1565_v19, %v3617_v41 }
 0x241   : > { %1832 = vrot.lane.b32.xlu1 %v1827_v58, %s3980_s29  ;;  %1717 = vrot.lane.b32.xlu0 %v1713_v40, %s3978_s25  ;;  %s3818_s29 = sld [smem:[#allocation6 + $0x2a]] }
 0x243   : > { %v1309_v22 = vpop.permute.xlu1 %1308  ;;  %v1450_v44 = vpop.permute.xlu0 %1449 }
 0x244   : > { %v1313_v3 = vadd.f32 %v1309_v22, %v1285_v31  ;;  %v1455_v36 = vadd.f32 %v1450_v44, %v1427_v5  ;;  %v1870_v5 = vmul.f32 %v1868_v30, %v3635_v8  ;;  %v1750_v30 = vmul.f32 %v1749_v16, %v3516_v52 }
 0x245   : > { %1663 = vrot.lane.b32.xlu1 %v1658_v25, %s3982_s22  ;;  %1730 = vrot.lane.b32.xlu0 %v1726_v24, %s3978_s25  ;;  %v1714_v24 = vmul.f32 %v1712_v13, %v3604_v15  ;;  %v1727_v52 = vmul.f32 %v1725_v6, %v3617_v41  ;;  %v1898_v15 = vmul.f32 %v1896_v33, %v3635_v8 }
 0x247   : > { %v1324_v47 = vpop.permute.xlu1 %1323  ;;  %v1463_v26 = vpop.permute.xlu0 %1462  ;;  %v1744_v50 = vstv %s3818_s29 }
 0x248   : > { %v1328_v46 = vadd.f32 %v1324_v47, %v1300_v62  ;;  %v1468_v14 = vadd.f32 %v1463_v26, %v1440_v38  ;;  %v1745_v58 = vmul.f32 %v1744_v50, %v3491_v28  ;;  %v1883_v38 = vmul.f32 %v1881_v57, %v3649_v32 }
 0x249   : > { %1676 = vrot.lane.b32.xlu1 %v1671_v55, %s3982_s22  ;;  %1901 = vrot.lane.b32.xlu0 %v1897_v61, %s3978_s25 }
 0x24b   : > { %v1337_v63 = vpop.permute.xlu1 %1336  ;;  %v1478_v0 = vpop.permute.xlu0 %1477 }
 0x24c   : > { %v1341_v2 = vadd.f32 %v1337_v63, %v1313_v3  ;;  %v1483_v45 = vadd.f32 %v1478_v0, %v1455_v36  ;;  %v1911_v0 = vmul.f32 %v1909_v17, %v3649_v32  ;;  %v1746_v17 = vmul.f32 %v1744_v50, %v3635_v8 }
 0x24d   : > { %1847 = vrot.lane.b32.xlu1 %v1842_v34, %s3982_s22  ;;  %1914 = vrot.lane.b32.xlu0 %v1910_v12, %s3978_s25 }
 0x24f   : > { %v1352_v53 = vpop.permute.xlu1 %1351  ;;  %v1491_v7 = vpop.permute.xlu0 %1490 }
 0x250   : > { %v1356_v35 = vadd.f32 %v1352_v53, %v1328_v46  ;;  %v1496_v27 = vadd.f32 %v1491_v7, %v1468_v14 }
 0x251   : > { %1860 = vrot.lane.b32.xlu1 %v1855_v29, %s3982_s22  ;;  %s2064_s22 = sshll.u32 %s2621_s18, 4 }
 0x252   : > { %v3820_v18 = vadd.f32 %v1562_v42, %v1356_v35 }
 0x253   : > { %v1365_v54 = vpop.permute.xlu1 %1364  ;;  %v1506_v39 = vpop.permute.xlu0 %1505 }
 0x254   : > { %v1369_v10 = vadd.f32 %v1365_v54, %v1341_v2  ;;  %v1511_v37 = vadd.f32 %v1506_v39, %v1483_v45 }
 0x255   : > { %1691 = vrot.lane.b32.xlu1 %v1686_v60, %s3977_s28 }
 0x256   : > { %v3831_v56 = vadd.f32 %v1567_v9, %v1369_v10 }
 0x257   : > { %v1396_v4 = vpop.permute.xlu1 %1395  ;;  %v1519_v11 = vpop.permute.xlu0 %1518 }
 0x258   : > { %v1400_v1 = vadd.f32 %v1396_v4, %v3672_v20  ;;  %v1524_v43 = vadd.f32 %v1519_v11, %v1496_v27  ;;  %v1751_v4 = vmul.f32 %v1749_v16, %v3649_v32 }
 0x259   : > { %1704 = vrot.lane.b32.xlu1 %v1699_v51, %s3977_s28 }
 0x25b   : > { %v1409_v19 = vpop.permute.xlu1 %1408  ;;  %v1534_v31 = vpop.permute.xlu0 %1533 }
 0x25c   : > { %v1413_v49 = vadd.f32 %v1409_v19, %v3690_v59  ;;  %v1539_v21 = vadd.f32 %v1534_v31, %v1511_v37 }
 0x25d   : > { %1875 = vrot.lane.b32.xlu1 %v1870_v5, %s3977_s28 }
 0x25e   : > { %v1747_v40 = vadd.f32 %v1745_v58, %v1539_v21 }
 0x25f   : > { %v1424_v20 = vpop.permute.xlu1 %1423  ;;  %v1547_v62 = vpop.permute.xlu0 %1546 }
 0x260   : > { %v1428_v22 = vadd.f32 %v1424_v20, %v1400_v1  ;;  %v1552_v44 = vadd.f32 %v1547_v62, %v1524_v43 }
 0x261   : > { %1888 = vrot.lane.b32.xlu1 %v1883_v38, %s3977_s28  ;;  %s187_s28 = scalar_lea.vmem [#allocation11], %s2064_s22 }
 0x262   : > { %v1752_v59 = vadd.f32 %v1750_v30, %v1552_v44  ;;  %s1957_s24 = sshll.u32 %s187_s28, 4  ;;  %s3881_s24 = int_to_ptr.vmem [resolvable:$true] %s1957_s24 }
 0x263   : > { %v1437_v25 = vpop.permute.xlu1 %1436  ;;  %v1578_v28 = vpop.permute.xlu0 %1577  ;;  %s2331_s10 = scalar_lea.vmem %s3881_s24, 256 }
 0x264   : > { %v1441_v3 = vadd.f32 %v1437_v25, %v1413_v49  ;;  %v1583_v36 = vadd.f32 %v1578_v28, %v3721_v23  ;;  %p2332_p4 = scmp.ne.s32.totalorder %s3881_s24, %s2331_s10 }
 0x265   : > { %1719 = vrot.lane.b32.xlu1 %v1714_v24, %s3978_s25 }
 0x266   : > { %p2333_p2 = pnand %p2332_p4, %p3983_p8 }
 0x267   : > { %v1452_v57 = vpop.permute.xlu1 %1451  ;;  %v1591_v47 = vpop.permute.xlu0 %1590 }
 0x268   : > { %v1456_v26 = vadd.f32 %v1452_v57, %v1428_v22  ;;  %v1596_v55 = vadd.f32 %v1591_v47, %v3737_v48  ;;  %p2334_p12 = pneg %p2333_p2 }
 0x269   : > { %1732 = vrot.lane.b32.xlu1 %v1727_v52, %s3978_s25 }
 0x26b   : > { %v1465_v61 = vpop.permute.xlu1 %1464  ;;  %v1762_v46 = vpop.permute.xlu0 %1761 }
 0x26c   : > { %v1469_v13 = vadd.f32 %v1465_v61, %v1441_v3  ;;  %v1767_v23 = vadd.f32 %v1762_v46, %v1747_v40 }
 0x26d   : > { %1903 = vrot.lane.b32.xlu1 %v1898_v15, %s3978_s25 }
 0x26f   : > { %v1480_v14 = vpop.permute.xlu1 %1479  ;;  %v1775_v63 = vpop.permute.xlu0 %1774 }
 0x270   : > { %v1484_v41 = vadd.f32 %v1480_v14, %v1456_v26  ;;  %v1780_v6 = vadd.f32 %v1775_v63, %v1752_v59 }
 0x271   : > { %1916 = vrot.lane.b32.xlu1 %v1911_v0, %s3978_s25  ;;  %s2186_s25 = sshll.u32 %s2409_s12, 8  ;;  %s2438_s12 = smov [#allocation11]  }
 0x272   : > { %s3879_s5 = scalar_lea.hbm %s3933_s2, %s2186_s25  ;;  %s2335_s6 = sshll.u32 %s2438_s12, 4  ;;  %s2336_s6 = int_to_ptr.vmem [resolvable:$false] %s2335_s6 }
 0x273   : > { %v1493_v48 = vpop.permute.xlu1 %1492  ;;  %v1606_v34 = vpop.permute.xlu0 %1605  ;;  %s2337_s27 = scalar_lea.vmem %s2336_s6, 512  ;;  %p2338_p0 = scmp.lt.s32.totalorder %s3881_s24, %s2336_s6 }
 0x274   : > { %v1497_v12 = vadd.f32 %v1493_v48, %v1469_v13  ;;  %v1611_v2 = vadd.f32 %v1606_v34, %v1583_v36  ;;  %p2339_p3 = scmp.lt.s32.totalorder %s2337_s27, %s2331_s10 }
 0x276   : > { %p2340_p5 = por %p2339_p3, %p2338_p0 }
 0x277   : > { %v1508_v45 = vpop.permute.xlu1 %1507  ;;  %v1619_v53 = vpop.permute.xlu0 %1618 }
 0x278   : > { %v1512_v33 = vadd.f32 %v1508_v45, %v1484_v41  ;;  %v1624_v7 = vadd.f32 %v1619_v53, %v1596_v55  ;;  %p2341_p11 = pnand %p2340_p5, %p2334_p12 }
 0x27b   : > { %v1521_v29 = vpop.permute.xlu1 %1520  ;;  %v1790_v35 = vpop.permute.xlu0 %1789 }
 0x27c   : > { %v1525_v27 = vadd.f32 %v1521_v29, %v1497_v12  ;;  %v1795_v52 = vadd.f32 %v1790_v35, %v1767_v23 }
 0x27f   : > { %v1536_v42 = vpop.permute.xlu1 %1535  ;;  %v1803_v54 = vpop.permute.xlu0 %1802 }
 0x280   : > { %v1540_v39 = vadd.f32 %v1536_v42, %v1512_v33  ;;  %v1808_v15 = vadd.f32 %v1803_v54, %v1780_v6 }
 0x282   : > { %v1748_v60 = vadd.f32 %v1746_v17, %v1540_v39 }
 0x283   : > { %v1549_v10 = vpop.permute.xlu1 %1548  ;;  %v1634_v37 = vpop.permute.xlu0 %1633 }
 0x284   : > { %v1553_v9 = vadd.f32 %v1549_v10, %v1525_v27  ;;  %v1639_v26 = vadd.f32 %v1634_v37, %v1611_v2 }
 0x286   : > { %v1753_v11 = vadd.f32 %v1751_v4, %v1553_v9 }
 0x287   : > { %v1580_v51 = vpop.permute.xlu1 %1579  ;;  %v1647_v1 = vpop.permute.xlu0 %1646 }
 0x288   : > { %v1584_v43 = vadd.f32 %v1580_v51, %v3820_v18  ;;  %v1652_v63 = vadd.f32 %v1647_v1, %v1624_v7 }
 0x28b   : > { %v1593_v19 = vpop.permute.xlu1 %1592  ;;  %v1818_v31 = vpop.permute.xlu0 %1817 }
 0x28c   : > { %v1597_v5 = vadd.f32 %v1593_v19, %v3831_v56  ;;  %v1823_v55 = vadd.f32 %v1818_v31, %v1795_v52 }
 0x28f   : > { %v1764_v49 = vpop.permute.xlu1 %1763  ;;  %v1831_v21 = vpop.permute.xlu0 %1830 }
 0x290   : > { %v1768_v58 = vadd.f32 %v1764_v49, %v1748_v60  ;;  %v1836_v0 = vadd.f32 %v1831_v21, %v1808_v15 }
 0x293   : > { %v1777_v40 = vpop.permute.xlu1 %1776  ;;  %v1662_v8 = vpop.permute.xlu0 %1661 }
 0x294   : > { %v1781_v50 = vadd.f32 %v1777_v40, %v1753_v11  ;;  %v1667_v13 = vadd.f32 %v1662_v8, %v1639_v26 }
 0x297   : > { %v1608_v20 = vpop.permute.xlu1 %1607  ;;  %v1675_v62 = vpop.permute.xlu0 %1674 }
 0x298   : > { %v1612_v38 = vadd.f32 %v1608_v20, %v1584_v43  ;;  %v1680_v45 = vadd.f32 %v1675_v62, %v1652_v63 }
 0x29b   : > { %v1621_v22 = vpop.permute.xlu1 %1620  ;;  %v1846_v32 = vpop.permute.xlu0 %1845 }
 0x29c   : > { %v1625_v16 = vadd.f32 %v1621_v22, %v1597_v5  ;;  %v1851_v14 = vadd.f32 %v1846_v32, %v1823_v55 }
 0x29f   : > { %v1792_v44 = vpop.permute.xlu1 %1791  ;;  %v1859_v30 = vpop.permute.xlu0 %1858 }
 0x2a0   : > { %v1864_v53 = vadd.f32 %v1859_v30, %v1836_v0  ;;  %v1796_v43 = vadd.f32 %v1792_v44, %v1768_v58 }
 0x2a3   : > { %v1805_v59 = vpop.permute.xlu1 %1804  ;;  %v1690_v18 = vpop.permute.xlu0 %1689 }
 0x2a4   : > { %v1695_v41 = vadd.f32 %v1690_v18, %v1667_v13  ;;  %v1809_v49 = vadd.f32 %v1805_v59, %v1781_v50 }
 0x2a7   : > { %v1636_v25 = vpop.permute.xlu1 %1635  ;;  %v1703_v28 = vpop.permute.xlu0 %1702 }
 0x2a8   : > { %v1708_v27 = vadd.f32 %v1703_v28, %v1680_v45  ;;  %v1640_v19 = vadd.f32 %v1636_v25, %v1612_v38 }
 0x2ab   : > { %v1649_v24 = vpop.permute.xlu1 %1648  ;;  %v1874_v56 = vpop.permute.xlu0 %1873 }
 0x2ac   : > { %v1879_v48 = vadd.f32 %v1874_v56, %v1851_v14  ;;  %v1653_v8 = vadd.f32 %v1649_v24, %v1625_v16 }
 0x2af   : > { %v1820_v3 = vpop.permute.xlu1 %1819  ;;  %v1887_v36 = vpop.permute.xlu0 %1886 }
 0x2b0   : > { %v1892_v42 = vadd.f32 %v1887_v36, %v1864_v53  ;;  %v1824_v31 = vadd.f32 %v1820_v3, %v1796_v43 }
 0x2b3   : > { %v1833_v57 = vpop.permute.xlu1 %1832  ;;  %v1718_v47 = vpop.permute.xlu0 %1717 }
 0x2b4   : > { %v1723_v33 = vadd.f32 %v1718_v47, %v1695_v41  ;;  %v1837_v20 = vadd.f32 %v1833_v57, %v1809_v49 }
 0x2b7   : > { %v1664_v61 = vpop.permute.xlu1 %1663  ;;  %v1731_v46 = vpop.permute.xlu0 %1730 }
 0x2b8   : > { %v1736_v39 = vadd.f32 %v1731_v46, %v1708_v27  ;;  %v1668_v21 = vadd.f32 %v1664_v61, %v1640_v19 }
 0x2bb   : > { %v1677_v34 = vpop.permute.xlu1 %1676  ;;  %v1902_v12 = vpop.permute.xlu0 %1901 }
 0x2bc   : > { %v1907_v29 = vadd.f32 %v1902_v12, %v1879_v48  ;;  %v1681_v18 = vadd.f32 %v1677_v34, %v1653_v8 }
 0x2be   : > { %v1922_v23 = vadd.f32 %v1907_v29, %v1723_v33 }
 0x2bf   : > { %v1848_v2 = vpop.permute.xlu1 %1847  ;;  %v1915_v35 = vpop.permute.xlu0 %1914 }
 0x2c0   : > { %v1920_v17 = vadd.f32 %v1915_v35, %v1892_v42  ;;  %v1852_v40 = vadd.f32 %v1848_v2, %v1824_v31 }
 0x2c2   : > { %v1924_v6 = vadd.f32 %v1920_v17, %v1736_v39 }
 0x2c3   : > { %v1861_v54 = vpop.permute.xlu1 %1860 }
 0x2c4   : > { %v1926_v7 = vadd.f32 %v1924_v6, %v1922_v23  ;;  %v1865_v28 = vadd.f32 %v1861_v54, %v1837_v20 }
 0x2c6   : > { %v2178_v60 = vmul.f32 -1.442695, %v1926_v7 }
 0x2c7   : > { %v1692_v10 = vpop.permute.xlu1 %1691 }
 0x2c8   : > { %2280 = vpow2.f32 %v2178_v60  ;;  %v1696_v62 = vadd.f32 %v1692_v10, %v1668_v21 }
 0x2cb   : > { %v1705_v37 = vpop.permute.xlu1 %1704 }
 0x2cc   : > { %v1709_v58 = vadd.f32 %v1705_v37, %v1681_v18 }
 0x2cf   : > { %v1876_v9 = vpop.permute.xlu1 %1875 }
 0x2d0   : > { %v1880_v22 = vadd.f32 %v1876_v9, %v1852_v40 }
 0x2d2   : > { %v2281_v4 = vpop.eup %2280 }
 0x2d3   : > { %v1934_v11 = vadd.f32 1.0, %v2281_v4  ;;  %v1889_v51 = vpop.permute.xlu1 %1888 }
 0x2d4   : > { %v1893_v38 = vadd.f32 %v1889_v51, %v1865_v28 }
 0x2d5   : > { %2282 = vrcp.f32 %v1934_v11 }
 0x2d7   : > { %v1720_v1 = vpop.permute.xlu1 %1719 }
 0x2d8   : > { %v1724_v56 = vadd.f32 %v1720_v1, %v1696_v62 }
 0x2db   : > { %v1733_v5 = vpop.permute.xlu1 %1732 }
 0x2dc   : > { %v1737_v59 = vadd.f32 %v1733_v5, %v1709_v58 }
 0x2df   : > { %v2283_v32 = vpop.eup %2282  ;;  %v1904_v30 = vpop.permute.xlu1 %1903 }
 0x2e0   : > { %v1908_v36 = vadd.f32 %v1904_v30, %v1880_v22  ;;  %1941 = vst.msk [vmem:[%s187_s28] sm:$0xff] %vm1940_vm6, %v2283_v32 }
 0x2e2   : > { %v1923_v50 = vadd.f32 %v1908_v36, %v1724_v56 }
 0x2e3   : > { %v1917_v44 = vpop.permute.xlu1 %1916 }
 0x2e4   : > { %v1921_v16 = vadd.f32 %v1917_v44, %v1893_v38 }
 0x2e6   : > { %v1925_v25 = vadd.f32 %v1921_v16, %v1737_v59 }
 0x2e8   : > { %v1927_v24 = vadd.f32 %v1925_v25, %v1923_v50 }
 0x2ea   : > { %v2179_v3 = vmul.f32 -1.442695, %v1927_v24 }
 0x2ec   : > { %2284 = vpow2.f32 %v2179_v3 }
 0x2f6   : > { %v2285_v57 = vpop.eup %2284 }
 0x2f7   : > { %v1935_v47 = vadd.f32 1.0, %v2285_v57 }
 0x2f9   : > { %2286 = vrcp.f32 %v1935_v47 }
 0x303   : > { %v2287_v52 = vpop.eup %2286 }
 0x304   : > { %1942 = vst.msk [vmem:[%s187_s28 + $0x8] sm:$0xff] %vm1940_vm6, %v2287_v52 }
 0x305   : > { %2344 = shalt.err (!%p2341_p11)
}
 0x306   : > { %s2345_s1 = scalar_lea.hbm %s3879_s5, 256  ;;  %s2349_s17 = scalar_lea.hbm %s3933_s2, 512 }
 0x307   : > { %p2346_p13 = scmp.ne.s32.totalorder %s3879_s5, %s2345_s1  ;;  %p2350_p6 = scmp.lt.u32.totalorder %s3879_s5, %s3933_s2 }
 0x308   : > { %p2351_p9 = scmp.lt.u32.totalorder %s2349_s17, %s2345_s1  ;;  %p2353_p4 = scmp.lt.u32.totalorder %s2345_s1, %s3879_s5 }
 0x309   : > { %p2347_p7 = pnand %p2346_p13, %p3983_p8 }
 0x30a   : > { %p2352_p1 = por %p2351_p9, %p2350_p6 }
 0x30b   : > { %p2348_p10 = pneg %p2347_p7 }
 0x30c   : > { %p2354_p2 = por %p2353_p4, %p2352_p1 }
 0x30e   : > { %p2355_p12 = pnand %p2354_p2, %p2348_p10 }
 0x310   : > { %2358 = shalt.err (!%p2355_p12)
}
 0x311   : > { %s2439_s3 = smov 128   ;;  %s2440_s19 = smov 8  }
 0x312   : > { %2193 = dma.vmem_to_hbm [thread:$0]  (%p3983_p8), %s3881_s24, 256, %s3879_s5, %s1944_s0, %s2439_s3, %s2439_s3, %s2440_s19  }
 0x313 PF: > { %s1972_s7 = sand.u32 1, %s2397_s9   ;;  %p3984_p0 = scmp.ne.s32.totalorder %s3962_s20, 0 }
 0x314   : > { %p3985_p3 = scmp.ge.s32.totalorder %s2417_s14, 2  ;;  %s1973_s16 = scalar_lea.sflag [#allocation8], %s1972_s7 }
 0x316   : > { %p2204_p5 = pnand %p3985_p3, %p3984_p0 }
 0x318   : > { %2392 = dma.done.wait (!%p2204_p5), %s1973_s16, 256  }
 0x319   : > { %2394 = vsyncadd (!%p2204_p5), %s1973_s16, 4294967040  ;;  %s19_s14 = sadd.s32 1, %s2417_s14   ;;  %s3986_s9 = sld [smem:[#allocation15_spill]] }
 0x31a   : > { %p16_p11 = scmp.ge.s32.totalorder %s19_s14, 4   ;;  %s3987_s10 = sld [smem:[#allocation16_spill]] }
 0x31b   : > { %s3988_s11 = sld [smem:[#allocation19_spill]]  ;;  %s3989_s12 = sld [smem:[#allocation17_spill]] }
 0x31c   : > { %s3990_s13 = sld [smem:[#allocation18_spill]]  ;;  %18 = sbr.rel (!%p16_p11) target bundleno = 10 (0xa), region = 86 }
 0x323   :  { %1978 = vsyncpa [#allocation7], 1 }
 0x324   :  { %1980 = vsyncpa [#allocation7 + $0x1], 1 }
 0x325   :  { %1981 = vsyncpa [#allocation8], 1 }
 0x326   :  { %1983 = vsyncpa [#allocation8 + $0x1], 1 }
 0x327   :  { %1984 = vsyncpa [#allocation9], 1 }
 0x328   :  { %1986 = vsyncpa [#allocation9 + $0x1], 1 }

</bundles_post_ra>
